<compile_context>
chip_gen: v7x
topology: tpu7x:2x2x1
jax: 0.10.0
libtpu: 0.0.40
codegen_flags: <defaults>
</compile_context>

<pallas_src>
import jax
import jax.numpy as jnp
from jax.experimental import pallas as pl
from jax.experimental.pallas import tpu as pltpu

CPAD = 128  # lane-dense channel padding for conv outputs / fc2 logits


def _round_up(x, m):
    return ((x + m - 1) // m) * m


# ---------------------------------------------------------------------------
# Fused conv (matmul over im2col patches) + 2x2 max-pool + bias + ReLU.
# ---------------------------------------------------------------------------
def _conv_relu_pool_kernel(p_ref, w_ref, b_ref, o_ref):
    # p_ref: (4, Mt, K) bf16  im2col rows, 4 leading slots = 2x2 pool candidates
    # w_ref: (K, 128)   bf16  flattened conv weight (dy, dx, cin) x cout(padded)
    # b_ref: (1, 128)   f32
    # o_ref: (Mt, 128)  bf16  pooled output rows (batch folded into M)
    w = w_ref[...]
    res = jnp.dot(p_ref[0], w, preferred_element_type=jnp.float32)
    for j in range(1, 4):  # statically unrolled 2x2 max-pool over candidates
        res = jnp.maximum(
            res, jnp.dot(p_ref[j], w, preferred_element_type=jnp.float32))
    # bias + ReLU applied once after the pooling max (ReLU is monotone)
    o_ref[...] = jnp.maximum(res + b_ref[0, :], 0.0).astype(o_ref.dtype)


def conv_relu_pool(x, w_flat, b_row, *, m_tile=1024):
    """x: (N, H, W, Cin) bf16, w_flat: (9*Cin, 128) bf16, b_row: (1, 128) f32.
    Returns maxpool2x2(relu(conv3x3_pad1(x))) -> (N, H//2, W//2, 128) bf16
    (channels beyond the real Cout are zero)."""
    N, H, W, Cin = x.shape
    K = 9 * Cin
    Ho, Wo = H // 2, W // 2
    M = N * Ho * Wo
    CP = w_flat.shape[1]

    # --- XLA glue (data movement only): pad, im2col, pool-candidate grouping --
    xp = jnp.pad(x, ((0, 0), (1, 1), (1, 1), (0, 0)))
    patches = jnp.stack(
        [xp[:, dy:dy + H, dx:dx + W, :] for dy in range(3) for dx in range(3)],
        axis=3,
    ).reshape(N, H, W, K)                                   # (N, H, W, 9*Cin)
    # group the 4 pooling candidates on a leading axis; fold batch into M
    pp = patches.reshape(N, Ho, 2, Wo, 2, K).transpose(2, 4, 0, 1, 3, 5)
    pp = pp.reshape(4, M, K)                                # (4, N*Ho*Wo, K)

    m_tile = min(m_tile, _round_up(M, 8))
    Mpad = _round_up(M, m_tile)
    if Mpad != M:
        pp = jnp.pad(pp, ((0, 0), (0, Mpad - M), (0, 0)))

    out = pl.pallas_call(
        _conv_relu_pool_kernel,
        out_shape=jax.ShapeDtypeStruct((Mpad, CP), x.dtype),
        grid_spec=pltpu.PrefetchScalarGridSpec(
            num_scalar_prefetch=0,
            grid=(Mpad // m_tile,),
            in_specs=[
                pl.BlockSpec((4, m_tile, K), lambda m: (0, m, 0)),
                pl.BlockSpec((K, CP), lambda m: (0, 0)),
                pl.BlockSpec((1, CP), lambda m: (0, 0)),
            ],
            out_specs=pl.BlockSpec((m_tile, CP), lambda m: (m, 0)),
        ),
        compiler_params=pltpu.CompilerParams(
            dimension_semantics=("parallel",)),
    )(pp, w_flat, b_row)
    return out[:M].reshape(N, Ho, Wo, CP)


# ---------------------------------------------------------------------------
# FC head: fc1 -> ReLU -> (dropout: identity at inference) -> fc2 (padded)
# ---------------------------------------------------------------------------
def _mlp_kernel(x_ref, w1_ref, b1_ref, w2_ref, b2_ref, o_ref):
    # x_ref: (Nt, F) bf16; w1: (F, 128) bf16; w2: (128, 128) bf16 (padded)
    # b1/b2: (1, 128) f32; o_ref: (Nt, 128) f32 (cols >= 2 are zero)
    h = jnp.dot(x_ref[...], w1_ref[...], preferred_element_type=jnp.float32)
    h = jnp.maximum(h + b1_ref[0, :], 0.0)
    # TODO(synk): nn.Dropout(0.3) is identity in eval mode; no RNG mask applied.
    out = jnp.dot(h.astype(w2_ref.dtype), w2_ref[...],
                  preferred_element_type=jnp.float32)
    o_ref[...] = (out + b2_ref[0, :]).astype(o_ref.dtype)


def mlp(x, w1, b1, w2, b2, *, n_tile=256):
    N, F = x.shape
    Hd = w1.shape[1]
    OP = w2.shape[1]
    n_tile = min(n_tile, _round_up(N, 8))
    Npad = _round_up(N, n_tile)
    if Npad != N:
        x = jnp.pad(x, ((0, Npad - N), (0, 0)))

    out = pl.pallas_call(
        _mlp_kernel,
        out_shape=jax.ShapeDtypeStruct((Npad, OP), jnp.float32),
        grid_spec=pltpu.PrefetchScalarGridSpec(
            num_scalar_prefetch=0,
            grid=(Npad // n_tile,),
            in_specs=[
                pl.BlockSpec((n_tile, F), lambda i: (i, 0)),
                pl.BlockSpec((F, Hd), lambda i: (0, 0)),
                pl.BlockSpec((1, Hd), lambda i: (0, 0)),
                pl.BlockSpec((Hd, OP), lambda i: (0, 0)),
                pl.BlockSpec((1, OP), lambda i: (0, 0)),
            ],
            out_specs=pl.BlockSpec((n_tile, OP), lambda i: (i, 0)),
        ),
        compiler_params=pltpu.CompilerParams(
            dimension_semantics=("parallel",)),
    )(x, w1, b1, w2, b2)
    return out[:N]


# ---------------------------------------------------------------------------
# Full forward pass (matches PyTorch SimpleCNN.forward semantics, eval mode)
# ---------------------------------------------------------------------------
@jax.jit
def simple_cnn_forward(x_nchw, params):
    x = jnp.transpose(x_nchw, (0, 2, 3, 1)).astype(jnp.bfloat16)   # NCHW->NHWC
    x = conv_relu_pool(x, params["conv1_w"], params["conv1_b"])    # (N,14,14,128)
    x = conv_relu_pool(x[..., :32],                                # real conv1 cout=32
                       params["conv2_w"], params["conv2_b"])       # (N,7,7,128)
    N = x.shape[0]
    # flatten keeps the 128-padded channel axis; fc1_w was padded with zero rows
    # and permuted at init so this is a free, lane-aligned reshape.
    x = x.reshape(N, 7 * 7 * CPAD)
    logits = mlp(x, params["fc1_w"], params["fc1_b"],
                 params["fc2_w"], params["fc2_b"])
    return logits[:, :2]                                           # (N, 2)


# ---------------------------------------------------------------------------
# Parameters
# ---------------------------------------------------------------------------
def init_params(key):
    """Raw params in PyTorch-equivalent layout (HWIO convs, fc1 rows in
    NCHW-flatten order, fc weights as [in, out])."""
    ks = jax.random.split(key, 8)
    s = 0.05
    return {
        "conv1_w": s * jax.random.normal(ks[0], (3, 3, 3, 32), jnp.float32),
        "conv1_b": s * jax.random.normal(ks[1], (32,), jnp.float32),
        "conv2_w": s * jax.random.normal(ks[2], (3, 3, 32, 64), jnp.float32),
        "conv2_b": s * jax.random.normal(ks[3], (64,), jnp.float32),
        "fc1_w": s * jax.random.normal(ks[4], (64 * 7 * 7, 128), jnp.float32),
        "fc1_b": s * jax.random.normal(ks[5], (128,), jnp.float32),
        "fc2_w": s * jax.random.normal(ks[6], (128, 2), jnp.float32),
        "fc2_b": s * jax.random.normal(ks[7], (2,), jnp.float32),
    }


def prepare_params(raw):
    """One-time transforms: pad out-channels to 128 (lane-dense stores),
    permute + zero-pad fc1 rows to the 128-padded NHWC-flatten order, pad fc2
    logits to 128 columns, cast matmul weights to bf16."""
    def pad_conv(w, b):
        k = w.shape[0] * w.shape[1] * w.shape[2]
        cout = w.shape[3]
        wf = jnp.pad(w.reshape(k, cout), ((0, 0), (0, CPAD - cout)))
        bf = jnp.pad(b, (0, CPAD - cout)).reshape(1, CPAD)
        return wf.astype(jnp.bfloat16), bf.astype(jnp.float32)

    c1w, c1b = pad_conv(raw["conv1_w"], raw["conv1_b"])
    c2w, c2b = pad_conv(raw["conv2_w"], raw["conv2_b"])

    # fc1: PyTorch rows are indexed c*49 + h*7 + w (NCHW flatten).  Re-index to
    # h*7*128 + w*128 + c (padded-NHWC flatten); rows for padded channels are 0.
    fc1 = raw["fc1_w"].reshape(64, 7, 7, 128).transpose(1, 2, 0, 3)  # (7,7,64,128)
    fc1 = jnp.pad(fc1, ((0, 0), (0, 0), (0, CPAD - 64), (0, 0)))
    fc1_w = fc1.reshape(7 * 7 * CPAD, 128).astype(jnp.bfloat16)
    fc1_b = raw["fc1_b"].reshape(1, 128).astype(jnp.float32)

    fc2_w = jnp.pad(raw["fc2_w"], ((0, 0), (0, CPAD - 2))).astype(jnp.bfloat16)
    fc2_b = jnp.pad(raw["fc2_b"], (0, CPAD - 2)).reshape(1, CPAD)
    fc2_b = fc2_b.astype(jnp.float32)

    return {
        "conv1_w": c1w, "conv1_b": c1b,
        "conv2_w": c2w, "conv2_b": c2b,
        "fc1_w": fc1_w, "fc1_b": fc1_b,
        "fc2_w": fc2_w, "fc2_b": fc2_b,
    }


if __name__ == "__main__":
    key = jax.random.PRNGKey(0)
    kx, kp = jax.random.split(key)
    # ColoredMNIST-style input: batch=2, 3 channels, 28x28 (NCHW like PyTorch)
    x = jax.random.normal(kx, (2, 3, 28, 28), jnp.float32)
    params = prepare_params(init_params(kp))

    logits = simple_cnn_forward(x, params)
    jax.block_until_ready(logits)
    assert logits.shape == (2, 2), logits.shape
    assert bool(jnp.all(jnp.isfinite(logits)))
    print("KERNEL_OK")
</pallas_src>

<mosaic_0001>
module attributes {stable_mosaic.version = 11 : i64} {
  func.func @_conv_relu_pool_kernel(%arg0: i32, %arg1: memref<4x392x27xbf16, #tpu.memory_space<vmem>>, %arg2: memref<27x128xbf16, #tpu.memory_space<vmem>>, %arg3: memref<1x128xf32, #tpu.memory_space<vmem>>, %arg4: memref<392x128xbf16, #tpu.memory_space<vmem>>) attributes {dimension_semantics = [#tpu.dimension_semantics<parallel>], iteration_bounds = array<i64: 1>, scalar_prefetch = 0 : i64, scratch_operands = 0 : i64, tpu.core_type = #tpu.core_type<tc>, window_params = [{transform_indices = @transform_0, window_bounds = array<i64: 4, 392, 27>}, {pipeline_mode = #tpu.pipeline_mode<synchronous>, transform_indices = @transform_1, window_bounds = array<i64: 27, 128>}, {pipeline_mode = #tpu.pipeline_mode<synchronous>, transform_indices = @transform_2, window_bounds = array<i64: 1, 128>}, {transform_indices = @transform_3, window_bounds = array<i64: 392, 128>}]} {
    %c0 = arith.constant 0 : index
    %c0_0 = arith.constant 0 : index
    %0 = vector.load %arg2[%c0, %c0_0] : memref<27x128xbf16, #tpu.memory_space<vmem>>, vector<27x128xbf16>
    %c0_1 = arith.constant 0 : index
    %c0_2 = arith.constant 0 : index
    %c0_3 = arith.constant 0 : index
    %1 = vector.load %arg1[%c0_1, %c0_2, %c0_3] : memref<4x392x27xbf16, #tpu.memory_space<vmem>>, vector<1x392x27xbf16>
    %2 = vector.shape_cast %1 : vector<1x392x27xbf16> to vector<392x27xbf16>
    %cst = arith.constant dense<0.000000e+00> : vector<392x128xf32>
    %3 = tpu.matmul %2, %0, %cst {dimension_numbers = #tpu.dot_dimension_numbers<[1], [0], [0], [1], [0, 0, 1, 1], [], []>} : vector<392x27xbf16>, vector<27x128xbf16>, vector<392x128xf32> -> vector<392x128xf32>
    %c1 = arith.constant 1 : index
    %c0_4 = arith.constant 0 : index
    %c0_5 = arith.constant 0 : index
    %4 = vector.load %arg1[%c1, %c0_4, %c0_5] : memref<4x392x27xbf16, #tpu.memory_space<vmem>>, vector<1x392x27xbf16>
    %5 = vector.shape_cast %4 : vector<1x392x27xbf16> to vector<392x27xbf16>
    %cst_6 = arith.constant dense<0.000000e+00> : vector<392x128xf32>
    %6 = tpu.matmul %5, %0, %cst_6 {dimension_numbers = #tpu.dot_dimension_numbers<[1], [0], [0], [1], [0, 0, 1, 1], [], []>} : vector<392x27xbf16>, vector<27x128xbf16>, vector<392x128xf32> -> vector<392x128xf32>
    %7 = arith.maximumf %3, %6 : vector<392x128xf32>
    %c2 = arith.constant 2 : index
    %c0_7 = arith.constant 0 : index
    %c0_8 = arith.constant 0 : index
    %8 = vector.load %arg1[%c2, %c0_7, %c0_8] : memref<4x392x27xbf16, #tpu.memory_space<vmem>>, vector<1x392x27xbf16>
    %9 = vector.shape_cast %8 : vector<1x392x27xbf16> to vector<392x27xbf16>
    %cst_9 = arith.constant dense<0.000000e+00> : vector<392x128xf32>
    %10 = tpu.matmul %9, %0, %cst_9 {dimension_numbers = #tpu.dot_dimension_numbers<[1], [0], [0], [1], [0, 0, 1, 1], [], []>} : vector<392x27xbf16>, vector<27x128xbf16>, vector<392x128xf32> -> vector<392x128xf32>
    %11 = arith.maximumf %7, %10 : vector<392x128xf32>
    %c3 = arith.constant 3 : index
    %c0_10 = arith.constant 0 : index
    %c0_11 = arith.constant 0 : index
    %12 = vector.load %arg1[%c3, %c0_10, %c0_11] : memref<4x392x27xbf16, #tpu.memory_space<vmem>>, vector<1x392x27xbf16>
    %13 = vector.shape_cast %12 : vector<1x392x27xbf16> to vector<392x27xbf16>
    %cst_12 = arith.constant dense<0.000000e+00> : vector<392x128xf32>
    %14 = tpu.matmul %13, %0, %cst_12 {dimension_numbers = #tpu.dot_dimension_numbers<[1], [0], [0], [1], [0, 0, 1, 1], [], []>} : vector<392x27xbf16>, vector<27x128xbf16>, vector<392x128xf32> -> vector<392x128xf32>
    %15 = arith.maximumf %11, %14 : vector<392x128xf32>
    %c0_13 = arith.constant 0 : index
    %c0_14 = arith.constant 0 : index
    %16 = vector.load %arg3[%c0_13, %c0_14] : memref<1x128xf32, #tpu.memory_space<vmem>>, vector<1x128xf32>
    %17 = vector.shape_cast %16 : vector<1x128xf32> to vector<128xf32>
    %18 = vector.shape_cast %17 : vector<128xf32> to vector<1x128xf32>
    %19 = vector.broadcast %18 : vector<1x128xf32> to vector<392x128xf32>
    %20 = arith.addf %15, %19 : vector<392x128xf32>
    %cst_15 = arith.constant 0.000000e+00 : f32
    %21 = vector.broadcast %cst_15 : f32 to vector<392x128xf32>
    %22 = arith.maximumf %20, %21 : vector<392x128xf32>
    %23 = arith.truncf %22 : vector<392x128xf32> to vector<392x128xbf16>
    %c0_16 = arith.constant 0 : index
    %c0_17 = arith.constant 0 : index
    %24 = vector.load %arg4[%c0_16, %c0_17] : memref<392x128xbf16, #tpu.memory_space<vmem>>, vector<392x128xbf16>
    tpu.vector_store %arg4[%c0_16, %c0_17], %23 {strides = array<i32>} : memref<392x128xbf16, #tpu.memory_space<vmem>>, vector<392x128xbf16>,
    return
  }
  func.func @transform_0(%arg0: i32) -> (i32, i32, i32) {
    %c0_i32 = arith.constant 0 : i32
    %c0_i32_0 = arith.constant 0 : i32
    %c0_i32_1 = arith.constant 0 : i32
    return %c0_i32, %arg0, %c0_i32_0 : i32, i32, i32
  }
  func.func @transform_1(%arg0: i32) -> (i32, i32) {
    %c0_i32 = arith.constant 0 : i32
    %c0_i32_0 = arith.constant 0 : i32
    %c0_i32_1 = arith.constant 0 : i32
    return %c0_i32, %c0_i32_0 : i32, i32
  }
  func.func @transform_2(%arg0: i32) -> (i32, i32) {
    %c0_i32 = arith.constant 0 : i32
    %c0_i32_0 = arith.constant 0 : i32
    %c0_i32_1 = arith.constant 0 : i32
    return %c0_i32, %c0_i32_0 : i32, i32
  }
  func.func @transform_3(%arg0: i32) -> (i32, i32) {
    %c0_i32 = arith.constant 0 : i32
    %c0_i32_0 = arith.constant 0 : i32
    return %arg0, %c0_i32 : i32, i32
  }
}

module attributes {stable_mosaic.version = 11 : i64} {
  func.func @_conv_relu_pool_kernel(%arg0: i32, %arg1: memref<4x104x288xbf16, #tpu.memory_space<vmem>>, %arg2: memref<288x128xbf16, #tpu.memory_space<vmem>>, %arg3: memref<1x128xf32, #tpu.memory_space<vmem>>, %arg4: memref<104x128xbf16, #tpu.memory_space<vmem>>) attributes {dimension_semantics = [#tpu.dimension_semantics<parallel>], iteration_bounds = array<i64: 1>, scalar_prefetch = 0 : i64, scratch_operands = 0 : i64, tpu.core_type = #tpu.core_type<tc>, window_params = [{transform_indices = @transform_0, window_bounds = array<i64: 4, 104, 288>}, {pipeline_mode = #tpu.pipeline_mode<synchronous>, transform_indices = @transform_1, window_bounds = array<i64: 288, 128>}, {pipeline_mode = #tpu.pipeline_mode<synchronous>, transform_indices = @transform_2, window_bounds = array<i64: 1, 128>}, {transform_indices = @transform_3, window_bounds = array<i64: 104, 128>}]} {
    %c0 = arith.constant 0 : index
    %c0_0 = arith.constant 0 : index
    %0 = vector.load %arg2[%c0, %c0_0] : memref<288x128xbf16, #tpu.memory_space<vmem>>, vector<288x128xbf16>
    %c0_1 = arith.constant 0 : index
    %c0_2 = arith.constant 0 : index
    %c0_3 = arith.constant 0 : index
    %1 = vector.load %arg1[%c0_1, %c0_2, %c0_3] : memref<4x104x288xbf16, #tpu.memory_space<vmem>>, vector<1x104x288xbf16>
    %2 = vector.shape_cast %1 : vector<1x104x288xbf16> to vector<104x288xbf16>
    %cst = arith.constant dense<0.000000e+00> : vector<104x128xf32>
    %3 = tpu.matmul %2, %0, %cst {dimension_numbers = #tpu.dot_dimension_numbers<[1], [0], [0], [1], [0, 0, 1, 1], [], []>} : vector<104x288xbf16>, vector<288x128xbf16>, vector<104x128xf32> -> vector<104x128xf32>
    %c1 = arith.constant 1 : index
    %c0_4 = arith.constant 0 : index
    %c0_5 = arith.constant 0 : index
    %4 = vector.load %arg1[%c1, %c0_4, %c0_5] : memref<4x104x288xbf16, #tpu.memory_space<vmem>>, vector<1x104x288xbf16>
    %5 = vector.shape_cast %4 : vector<1x104x288xbf16> to vector<104x288xbf16>
    %cst_6 = arith.constant dense<0.000000e+00> : vector<104x128xf32>
    %6 = tpu.matmul %5, %0, %cst_6 {dimension_numbers = #tpu.dot_dimension_numbers<[1], [0], [0], [1], [0, 0, 1, 1], [], []>} : vector<104x288xbf16>, vector<288x128xbf16>, vector<104x128xf32> -> vector<104x128xf32>
    %7 = arith.maximumf %3, %6 : vector<104x128xf32>
    %c2 = arith.constant 2 : index
    %c0_7 = arith.constant 0 : index
    %c0_8 = arith.constant 0 : index
    %8 = vector.load %arg1[%c2, %c0_7, %c0_8] : memref<4x104x288xbf16, #tpu.memory_space<vmem>>, vector<1x104x288xbf16>
    %9 = vector.shape_cast %8 : vector<1x104x288xbf16> to vector<104x288xbf16>
    %cst_9 = arith.constant dense<0.000000e+00> : vector<104x128xf32>
    %10 = tpu.matmul %9, %0, %cst_9 {dimension_numbers = #tpu.dot_dimension_numbers<[1], [0], [0], [1], [0, 0, 1, 1], [], []>} : vector<104x288xbf16>, vector<288x128xbf16>, vector<104x128xf32> -> vector<104x128xf32>
    %11 = arith.maximumf %7, %10 : vector<104x128xf32>
    %c3 = arith.constant 3 : index
    %c0_10 = arith.constant 0 : index
    %c0_11 = arith.constant 0 : index
    %12 = vector.load %arg1[%c3, %c0_10, %c0_11] : memref<4x104x288xbf16, #tpu.memory_space<vmem>>, vector<1x104x288xbf16>
    %13 = vector.shape_cast %12 : vector<1x104x288xbf16> to vector<104x288xbf16>
    %cst_12 = arith.constant dense<0.000000e+00> : vector<104x128xf32>
    %14 = tpu.matmul %13, %0, %cst_12 {dimension_numbers = #tpu.dot_dimension_numbers<[1], [0], [0], [1], [0, 0, 1, 1], [], []>} : vector<104x288xbf16>, vector<288x128xbf16>, vector<104x128xf32> -> vector<104x128xf32>
    %15 = arith.maximumf %11, %14 : vector<104x128xf32>
    %c0_13 = arith.constant 0 : index
    %c0_14 = arith.constant 0 : index
    %16 = vector.load %arg3[%c0_13, %c0_14] : memref<1x128xf32, #tpu.memory_space<vmem>>, vector<1x128xf32>
    %17 = vector.shape_cast %16 : vector<1x128xf32> to vector<128xf32>
    %18 = vector.shape_cast %17 : vector<128xf32> to vector<1x128xf32>
    %19 = vector.broadcast %18 : vector<1x128xf32> to vector<104x128xf32>
    %20 = arith.addf %15, %19 : vector<104x128xf32>
    %cst_15 = arith.constant 0.000000e+00 : f32
    %21 = vector.broadcast %cst_15 : f32 to vector<104x128xf32>
    %22 = arith.maximumf %20, %21 : vector<104x128xf32>
    %23 = arith.truncf %22 : vector<104x128xf32> to vector<104x128xbf16>
    %c0_16 = arith.constant 0 : index
    %c0_17 = arith.constant 0 : index
    %24 = vector.load %arg4[%c0_16, %c0_17] : memref<104x128xbf16, #tpu.memory_space<vmem>>, vector<104x128xbf16>
    tpu.vector_store %arg4[%c0_16, %c0_17], %23 {strides = array<i32>} : memref<104x128xbf16, #tpu.memory_space<vmem>>, vector<104x128xbf16>,
    return
  }
  func.func @transform_0(%arg0: i32) -> (i32, i32, i32) {
    %c0_i32 = arith.constant 0 : i32
    %c0_i32_0 = arith.constant 0 : i32
    %c0_i32_1 = arith.constant 0 : i32
    return %c0_i32, %arg0, %c0_i32_0 : i32, i32, i32
  }
  func.func @transform_1(%arg0: i32) -> (i32, i32) {
    %c0_i32 = arith.constant 0 : i32
    %c0_i32_0 = arith.constant 0 : i32
    %c0_i32_1 = arith.constant 0 : i32
    return %c0_i32, %c0_i32_0 : i32, i32
  }
  func.func @transform_2(%arg0: i32) -> (i32, i32) {
    %c0_i32 = arith.constant 0 : i32
    %c0_i32_0 = arith.constant 0 : i32
    %c0_i32_1 = arith.constant 0 : i32
    return %c0_i32, %c0_i32_0 : i32, i32
  }
  func.func @transform_3(%arg0: i32) -> (i32, i32) {
    %c0_i32 = arith.constant 0 : i32
    %c0_i32_0 = arith.constant 0 : i32
    return %arg0, %c0_i32 : i32, i32
  }
}

module attributes {stable_mosaic.version = 11 : i64} {
  func.func @_mlp_kernel(%arg0: i32, %arg1: memref<8x6272xbf16, #tpu.memory_space<vmem>>, %arg2: memref<6272x128xbf16, #tpu.memory_space<vmem>>, %arg3: memref<1x128xf32, #tpu.memory_space<vmem>>, %arg4: memref<128x128xbf16, #tpu.memory_space<vmem>>, %arg5: memref<1x128xf32, #tpu.memory_space<vmem>>, %arg6: memref<8x128xf32, #tpu.memory_space<vmem>>) attributes {dimension_semantics = [#tpu.dimension_semantics<parallel>], iteration_bounds = array<i64: 1>, scalar_prefetch = 0 : i64, scratch_operands = 0 : i64, tpu.core_type = #tpu.core_type<tc>, window_params = [{transform_indices = @transform_0, window_bounds = array<i64: 8, 6272>}, {pipeline_mode = #tpu.pipeline_mode<synchronous>, transform_indices = @transform_1, window_bounds = array<i64: 6272, 128>}, {pipeline_mode = #tpu.pipeline_mode<synchronous>, transform_indices = @transform_2, window_bounds = array<i64: 1, 128>}, {pipeline_mode = #tpu.pipeline_mode<synchronous>, transform_indices = @transform_3, window_bounds = array<i64: 128, 128>}, {pipeline_mode = #tpu.pipeline_mode<synchronous>, transform_indices = @transform_4, window_bounds = array<i64: 1, 128>}, {transform_indices = @transform_5, window_bounds = array<i64: 8, 128>}]} {
    %c0 = arith.constant 0 : index
    %c0_0 = arith.constant 0 : index
    %0 = vector.load %arg1[%c0, %c0_0] : memref<8x6272xbf16, #tpu.memory_space<vmem>>, vector<8x6272xbf16>
    %c0_1 = arith.constant 0 : index
    %c0_2 = arith.constant 0 : index
    %1 = vector.load %arg2[%c0_1, %c0_2] : memref<6272x128xbf16, #tpu.memory_space<vmem>>, vector<6272x128xbf16>
    %cst = arith.constant dense<0.000000e+00> : vector<8x128xf32>
    %2 = tpu.matmul %0, %1, %cst {dimension_numbers = #tpu.dot_dimension_numbers<[1], [0], [0], [1], [0, 0, 1, 1], [], []>} : vector<8x6272xbf16>, vector<6272x128xbf16>, vector<8x128xf32> -> vector<8x128xf32>
    %c0_3 = arith.constant 0 : index
    %c0_4 = arith.constant 0 : index
    %3 = vector.load %arg3[%c0_3, %c0_4] : memref<1x128xf32, #tpu.memory_space<vmem>>, vector<1x128xf32>
    %4 = vector.shape_cast %3 : vector<1x128xf32> to vector<128xf32>
    %5 = vector.shape_cast %4 : vector<128xf32> to vector<1x128xf32>
    %6 = vector.broadcast %5 : vector<1x128xf32> to vector<8x128xf32>
    %7 = arith.addf %2, %6 : vector<8x128xf32>
    %cst_5 = arith.constant 0.000000e+00 : f32
    %8 = vector.broadcast %cst_5 : f32 to vector<8x128xf32>
    %9 = arith.maximumf %7, %8 : vector<8x128xf32>
    %10 = arith.truncf %9 : vector<8x128xf32> to vector<8x128xbf16>
    %c0_6 = arith.constant 0 : index
    %c0_7 = arith.constant 0 : index
    %11 = vector.load %arg4[%c0_6, %c0_7] : memref<128x128xbf16, #tpu.memory_space<vmem>>, vector<128x128xbf16>
    %cst_8 = arith.constant dense<0.000000e+00> : vector<8x128xf32>
    %12 = tpu.matmul %10, %11, %cst_8 {dimension_numbers = #tpu.dot_dimension_numbers<[1], [0], [0], [1], [0, 0, 1, 1], [], []>} : vector<8x128xbf16>, vector<128x128xbf16>, vector<8x128xf32> -> vector<8x128xf32>
    %c0_9 = arith.constant 0 : index
    %c0_10 = arith.constant 0 : index
    %13 = vector.load %arg5[%c0_9, %c0_10] : memref<1x128xf32, #tpu.memory_space<vmem>>, vector<1x128xf32>
    %14 = vector.shape_cast %13 : vector<1x128xf32> to vector<128xf32>
    %15 = vector.shape_cast %14 : vector<128xf32> to vector<1x128xf32>
    %16 = vector.broadcast %15 : vector<1x128xf32> to vector<8x128xf32>
    %17 = arith.addf %12, %16 : vector<8x128xf32>
    %c0_11 = arith.constant 0 : index
    %c0_12 = arith.constant 0 : index
    %18 = vector.load %arg6[%c0_11, %c0_12] : memref<8x128xf32, #tpu.memory_space<vmem>>, vector<8x128xf32>
    tpu.vector_store %arg6[%c0_11, %c0_12], %17 {strides = array<i32>} : memref<8x128xf32, #tpu.memory_space<vmem>>, vector<8x128xf32>,
    return
  }
  func.func @transform_0(%arg0: i32) -> (i32, i32) {
    %c0_i32 = arith.constant 0 : i32
    %c0_i32_0 = arith.constant 0 : i32
    return %arg0, %c0_i32 : i32, i32
  }
  func.func @transform_1(%arg0: i32) -> (i32, i32) {
    %c0_i32 = arith.constant 0 : i32
    %c0_i32_0 = arith.constant 0 : i32
    %c0_i32_1 = arith.constant 0 : i32
    return %c0_i32, %c0_i32_0 : i32, i32
  }
  func.func @transform_2(%arg0: i32) -> (i32, i32) {
    %c0_i32 = arith.constant 0 : i32
    %c0_i32_0 = arith.constant 0 : i32
    %c0_i32_1 = arith.constant 0 : i32
    return %c0_i32, %c0_i32_0 : i32, i32
  }
  func.func @transform_3(%arg0: i32) -> (i32, i32) {
    %c0_i32 = arith.constant 0 : i32
    %c0_i32_0 = arith.constant 0 : i32
    %c0_i32_1 = arith.constant 0 : i32
    return %c0_i32, %c0_i32_0 : i32, i32
  }
  func.func @transform_4(%arg0: i32) -> (i32, i32) {
    %c0_i32 = arith.constant 0 : i32
    %c0_i32_0 = arith.constant 0 : i32
    %c0_i32_1 = arith.constant 0 : i32
    return %c0_i32, %c0_i32_0 : i32, i32
  }
  func.func @transform_5(%arg0: i32) -> (i32, i32) {
    %c0_i32 = arith.constant 0 : i32
    %c0_i32_0 = arith.constant 0 : i32
    return %arg0, %c0_i32 : i32, i32
  }
}

</mosaic_0001>

<bundles_post_ra>
// kernel: simple_cnn_forward.3
= control target key start
LH: loop header
LB: loop body
LE: loop exit
PB: predicated region body
PF: predicated region fallthrough
CT: control target
= control target key end

     0   :  { %vm278_vm0 = vcmask 1044480   ;;  %vm279_vm1 = vcmask 1045504   ;;  %v4890_v0 = vmov 0.0   ;;  %v3680_v2 = vmov 65535   ;;  %s4886_s1 = inlined_call_operand.vmem [shape: bf16[27,128], index: 1, kind: input, shape index: {}]   ;;  %s4887_s0 = inlined_call_operand.vmem [shape: bf16[4,392,27], index: 0, kind: input, shape index: {}]   ;;  %s4888_s2 = inlined_call_operand.vmem [shape: f32[1,128], index: 2, kind: input, shape index: {}]   ;;  %s4889_s3 = inlined_call_operand.vmem [shape: bf16[392,128], index: 3, kind: output, shape index: {}]  }
   0x1   :  { %3158 = vmatprep.subr.bf16.mxu0 %v4890_v0  ;;  %3262 = vmatprep.subr.bf16.mxu1 %v4890_v0  ;;  %v3577_v1 = vld [vmem:[%s4886_s1] sm:$0xff]   ;;  %v280_v3 = vsel %vm278_vm0, 4294967295, %v3680_v2  ;;  %v3578_v4 = vld [vmem:[%s4886_s1 + $0x8] sm:$0x3f]   ;;  %vm3681_vm2 = vmmov 0   ;;  %vm202_vm3 = vcmask 220160  }
   0x2   :  { %3159 = vmatpush3.bf16.msra.mxu0 %v3577_v1  ;;  %3263 = vmatpush3.bf16.msra.mxu1 %v3577_v1  ;;  %v281_v5 = vsel %vm279_vm1, %v280_v3, 0  ;;  %v3579_v7 = vld [vmem:[%s4887_s0] sm:$0xff]   ;;  %v3581_v9 = vld [vmem:[%s4887_s0 + $0x8] sm:$0xff]   ;;  %v3583_v11 = vld [vmem:[%s4887_s0 + $0x10] sm:$0xff]  }
   0x3   :  { %3160 = vmatprep.subr.bf16.mxu0 %v4890_v0  ;;  %3264 = vmatprep.subr.bf16.mxu1 %v4890_v0  ;;  %v283_v6 = vand.u32 %v3578_v4, %v281_v5  ;;  %v3580_v8 = vld [vmem:[%s4887_s0 + $0xc4] sm:$0xff]   ;;  %v3582_v10 = vld [vmem:[%s4887_s0 + $0xcc] sm:$0xff]   ;;  %v3584_v12 = vld [vmem:[%s4887_s0 + $0xd4] sm:$0xff]  }
   0x4   :  { %3162 = vmatprep.mubr.msk.bf16.mxu0 %vm3681_vm2, %v4890_v0  ;;  %3266 = vmatprep.mubr.msk.bf16.mxu1 %vm3681_vm2, %v4890_v0  ;;  %v3585_v13 = vld [vmem:[%s4887_s0 + $0x18] sm:$0xff]   ;;  %v3587_v15 = vld [vmem:[%s4887_s0 + $0x20] sm:$0xff]   ;;  %v3589_v17 = vld [vmem:[%s4887_s0 + $0x28] sm:$0xff]  }
   0x5   :  { %v3586_v14 = vld [vmem:[%s4887_s0 + $0xdc] sm:$0xff]   ;;  %v3588_v16 = vld [vmem:[%s4887_s0 + $0xe4] sm:$0xff]   ;;  %v3590_v18 = vld [vmem:[%s4887_s0 + $0xec] sm:$0xff]  }
   0x6   :  { %3161 = vmatpush3.bf16.msra.mxu0 %v283_v6  ;;  %3265 = vmatpush3.bf16.msra.mxu1 %v283_v6  ;;  %v3591_v19 = vld [vmem:[%s4887_s0 + $0x30] sm:$0xff]   ;;  %v3593_v21 = vld [vmem:[%s4887_s0 + $0x38] sm:$0xff]   ;;  %v3595_v23 = vld [vmem:[%s4887_s0 + $0x40] sm:$0xff]  }
   0x7   :  { %3366 = vmatprep.subr.bf16.mxu0 %v4890_v0  ;;  %3470 = vmatprep.subr.bf16.mxu1 %v4890_v0  ;;  %v3592_v20 = vld [vmem:[%s4887_s0 + $0xf4] sm:$0xff]   ;;  %v3594_v22 = vld [vmem:[%s4887_s0 + $0xfc] sm:$0xff]   ;;  %v3596_v24 = vld [vmem:[%s4887_s0 + $0x104] sm:$0xff]  }
   0x8   :  { %v3597_v25 = vld [vmem:[%s4887_s0 + $0x48] sm:$0xff]   ;;  %v3599_v27 = vld [vmem:[%s4887_s0 + $0x50] sm:$0xff]   ;;  %v3601_v29 = vld [vmem:[%s4887_s0 + $0x58] sm:$0xff]  }
   0x9   :  { %3163 = vmatmul.mubr.msk.bf16.vlgmr.msra.gmra.mrb[0].mxu0 %vm202_vm3, %v3579_v7  ;;  %3267 = vmatmul.mubr.msk.bf16.vlgmr.msra.gmra.mrb[0].mxu1 %vm202_vm3, %v3580_v8  ;;  %v3598_v26 = vld [vmem:[%s4887_s0 + $0x10c] sm:$0xff]   ;;  %v3600_v28 = vld [vmem:[%s4887_s0 + $0x114] sm:$0xff]   ;;  %v3602_v30 = vld [vmem:[%s4887_s0 + $0x11c] sm:$0xff]  }
   0xa   :  { %3367 = vmatpush3.bf16.msra.mxu0 %v3577_v1  ;;  %3471 = vmatpush3.bf16.msra.mxu1 %v3577_v1  ;;  %v3603_v31 = vld [vmem:[%s4887_s0 + $0x60] sm:$0xff]   ;;  %v3605_v33 = vld [vmem:[%s4887_s0 + $0x68] sm:$0xff]   ;;  %v3607_v35 = vld [vmem:[%s4887_s0 + $0x70] sm:$0xff]  }
   0xb   :  { %3166 = vmatprep.mubr.msk.bf16.mxu0 %vm3681_vm2, %v4890_v0  ;;  %3270 = vmatprep.mubr.msk.bf16.mxu1 %vm3681_vm2, %v4890_v0  ;;  %v3604_v32 = vld [vmem:[%s4887_s0 + $0x124] sm:$0xff]   ;;  %v3606_v34 = vld [vmem:[%s4887_s0 + $0x12c] sm:$0xff]   ;;  %v3608_v36 = vld [vmem:[%s4887_s0 + $0x134] sm:$0xff]  }
   0xc   :  { %3368 = vmatprep.subr.bf16.mxu0 %v4890_v0  ;;  %3472 = vmatprep.subr.bf16.mxu1 %v4890_v0  ;;  %v3609_v37 = vld [vmem:[%s4887_s0 + $0x78] sm:$0xff]   ;;  %v3611_v39 = vld [vmem:[%s4887_s0 + $0x80] sm:$0xff]   ;;  %v3613_v41 = vld [vmem:[%s4887_s0 + $0x88] sm:$0xff]  }
   0xd   :  { %v3610_v38 = vld [vmem:[%s4887_s0 + $0x13c] sm:$0xff]   ;;  %v3612_v40 = vld [vmem:[%s4887_s0 + $0x144] sm:$0xff]   ;;  %v3614_v42 = vld [vmem:[%s4887_s0 + $0x14c] sm:$0xff]  }
   0xe   :  { %3369 = vmatpush3.bf16.msra.mxu0 %v283_v6  ;;  %3473 = vmatpush3.bf16.msra.mxu1 %v283_v6  ;;  %v3615_v43 = vld [vmem:[%s4887_s0 + $0x90] sm:$0xff]   ;;  %v3617_v45 = vld [vmem:[%s4887_s0 + $0x98] sm:$0xff]   ;;  %v3619_v47 = vld [vmem:[%s4887_s0 + $0xa0] sm:$0xff]  }
   0xf   :  { %v3616_v44 = vld [vmem:[%s4887_s0 + $0x154] sm:$0xff]   ;;  %v3618_v46 = vld [vmem:[%s4887_s0 + $0x15c] sm:$0xff]   ;;  %v3620_v48 = vld [vmem:[%s4887_s0 + $0x164] sm:$0xff]  }
  0x10   :  { %v3621_v49 = vld [vmem:[%s4887_s0 + $0xa8] sm:$0xff]   ;;  %v3623_v51 = vld [vmem:[%s4887_s0 + $0xb0] sm:$0xff]   ;;  %v3625_v53 = vld [vmem:[%s4887_s0 + $0xb8] sm:$0xff]  }
  0x11   :  { %3167 = vmatmul.mubr.msk.bf16.gmra.mrb[4].mxu0 %vm202_vm3, %v3581_v9  ;;  %3271 = vmatmul.mubr.msk.bf16.gmra.mrb[4].mxu1 %vm202_vm3, %v3582_v10  ;;  %v3622_v50 = vld [vmem:[%s4887_s0 + $0x16c] sm:$0xff]   ;;  %v3624_v52 = vld [vmem:[%s4887_s0 + $0x174] sm:$0xff]   ;;  %v3626_v54 = vld [vmem:[%s4887_s0 + $0x17c] sm:$0xff]  }
  0x12   :  { %3170 = vmatprep.mubr.msk.bf16.mxu0 %vm3681_vm2, %v4890_v0  ;;  %3274 = vmatprep.mubr.msk.bf16.mxu1 %vm3681_vm2, %v4890_v0  ;;  %v3627_v55 = vld [vmem:[%s4887_s0 + $0xc0] ss:$0 sps:$4 sm:$0xff]   ;;  %v3628_v56 = vld [vmem:[%s4887_s0 + $0x184] ss:$0 sps:$4 sm:$0xff]   ;;  %v3629_v57 = vld [vmem:[%s4887_s0 + $0x188] sm:$0xff]  }
  0x13   :  { %v3630_v58 = vld [vmem:[%s4887_s0 + $0x24c] sm:$0xff]   ;;  %v3632_v60 = vld [vmem:[%s4887_s0 + $0x254] sm:$0xff]   ;;  %v3634_v4 = vld [vmem:[%s4887_s0 + $0x25c] sm:$0xff]  }
  0x14   :  { %v3631_v59 = vld [vmem:[%s4887_s0 + $0x190] sm:$0xff]   ;;  %v3633_v3 = vld [vmem:[%s4887_s0 + $0x198] sm:$0xff]  }
  0x19   :  { %3171 = vmatmul.mubr.msk.bf16.gmra.mrb[8].mxu0 %vm202_vm3, %v3583_v11  ;;  %3275 = vmatmul.mubr.msk.bf16.gmra.mrb[8].mxu1 %vm202_vm3, %v3584_v12 }
  0x1a   :  { %3174 = vmatprep.mubr.msk.bf16.mxu0 %vm3681_vm2, %v4890_v0  ;;  %3278 = vmatprep.mubr.msk.bf16.mxu1 %vm3681_vm2, %v4890_v0 }
  0x21   :  { %3175 = vmatmul.mubr.msk.bf16.gmra.mrb[12].mxu0 %vm202_vm3, %v3585_v13  ;;  %3279 = vmatmul.mubr.msk.bf16.gmra.mrb[12].mxu1 %vm202_vm3, %v3586_v14 }
  0x22   :  { %3178 = vmatprep.mubr.msk.bf16.mxu0 %vm3681_vm2, %v4890_v0  ;;  %3282 = vmatprep.mubr.msk.bf16.mxu1 %vm3681_vm2, %v4890_v0 }
  0x29   :  { %3179 = vmatmul.mubr.msk.bf16.gmra.mrb[16].mxu0 %vm202_vm3, %v3587_v15  ;;  %3283 = vmatmul.mubr.msk.bf16.gmra.mrb[16].mxu1 %vm202_vm3, %v3588_v16  ;;  %v3635_v15 = vld [vmem:[%s4887_s0 + $0x1a0] sm:$0xff]  }
  0x2a   :  { %3182 = vmatprep.mubr.msk.bf16.mxu0 %vm3681_vm2, %v4890_v0  ;;  %3286 = vmatprep.mubr.msk.bf16.mxu1 %vm3681_vm2, %v4890_v0  ;;  %v3636_v16 = vld [vmem:[%s4887_s0 + $0x264] sm:$0xff]  }
  0x31   :  { %3183 = vmatmul.mubr.msk.bf16.gmra.mrb[20].mxu0 %vm202_vm3, %v3589_v17  ;;  %3287 = vmatmul.mubr.msk.bf16.gmra.mrb[20].mxu1 %vm202_vm3, %v3590_v18 }
  0x32   :  { %3186 = vmatprep.mubr.msk.bf16.mxu0 %vm3681_vm2, %v4890_v0  ;;  %3290 = vmatprep.mubr.msk.bf16.mxu1 %vm3681_vm2, %v4890_v0 }
  0x39   :  { %3187 = vmatmul.mubr.msk.bf16.gmra.mrb[24].mxu0 %vm202_vm3, %v3591_v19  ;;  %3291 = vmatmul.mubr.msk.bf16.gmra.mrb[24].mxu1 %vm202_vm3, %v3592_v20 }
  0x3a   :  { %3190 = vmatprep.mubr.msk.bf16.mxu0 %vm3681_vm2, %v4890_v0  ;;  %3294 = vmatprep.mubr.msk.bf16.mxu1 %vm3681_vm2, %v4890_v0 }
  0x41   :  { %3191 = vmatmul.mubr.msk.bf16.gmra.mrb[28].mxu0 %vm202_vm3, %v3593_v21  ;;  %3295 = vmatmul.mubr.msk.bf16.gmra.mrb[28].mxu1 %vm202_vm3, %v3594_v22 }
  0x42   :  { %3194 = vmatprep.mubr.msk.bf16.mxu0 %vm3681_vm2, %v4890_v0  ;;  %3298 = vmatprep.mubr.msk.bf16.mxu1 %vm3681_vm2, %v4890_v0 }
  0x49   :  { %3195 = vmatmul.mubr.msk.bf16.gmra.mrb[32].mxu0 %vm202_vm3, %v3595_v23  ;;  %3299 = vmatmul.mubr.msk.bf16.gmra.mrb[32].mxu1 %vm202_vm3, %v3596_v24 }
  0x4a   :  { %3198 = vmatprep.mubr.msk.bf16.mxu0 %vm3681_vm2, %v4890_v0  ;;  %3302 = vmatprep.mubr.msk.bf16.mxu1 %vm3681_vm2, %v4890_v0 }
  0x51   :  { %3199 = vmatmul.mubr.msk.bf16.gmra.mrb[36].mxu0 %vm202_vm3, %v3597_v25  ;;  %3303 = vmatmul.mubr.msk.bf16.gmra.mrb[36].mxu1 %vm202_vm3, %v3598_v26 }
  0x52   :  { %3202 = vmatprep.mubr.msk.bf16.mxu0 %vm3681_vm2, %v4890_v0  ;;  %3306 = vmatprep.mubr.msk.bf16.mxu1 %vm3681_vm2, %v4890_v0 }
  0x59   :  { %3203 = vmatmul.mubr.msk.bf16.gmra.mrb[40].mxu0 %vm202_vm3, %v3599_v27  ;;  %3307 = vmatmul.mubr.msk.bf16.gmra.mrb[40].mxu1 %vm202_vm3, %v3600_v28  ;;  %v3637_v27 = vld [vmem:[%s4887_s0 + $0x1a8] sm:$0xff]  }
  0x5a   :  { %3206 = vmatprep.mubr.msk.bf16.mxu0 %vm3681_vm2, %v4890_v0  ;;  %3310 = vmatprep.mubr.msk.bf16.mxu1 %vm3681_vm2, %v4890_v0  ;;  %v3638_v28 = vld [vmem:[%s4887_s0 + $0x26c] sm:$0xff]  }
  0x61   :  { %3207 = vmatmul.mubr.msk.bf16.gmra.mrb[44].mxu0 %vm202_vm3, %v3601_v29  ;;  %3311 = vmatmul.mubr.msk.bf16.gmra.mrb[44].mxu1 %vm202_vm3, %v3602_v30 }
  0x62   :  { %3210 = vmatprep.mubr.msk.bf16.mxu0 %vm3681_vm2, %v4890_v0  ;;  %3314 = vmatprep.mubr.msk.bf16.mxu1 %vm3681_vm2, %v4890_v0 }
  0x69   :  { %3211 = vmatmul.mubr.msk.bf16.gmra.mrb[48].mxu0 %vm202_vm3, %v3603_v31  ;;  %3315 = vmatmul.mubr.msk.bf16.gmra.mrb[48].mxu1 %vm202_vm3, %v3604_v32 }
  0x6a   :  { %3214 = vmatprep.mubr.msk.bf16.mxu0 %vm3681_vm2, %v4890_v0  ;;  %3318 = vmatprep.mubr.msk.bf16.mxu1 %vm3681_vm2, %v4890_v0 }
  0x71   :  { %3215 = vmatmul.mubr.msk.bf16.gmra.mrb[52].mxu0 %vm202_vm3, %v3605_v33  ;;  %3319 = vmatmul.mubr.msk.bf16.gmra.mrb[52].mxu1 %vm202_vm3, %v3606_v34 }
  0x72   :  { %3218 = vmatprep.mubr.msk.bf16.mxu0 %vm3681_vm2, %v4890_v0  ;;  %3322 = vmatprep.mubr.msk.bf16.mxu1 %vm3681_vm2, %v4890_v0 }
  0x79   :  { %3219 = vmatmul.mubr.msk.bf16.gmra.mrb[56].mxu0 %vm202_vm3, %v3607_v35  ;;  %3323 = vmatmul.mubr.msk.bf16.gmra.mrb[56].mxu1 %vm202_vm3, %v3608_v36 }
  0x7a   :  { %3222 = vmatprep.mubr.msk.bf16.mxu0 %vm3681_vm2, %v4890_v0  ;;  %3326 = vmatprep.mubr.msk.bf16.mxu1 %vm3681_vm2, %v4890_v0 }
  0x81   :  { %3223 = vmatmul.mubr.msk.bf16.gmra.mrb[60].mxu0 %vm202_vm3, %v3609_v37  ;;  %3327 = vmatmul.mubr.msk.bf16.gmra.mrb[60].mxu1 %vm202_vm3, %v3610_v38 }
  0x82   :  { %3226 = vmatprep.mubr.msk.bf16.mxu0 %vm3681_vm2, %v4890_v0  ;;  %3330 = vmatprep.mubr.msk.bf16.mxu1 %vm3681_vm2, %v4890_v0 }
  0x89   :  { %3227 = vmatmul.mubr.msk.bf16.gmra.mrb[64].mxu0 %vm202_vm3, %v3611_v39  ;;  %3331 = vmatmul.mubr.msk.bf16.gmra.mrb[64].mxu1 %vm202_vm3, %v3612_v40  ;;  %v3639_v39 = vld [vmem:[%s4887_s0 + $0x1b0] sm:$0xff]  }
  0x8a   :  { %3230 = vmatprep.mubr.msk.bf16.mxu0 %vm3681_vm2, %v4890_v0  ;;  %3334 = vmatprep.mubr.msk.bf16.mxu1 %vm3681_vm2, %v4890_v0  ;;  %v3640_v40 = vld [vmem:[%s4887_s0 + $0x274] sm:$0xff]  }
  0x91   :  { %3231 = vmatmul.mubr.msk.bf16.gmra.mrb[68].mxu0 %vm202_vm3, %v3613_v41  ;;  %3335 = vmatmul.mubr.msk.bf16.gmra.mrb[68].mxu1 %vm202_vm3, %v3614_v42 }
  0x92   :  { %3234 = vmatprep.mubr.msk.bf16.mxu0 %vm3681_vm2, %v4890_v0  ;;  %3338 = vmatprep.mubr.msk.bf16.mxu1 %vm3681_vm2, %v4890_v0 }
  0x99   :  { %3235 = vmatmul.mubr.msk.bf16.gmra.mrb[72].mxu0 %vm202_vm3, %v3615_v43  ;;  %3339 = vmatmul.mubr.msk.bf16.gmra.mrb[72].mxu1 %vm202_vm3, %v3616_v44 }
  0x9a   :  { %3238 = vmatprep.mubr.msk.bf16.mxu0 %vm3681_vm2, %v4890_v0  ;;  %3342 = vmatprep.mubr.msk.bf16.mxu1 %vm3681_vm2, %v4890_v0 }
  0xa1   :  { %3239 = vmatmul.mubr.msk.bf16.gmra.mrb[76].mxu0 %vm202_vm3, %v3617_v45  ;;  %3343 = vmatmul.mubr.msk.bf16.gmra.mrb[76].mxu1 %vm202_vm3, %v3618_v46 }
  0xa2   :  { %3242 = vmatprep.mubr.msk.bf16.mxu0 %vm3681_vm2, %v4890_v0  ;;  %3346 = vmatprep.mubr.msk.bf16.mxu1 %vm3681_vm2, %v4890_v0 }
  0xa9   :  { %3243 = vmatmul.mubr.msk.bf16.gmra.mrb[80].mxu0 %vm202_vm3, %v3619_v47  ;;  %3347 = vmatmul.mubr.msk.bf16.gmra.mrb[80].mxu1 %vm202_vm3, %v3620_v48 }
  0xaa   :  { %3246 = vmatprep.mubr.msk.bf16.mxu0 %vm3681_vm2, %v4890_v0  ;;  %3350 = vmatprep.mubr.msk.bf16.mxu1 %vm3681_vm2, %v4890_v0 }
  0xb1   :  { %3247 = vmatmul.mubr.msk.bf16.gmra.mrb[84].mxu0 %vm202_vm3, %v3621_v49  ;;  %3351 = vmatmul.mubr.msk.bf16.gmra.mrb[84].mxu1 %vm202_vm3, %v3622_v50 }
  0xb2   :  { %3250 = vmatprep.mubr.msk.bf16.mxu0 %vm3681_vm2, %v4890_v0  ;;  %3354 = vmatprep.mubr.msk.bf16.mxu1 %vm3681_vm2, %v4890_v0 }
  0xb9   :  { %3251 = vmatmul.mubr.msk.bf16.gmra.mrb[88].mxu0 %vm202_vm3, %v3623_v51  ;;  %3355 = vmatmul.mubr.msk.bf16.gmra.mrb[88].mxu1 %vm202_vm3, %v3624_v52  ;;  %v3641_v51 = vld [vmem:[%s4887_s0 + $0x1b8] sm:$0xff]  }
  0xba   :  { %3254 = vmatprep.mubr.msk.bf16.mxu0 %vm3681_vm2, %v4890_v0  ;;  %3358 = vmatprep.mubr.msk.bf16.mxu1 %vm3681_vm2, %v4890_v0  ;;  %v3642_v52 = vld [vmem:[%s4887_s0 + $0x27c] sm:$0xff]  }
  0xc1   :  { %3255 = vmatmul.mubr.msk.bf16.gmra.mrb[92].mxu0 %vm202_vm3, %v3625_v53  ;;  %3359 = vmatmul.mubr.msk.bf16.gmra.mrb[92].mxu1 %vm202_vm3, %v3626_v54 }
  0xc2   :  { %3258 = vmatprep.mubr.msk.bf16.mxu0 %vm3681_vm2, %v4890_v0  ;;  %3362 = vmatprep.mubr.msk.bf16.mxu1 %vm3681_vm2, %v4890_v0 }
  0xc9   :  { %3259 = vmatmul.mubr.msk.bf16.gmra.mrb[96].mxu0 %vm202_vm3, %v3627_v55  ;;  %3363 = vmatmul.mubr.msk.bf16.gmra.mrb[96].mxu1 %vm202_vm3, %v3628_v56 }
  0xca   :  { %3370 = vmatprep.mubr.msk.bf16.mxu0 %vm3681_vm2, %v4890_v0  ;;  %3474 = vmatprep.mubr.msk.bf16.mxu1 %vm3681_vm2, %v4890_v0 }
  0xd1   :  { %3371 = vmatmul.mubr.msk.bf16.vlgmr.msra.gmra.mrb[100].mxu0 %vm202_vm3, %v3629_v57  ;;  %3475 = vmatmul.mubr.msk.bf16.vlgmr.msra.gmra.mrb[100].mxu1 %vm202_vm3, %v3630_v58 }
  0xd2   :  { %3374 = vmatprep.mubr.msk.bf16.mxu0 %vm3681_vm2, %v4890_v0  ;;  %3478 = vmatprep.mubr.msk.bf16.mxu1 %vm3681_vm2, %v4890_v0 }
  0xd9   :  { %3375 = vmatmul.mubr.msk.bf16.gmra.mrb[104].mxu0 %vm202_vm3, %v3631_v59  ;;  %3479 = vmatmul.mubr.msk.bf16.gmra.mrb[104].mxu1 %vm202_vm3, %v3632_v60 }
  0xda   :  { %3378 = vmatprep.mubr.msk.bf16.mxu0 %vm3681_vm2, %v4890_v0  ;;  %3482 = vmatprep.mubr.msk.bf16.mxu1 %vm3681_vm2, %v4890_v0 }
  0xdc   :  { %v4044_v61 = vpop.f32.mrb[0].mxu0  ;;  %v4046_v62 = vpop.f32.mrb[0].mxu1 }
  0xdd   :  { %v3164_v1 = vpop.f32.mrb[1].mxu0  ;;  %v3268_v2 = vpop.f32.mrb[1].mxu1 }
  0xde   :  { %v4056_v5 = vpop.f32.mrb[2].mxu0  ;;  %v4058_v6 = vpop.f32.mrb[2].mxu1 }
  0xdf   :  { %v3165_v8 = vpop.f32.mrb[3].mxu0  ;;  %v3269_v9 = vpop.f32.mrb[3].mxu1 }
  0xe1   :  { %3379 = vmatmul.mubr.msk.bf16.gmra.mrb[108].mxu0 %vm202_vm3, %v3633_v3  ;;  %3483 = vmatmul.mubr.msk.bf16.gmra.mrb[108].mxu1 %vm202_vm3, %v3634_v4  ;;  %v3643_v3 = vld [vmem:[%s4887_s0 + $0x1c0] sm:$0xff]  }
  0xe2   :  { %3382 = vmatprep.mubr.msk.bf16.mxu0 %vm3681_vm2, %v4890_v0  ;;  %3486 = vmatprep.mubr.msk.bf16.mxu1 %vm3681_vm2, %v4890_v0  ;;  %v3644_v4 = vld [vmem:[%s4887_s0 + $0x284] sm:$0xff]  }
  0xe4   :  { %v4068_v10 = vpop.f32.mrb[4].mxu0  ;;  %v4070_v11 = vpop.f32.mrb[4].mxu1 }
  0xe5   :  { %v3168_v13 = vpop.f32.mrb[5].mxu0  ;;  %v3272_v14 = vpop.f32.mrb[5].mxu1 }
  0xe6   :  { %v4080_v17 = vpop.f32.mrb[6].mxu0  ;;  %v4082_v18 = vpop.f32.mrb[6].mxu1 }
  0xe7   :  { %v3169_v20 = vpop.f32.mrb[7].mxu0  ;;  %v3273_v21 = vpop.f32.mrb[7].mxu1 }
  0xe9   :  { %3383 = vmatmul.mubr.msk.bf16.gmra.mrb[112].mxu0 %vm202_vm3, %v3635_v15  ;;  %3487 = vmatmul.mubr.msk.bf16.gmra.mrb[112].mxu1 %vm202_vm3, %v3636_v16 }
  0xea   :  { %3386 = vmatprep.mubr.msk.bf16.mxu0 %vm3681_vm2, %v4890_v0  ;;  %3490 = vmatprep.mubr.msk.bf16.mxu1 %vm3681_vm2, %v4890_v0 }
  0xec   :  { %v4092_v22 = vpop.f32.mrb[8].mxu0  ;;  %v4094_v23 = vpop.f32.mrb[8].mxu1 }
  0xed   :  { %v3172_v25 = vpop.f32.mrb[9].mxu0  ;;  %v3276_v26 = vpop.f32.mrb[9].mxu1 }
  0xee   :  { %v4104_v29 = vpop.f32.mrb[10].mxu0  ;;  %v4106_v30 = vpop.f32.mrb[10].mxu1 }
  0xef   :  { %v3173_v32 = vpop.f32.mrb[11].mxu0  ;;  %v3277_v33 = vpop.f32.mrb[11].mxu1 }
  0xf1   :  { %3387 = vmatmul.mubr.msk.bf16.gmra.mrb[116].mxu0 %vm202_vm3, %v3637_v27  ;;  %3491 = vmatmul.mubr.msk.bf16.gmra.mrb[116].mxu1 %vm202_vm3, %v3638_v28  ;;  %v3645_v27 = vld [vmem:[%s4887_s0 + $0x1c8] sm:$0xff]  }
  0xf2   :  { %3390 = vmatprep.mubr.msk.bf16.mxu0 %vm3681_vm2, %v4890_v0  ;;  %3494 = vmatprep.mubr.msk.bf16.mxu1 %vm3681_vm2, %v4890_v0  ;;  %v3646_v28 = vld [vmem:[%s4887_s0 + $0x28c] sm:$0xff]  }
  0xf4   :  { %v4116_v34 = vpop.f32.mrb[12].mxu0  ;;  %v4118_v35 = vpop.f32.mrb[12].mxu1 }
  0xf5   :  { %v3176_v37 = vpop.f32.mrb[13].mxu0  ;;  %v3280_v38 = vpop.f32.mrb[13].mxu1 }
  0xf6   :  { %v4128_v41 = vpop.f32.mrb[14].mxu0  ;;  %v4130_v42 = vpop.f32.mrb[14].mxu1 }
  0xf7   :  { %v3177_v44 = vpop.f32.mrb[15].mxu0  ;;  %v3281_v45 = vpop.f32.mrb[15].mxu1 }
  0xf9   :  { %3391 = vmatmul.mubr.msk.bf16.gmra.mrb[120].mxu0 %vm202_vm3, %v3639_v39  ;;  %3495 = vmatmul.mubr.msk.bf16.gmra.mrb[120].mxu1 %vm202_vm3, %v3640_v40 }
  0xfa   :  { %3394 = vmatprep.mubr.msk.bf16.mxu0 %vm3681_vm2, %v4890_v0  ;;  %3498 = vmatprep.mubr.msk.bf16.mxu1 %vm3681_vm2, %v4890_v0 }
  0xfc   :  { %v4140_v46 = vpop.f32.mrb[16].mxu0  ;;  %v4142_v47 = vpop.f32.mrb[16].mxu1 }
  0xfd   :  { %v3180_v49 = vpop.f32.mrb[17].mxu0  ;;  %v3284_v50 = vpop.f32.mrb[17].mxu1 }
  0xfe   :  { %v4152_v53 = vpop.f32.mrb[18].mxu0  ;;  %v4154_v54 = vpop.f32.mrb[18].mxu1 }
  0xff   :  { %v3181_v56 = vpop.f32.mrb[19].mxu0  ;;  %v3285_v57 = vpop.f32.mrb[19].mxu1 }
 0x101   :  { %3395 = vmatmul.mubr.msk.bf16.gmra.mrb[124].mxu0 %vm202_vm3, %v3641_v51  ;;  %3499 = vmatmul.mubr.msk.bf16.gmra.mrb[124].mxu1 %vm202_vm3, %v3642_v52  ;;  %v3647_v51 = vld [vmem:[%s4887_s0 + $0x1d0] sm:$0xff]  }
 0x102   :  { %3398 = vmatprep.mubr.msk.bf16.mxu0 %vm3681_vm2, %v4890_v0  ;;  %3502 = vmatprep.mubr.msk.bf16.mxu1 %vm3681_vm2, %v4890_v0  ;;  %v3648_v52 = vld [vmem:[%s4887_s0 + $0x294] sm:$0xff]  }
 0x104   :  { %v4164_v58 = vpop.f32.mrb[20].mxu0  ;;  %v4166_v59 = vpop.f32.mrb[20].mxu1 }
 0x105   :  { %v3184_v1 = vpop.f32.mrb[21].mxu0  ;;  %v3288_v2 = vpop.f32.mrb[21].mxu1 }
 0x106   :  { %v4176_v8 = vpop.f32.mrb[22].mxu0  ;;  %v4178_v9 = vpop.f32.mrb[22].mxu1 }
 0x107   :  { %v3185_v14 = vpop.f32.mrb[23].mxu0  ;;  %v3289_v15 = vpop.f32.mrb[23].mxu1 }
 0x109   :  { %3399 = vmatmul.mubr.msk.bf16.gmra.mrb[128].mxu0 %vm202_vm3, %v3643_v3  ;;  %3503 = vmatmul.mubr.msk.bf16.gmra.mrb[128].mxu1 %vm202_vm3, %v3644_v4 }
 0x10a   :  { %3402 = vmatprep.mubr.msk.bf16.mxu0 %vm3681_vm2, %v4890_v0  ;;  %3506 = vmatprep.mubr.msk.bf16.mxu1 %vm3681_vm2, %v4890_v0 }
 0x10c   :  { %v4188_v16 = vpop.f32.mrb[24].mxu0  ;;  %v4190_v20 = vpop.f32.mrb[24].mxu1 }
 0x10d   :  { %v3188_v25 = vpop.f32.mrb[25].mxu0  ;;  %v3292_v26 = vpop.f32.mrb[25].mxu1 }
 0x10e   :  { %v4200_v32 = vpop.f32.mrb[26].mxu0  ;;  %v4202_v33 = vpop.f32.mrb[26].mxu1 }
 0x10f   :  { %v3189_v38 = vpop.f32.mrb[27].mxu0  ;;  %v3293_v39 = vpop.f32.mrb[27].mxu1 }
 0x111   :  { %3403 = vmatmul.mubr.msk.bf16.gmra.mrb[132].mxu0 %vm202_vm3, %v3645_v27  ;;  %3507 = vmatmul.mubr.msk.bf16.gmra.mrb[132].mxu1 %vm202_vm3, %v3646_v28  ;;  %v3649_v27 = vld [vmem:[%s4887_s0 + $0x1d8] sm:$0xff]  }
 0x112   :  { %3406 = vmatprep.mubr.msk.bf16.mxu0 %vm3681_vm2, %v4890_v0  ;;  %3510 = vmatprep.mubr.msk.bf16.mxu1 %vm3681_vm2, %v4890_v0  ;;  %v3650_v28 = vld [vmem:[%s4887_s0 + $0x29c] sm:$0xff]  }
 0x114   :  { %v4212_v40 = vpop.f32.mrb[28].mxu0  ;;  %v4214_v44 = vpop.f32.mrb[28].mxu1 }
 0x115   :  { %v3192_v49 = vpop.f32.mrb[29].mxu0  ;;  %v3296_v50 = vpop.f32.mrb[29].mxu1 }
 0x116   :  { %v4224_v56 = vpop.f32.mrb[30].mxu0  ;;  %v4226_v57 = vpop.f32.mrb[30].mxu1 }
 0x117   :  { %v3193_v2 = vpop.f32.mrb[31].mxu0  ;;  %v3297_v3 = vpop.f32.mrb[31].mxu1 }
 0x119   :  { %3407 = vmatmul.mubr.msk.bf16.gmra.mrb[136].mxu0 %vm202_vm3, %v3647_v51  ;;  %3511 = vmatmul.mubr.msk.bf16.gmra.mrb[136].mxu1 %vm202_vm3, %v3648_v52 }
 0x11a   :  { %3410 = vmatprep.mubr.msk.bf16.mxu0 %vm3681_vm2, %v4890_v0  ;;  %3514 = vmatprep.mubr.msk.bf16.mxu1 %vm3681_vm2, %v4890_v0 }
 0x11c   :  { %v4236_v4 = vpop.f32.mrb[32].mxu0  ;;  %v4238_v14 = vpop.f32.mrb[32].mxu1 }
 0x11d   :  { %v3196_v25 = vpop.f32.mrb[33].mxu0  ;;  %v3300_v26 = vpop.f32.mrb[33].mxu1 }
 0x11e   :  { %v4248_v38 = vpop.f32.mrb[34].mxu0  ;;  %v4250_v39 = vpop.f32.mrb[34].mxu1 }
 0x11f   :  { %v3197_v50 = vpop.f32.mrb[35].mxu0  ;;  %v3301_v51 = vpop.f32.mrb[35].mxu1 }
 0x121   :  { %3411 = vmatmul.mubr.msk.bf16.gmra.mrb[140].mxu0 %vm202_vm3, %v3649_v27  ;;  %3515 = vmatmul.mubr.msk.bf16.gmra.mrb[140].mxu1 %vm202_vm3, %v3650_v28  ;;  %v3651_v27 = vld [vmem:[%s4887_s0 + $0x1e0] sm:$0xff]  }
 0x122   :  { %3414 = vmatprep.mubr.msk.bf16.mxu0 %vm3681_vm2, %v4890_v0  ;;  %3518 = vmatprep.mubr.msk.bf16.mxu1 %vm3681_vm2, %v4890_v0  ;;  %v3652_v28 = vld [vmem:[%s4887_s0 + $0x2a4] sm:$0xff]  }
 0x124   :  { %v4260_v52 = vpop.f32.mrb[36].mxu0  ;;  %v4262_v2 = vpop.f32.mrb[36].mxu1 }
 0x125   :  { %v3200_v25 = vpop.f32.mrb[37].mxu0  ;;  %v3304_v26 = vpop.f32.mrb[37].mxu1 }
 0x126   :  { %v4272_v50 = vpop.f32.mrb[38].mxu0  ;;  %v4274_v51 = vpop.f32.mrb[38].mxu1 }
 0x127   :  { %v3201_v15 = vpop.f32.mrb[39].mxu0  ;;  %v3305_v1 = vpop.f32.mrb[39].mxu1 }
 0x128   :  { %v3653_v1 = vld [vmem:[%s4887_s0 + $0x1e8] sm:$0xff]  }
 0x129   :  { %3415 = vmatmul.mubr.msk.bf16.gmra.mrb[144].mxu0 %vm202_vm3, %v3651_v27  ;;  %3519 = vmatmul.mubr.msk.bf16.gmra.mrb[144].mxu1 %vm202_vm3, %v3652_v28  ;;  %v3654_v27 = vld [vmem:[%s4887_s0 + $0x2ac] sm:$0xff]  }
 0x12a   :  { %3418 = vmatprep.mubr.msk.bf16.mxu0 %vm3681_vm2, %v4890_v0  ;;  %3522 = vmatprep.mubr.msk.bf16.mxu1 %vm3681_vm2, %v4890_v0 }
 0x12c   :  { %v4284_v25 = vpop.f32.mrb[40].mxu0  ;;  %v4286_v26 = vpop.f32.mrb[40].mxu1 }
 0x12d   :  { %v3204_v49 = vpop.f32.mrb[41].mxu0  ;;  %v3308_v15 = vpop.f32.mrb[41].mxu1 }
 0x12e   :  { %v4296_v28 = vpop.f32.mrb[42].mxu0  ;;  %v4298_v45 = vpop.f32.mrb[42].mxu1 }
 0x12f   :  { %v3205_v21 = vpop.f32.mrb[43].mxu0  ;;  %v3309_v13 = vpop.f32.mrb[43].mxu1 }
 0x130   :  { %v3655_v13 = vld [vmem:[%s4887_s0 + $0x1f0] sm:$0xff]  }
 0x131   :  { %3419 = vmatmul.mubr.msk.bf16.gmra.mrb[148].mxu0 %vm202_vm3, %v3653_v1  ;;  %3523 = vmatmul.mubr.msk.bf16.gmra.mrb[148].mxu1 %vm202_vm3, %v3654_v27  ;;  %v3656_v1 = vld [vmem:[%s4887_s0 + $0x2b4] sm:$0xff]  }
 0x132   :  { %3422 = vmatprep.mubr.msk.bf16.mxu0 %vm3681_vm2, %v4890_v0  ;;  %3526 = vmatprep.mubr.msk.bf16.mxu1 %vm3681_vm2, %v4890_v0 }
 0x134   :  { %v4308_v49 = vpop.f32.mrb[44].mxu0  ;;  %v4310_v15 = vpop.f32.mrb[44].mxu1 }
 0x135   :  { %v3208_v37 = vpop.f32.mrb[45].mxu0  ;;  %v3312_v21 = vpop.f32.mrb[45].mxu1 }
 0x136   :  { %v4320_v27 = vpop.f32.mrb[46].mxu0  ;;  %v4322_v60 = vpop.f32.mrb[46].mxu1 }
 0x137   :  { %4944 = vst [vmem:[#allocation2_spill] sm:$0xff] %v4320_v27  ;;  %4945 = vst [vmem:[#allocation3_spill] sm:$0xff] %v4322_v60  ;;  %v3209_v48 = vpop.f32.mrb[47].mxu0  ;;  %v3313_v43 = vpop.f32.mrb[47].mxu1 }
 0x138   :  { %v3657_v43 = vld [vmem:[%s4887_s0 + $0x1f8] sm:$0xff]  }
 0x139   :  { %3423 = vmatmul.mubr.msk.bf16.gmra.mrb[152].mxu0 %vm202_vm3, %v3655_v13  ;;  %3527 = vmatmul.mubr.msk.bf16.gmra.mrb[152].mxu1 %vm202_vm3, %v3656_v1  ;;  %v3658_v13 = vld [vmem:[%s4887_s0 + $0x2bc] sm:$0xff]  }
 0x13a   :  { %3426 = vmatprep.mubr.msk.bf16.mxu0 %vm3681_vm2, %v4890_v0  ;;  %3530 = vmatprep.mubr.msk.bf16.mxu1 %vm3681_vm2, %v4890_v0 }
 0x13c   :  { %v4332_v37 = vpop.f32.mrb[48].mxu0  ;;  %v4334_v21 = vpop.f32.mrb[48].mxu1 }
 0x13d   :  { %4946 = vst [vmem:[#allocation4_spill] sm:$0xff] %v4332_v37  ;;  %4947 = vst [vmem:[#allocation5_spill] sm:$0xff] %v4334_v21  ;;  %v3212_v55 = vpop.f32.mrb[49].mxu0  ;;  %v3316_v48 = vpop.f32.mrb[49].mxu1 }
 0x13e   :  { %v4344_v1 = vpop.f32.mrb[50].mxu0  ;;  %v4346_v36 = vpop.f32.mrb[50].mxu1 }
 0x13f   :  { %4948 = vst [vmem:[#allocation6_spill] sm:$0xff] %v4344_v1  ;;  %4949 = vst [vmem:[#allocation7_spill] sm:$0xff] %v4346_v36  ;;  %v3213_v24 = vpop.f32.mrb[51].mxu0  ;;  %v3317_v19 = vpop.f32.mrb[51].mxu1 }
 0x140   :  { %v3659_v19 = vld [vmem:[%s4887_s0 + $0x200] sm:$0xff]  }
 0x141   :  { %3427 = vmatmul.mubr.msk.bf16.gmra.mrb[156].mxu0 %vm202_vm3, %v3657_v43  ;;  %3531 = vmatmul.mubr.msk.bf16.gmra.mrb[156].mxu1 %vm202_vm3, %v3658_v13  ;;  %v3660_v43 = vld [vmem:[%s4887_s0 + $0x2c4] sm:$0xff]  }
 0x142   :  { %3430 = vmatprep.mubr.msk.bf16.mxu0 %vm3681_vm2, %v4890_v0  ;;  %3534 = vmatprep.mubr.msk.bf16.mxu1 %vm3681_vm2, %v4890_v0 }
 0x144   :  { %v4356_v55 = vpop.f32.mrb[52].mxu0  ;;  %v4358_v48 = vpop.f32.mrb[52].mxu1 }
 0x145   :  { %4950 = vst [vmem:[#allocation8_spill] sm:$0xff] %v4356_v55  ;;  %4951 = vst [vmem:[#allocation9_spill] sm:$0xff] %v4358_v48  ;;  %v3216_v31 = vpop.f32.mrb[53].mxu0  ;;  %v3320_v24 = vpop.f32.mrb[53].mxu1 }
 0x146   :  { %v4368_v13 = vpop.f32.mrb[54].mxu0  ;;  %v4370_v12 = vpop.f32.mrb[54].mxu1  ;;  %v4954_v31 = vmov 0.0  }
 0x147   :  { %4952 = vst [vmem:[#allocation10_spill] sm:$0xff] %v4368_v13  ;;  %4953 = vst [vmem:[#allocation11_spill] sm:$0xff] %v4370_v12  ;;  %v3217_v63 = vpop.f32.mrb[55].mxu0  ;;  %v3321_v0 = vpop.f32.mrb[55].mxu1 }
 0x148   :  { %v3661_v0 = vld [vmem:[%s4887_s0 + $0x208] sm:$0xff]  }
 0x149   :  { %3431 = vmatmul.mubr.msk.bf16.gmra.mrb[160].mxu0 %vm202_vm3, %v3659_v19  ;;  %3535 = vmatmul.mubr.msk.bf16.gmra.mrb[160].mxu1 %vm202_vm3, %v3660_v43  ;;  %v3662_v19 = vld [vmem:[%s4887_s0 + $0x2cc] sm:$0xff]  }
 0x14a   :  { %3434 = vmatprep.mubr.msk.bf16.mxu0 %vm3681_vm2, %v4954_v31  ;;  %3538 = vmatprep.mubr.msk.bf16.mxu1 %vm3681_vm2, %v4954_v31 }
 0x14c   :  { %v4380_v24 = vpop.f32.mrb[56].mxu0  ;;  %v4382_v3 = vpop.f32.mrb[56].mxu1 }
 0x14d   :  { %4955 = vst [vmem:[#allocation12_spill] sm:$0xff] %v4380_v24  ;;  %4956 = vst [vmem:[#allocation13_spill] sm:$0xff] %v4382_v3  ;;  %v3220_v7 = vpop.f32.mrb[57].mxu0  ;;  %v3324_v63 = vpop.f32.mrb[57].mxu1 }
 0x14e   :  { %v4392_v43 = vpop.f32.mrb[58].mxu0  ;;  %v4394_v12 = vpop.f32.mrb[58].mxu1 }
 0x14f   :  { %4957 = vst [vmem:[#allocation14_spill] sm:$0xff] %v4392_v43  ;;  %4958 = vst [vmem:[#allocation15_spill] sm:$0xff] %v4394_v12  ;;  %v3221_v55 = vpop.f32.mrb[59].mxu0  ;;  %v3325_v36 = vpop.f32.mrb[59].mxu1 }
 0x150   :  { %v3663_v36 = vld [vmem:[%s4887_s0 + $0x210] sm:$0xff]  }
 0x151   :  { %3435 = vmatmul.mubr.msk.bf16.gmra.mrb[164].mxu0 %vm202_vm3, %v3661_v0  ;;  %3539 = vmatmul.mubr.msk.bf16.gmra.mrb[164].mxu1 %vm202_vm3, %v3662_v19  ;;  %v3664_v0 = vld [vmem:[%s4887_s0 + $0x2d4] sm:$0xff]  }
 0x152   :  { %3438 = vmatprep.mubr.msk.bf16.mxu0 %vm3681_vm2, %v4954_v31  ;;  %3542 = vmatprep.mubr.msk.bf16.mxu1 %vm3681_vm2, %v4954_v31 }
 0x154   :  { %v4404_v7 = vpop.f32.mrb[60].mxu0  ;;  %v4406_v63 = vpop.f32.mrb[60].mxu1 }
 0x155   :  { %4959 = vst [vmem:[#allocation16_spill] sm:$0xff] %v4404_v7  ;;  %4960 = vst [vmem:[#allocation17_spill] sm:$0xff] %v4406_v63  ;;  %v3224_v13 = vpop.f32.mrb[61].mxu0  ;;  %v3328_v55 = vpop.f32.mrb[61].mxu1 }
 0x156   :  { %v4416_v19 = vpop.f32.mrb[62].mxu0  ;;  %v4418_v12 = vpop.f32.mrb[62].mxu1 }
 0x157   :  { %4961 = vst [vmem:[#allocation18_spill] sm:$0xff] %v4416_v19  ;;  %4962 = vst [vmem:[#allocation19_spill] sm:$0xff] %v4418_v12  ;;  %v3225_v3 = vpop.f32.mrb[63].mxu0  ;;  %v3329_v24 = vpop.f32.mrb[63].mxu1 }
 0x158   :  { %v3665_v24 = vld [vmem:[%s4887_s0 + $0x218] sm:$0xff]  }
 0x159   :  { %3439 = vmatmul.mubr.msk.bf16.gmra.mrb[168].mxu0 %vm202_vm3, %v3663_v36  ;;  %3543 = vmatmul.mubr.msk.bf16.gmra.mrb[168].mxu1 %vm202_vm3, %v3664_v0  ;;  %v3666_v36 = vld [vmem:[%s4887_s0 + $0x2dc] sm:$0xff]  }
 0x15a   :  { %3442 = vmatprep.mubr.msk.bf16.mxu0 %vm3681_vm2, %v4954_v31  ;;  %3546 = vmatprep.mubr.msk.bf16.mxu1 %vm3681_vm2, %v4954_v31 }
 0x15c   :  { %v4428_v13 = vpop.f32.mrb[64].mxu0  ;;  %v4430_v55 = vpop.f32.mrb[64].mxu1 }
 0x15d   :  { %4963 = vst [vmem:[#allocation20_spill] sm:$0xff] %v4428_v13  ;;  %4964 = vst [vmem:[#allocation21_spill] sm:$0xff] %v4430_v55  ;;  %v3228_v43 = vpop.f32.mrb[65].mxu0  ;;  %v3332_v3 = vpop.f32.mrb[65].mxu1 }
 0x15e   :  { %v4440_v0 = vpop.f32.mrb[66].mxu0  ;;  %v4442_v12 = vpop.f32.mrb[66].mxu1 }
 0x15f   :  { %4965 = vst [vmem:[#allocation22_spill] sm:$0xff] %v4440_v0  ;;  %4966 = vst [vmem:[#allocation23_spill] sm:$0xff] %v4442_v12  ;;  %v3229_v63 = vpop.f32.mrb[67].mxu0  ;;  %v3333_v7 = vpop.f32.mrb[67].mxu1 }
 0x160   :  { %v3667_v7 = vld [vmem:[%s4887_s0 + $0x220] sm:$0xff]  }
 0x161   :  { %3443 = vmatmul.mubr.msk.bf16.gmra.mrb[172].mxu0 %vm202_vm3, %v3665_v24  ;;  %3547 = vmatmul.mubr.msk.bf16.gmra.mrb[172].mxu1 %vm202_vm3, %v3666_v36  ;;  %v3668_v24 = vld [vmem:[%s4887_s0 + $0x2e4] sm:$0xff]  }
 0x162   :  { %3446 = vmatprep.mubr.msk.bf16.mxu0 %vm3681_vm2, %v4954_v31  ;;  %3550 = vmatprep.mubr.msk.bf16.mxu1 %vm3681_vm2, %v4954_v31 }
 0x164   :  { %v4452_v43 = vpop.f32.mrb[68].mxu0  ;;  %v4454_v3 = vpop.f32.mrb[68].mxu1 }
 0x165   :  { %4967 = vst [vmem:[#allocation24_spill] sm:$0xff] %v4452_v43  ;;  %4968 = vst [vmem:[#allocation25_spill] sm:$0xff] %v4454_v3  ;;  %v3232_v19 = vpop.f32.mrb[69].mxu0  ;;  %v3336_v63 = vpop.f32.mrb[69].mxu1 }
 0x166   :  { %v4464_v36 = vpop.f32.mrb[70].mxu0  ;;  %v4466_v12 = vpop.f32.mrb[70].mxu1 }
 0x167   :  { %4969 = vst [vmem:[#allocation26_spill] sm:$0xff] %v4464_v36  ;;  %4970 = vst [vmem:[#allocation27_spill] sm:$0xff] %v4466_v12  ;;  %v3233_v55 = vpop.f32.mrb[71].mxu0  ;;  %v3337_v13 = vpop.f32.mrb[71].mxu1 }
 0x168   :  { %v3669_v13 = vld [vmem:[%s4887_s0 + $0x228] sm:$0xff]  }
 0x169   :  { %3447 = vmatmul.mubr.msk.bf16.gmra.mrb[176].mxu0 %vm202_vm3, %v3667_v7  ;;  %3551 = vmatmul.mubr.msk.bf16.gmra.mrb[176].mxu1 %vm202_vm3, %v3668_v24  ;;  %v3670_v7 = vld [vmem:[%s4887_s0 + $0x2ec] sm:$0xff]  }
 0x16a   :  { %3450 = vmatprep.mubr.msk.bf16.mxu0 %vm3681_vm2, %v4954_v31  ;;  %3554 = vmatprep.mubr.msk.bf16.mxu1 %vm3681_vm2, %v4954_v31 }
 0x16c   :  { %v4476_v19 = vpop.f32.mrb[72].mxu0  ;;  %v4478_v63 = vpop.f32.mrb[72].mxu1 }
 0x16d   :  { %4971 = vst [vmem:[#allocation28_spill] sm:$0xff] %v4476_v19  ;;  %4972 = vst [vmem:[#allocation29_spill] sm:$0xff] %v4478_v63  ;;  %v3236_v0 = vpop.f32.mrb[73].mxu0  ;;  %v3340_v55 = vpop.f32.mrb[73].mxu1 }
 0x16e   :  { %v4488_v24 = vpop.f32.mrb[74].mxu0  ;;  %v4490_v12 = vpop.f32.mrb[74].mxu1 }
 0x16f   :  { %4973 = vst [vmem:[#allocation30_spill] sm:$0xff] %v4488_v24  ;;  %4974 = vst [vmem:[#allocation31_spill] sm:$0xff] %v4490_v12  ;;  %v3237_v3 = vpop.f32.mrb[75].mxu0  ;;  %v3341_v43 = vpop.f32.mrb[75].mxu1 }
 0x170   :  { %v3671_v43 = vld [vmem:[%s4887_s0 + $0x230] sm:$0xff]  }
 0x171   :  { %3451 = vmatmul.mubr.msk.bf16.gmra.mrb[180].mxu0 %vm202_vm3, %v3669_v13  ;;  %3555 = vmatmul.mubr.msk.bf16.gmra.mrb[180].mxu1 %vm202_vm3, %v3670_v7  ;;  %v3672_v13 = vld [vmem:[%s4887_s0 + $0x2f4] sm:$0xff]  }
 0x172   :  { %3454 = vmatprep.mubr.msk.bf16.mxu0 %vm3681_vm2, %v4954_v31  ;;  %3558 = vmatprep.mubr.msk.bf16.mxu1 %vm3681_vm2, %v4954_v31 }
 0x174   :  { %v4500_v0 = vpop.f32.mrb[76].mxu0  ;;  %v4502_v55 = vpop.f32.mrb[76].mxu1 }
 0x175   :  { %4975 = vst [vmem:[#allocation32_spill] sm:$0xff] %v4500_v0  ;;  %4976 = vst [vmem:[#allocation33_spill] sm:$0xff] %v4502_v55  ;;  %v3240_v36 = vpop.f32.mrb[77].mxu0  ;;  %v3344_v3 = vpop.f32.mrb[77].mxu1 }
 0x176   :  { %v4512_v7 = vpop.f32.mrb[78].mxu0  ;;  %v4514_v12 = vpop.f32.mrb[78].mxu1 }
 0x177   :  { %4977 = vst [vmem:[#allocation34_spill] sm:$0xff] %v4512_v7  ;;  %4978 = vst [vmem:[#allocation35_spill] sm:$0xff] %v4514_v12  ;;  %v3241_v63 = vpop.f32.mrb[79].mxu0  ;;  %v3345_v19 = vpop.f32.mrb[79].mxu1 }
 0x178   :  { %v3673_v19 = vld [vmem:[%s4887_s0 + $0x238] sm:$0xff]  }
 0x179   :  { %3455 = vmatmul.mubr.msk.bf16.gmra.mrb[184].mxu0 %vm202_vm3, %v3671_v43  ;;  %3559 = vmatmul.mubr.msk.bf16.gmra.mrb[184].mxu1 %vm202_vm3, %v3672_v13  ;;  %v3674_v43 = vld [vmem:[%s4887_s0 + $0x2fc] sm:$0xff]  }
 0x17a   :  { %3458 = vmatprep.mubr.msk.bf16.mxu0 %vm3681_vm2, %v4954_v31  ;;  %3562 = vmatprep.mubr.msk.bf16.mxu1 %vm3681_vm2, %v4954_v31 }
 0x17c   :  { %v4524_v36 = vpop.f32.mrb[80].mxu0  ;;  %v4526_v3 = vpop.f32.mrb[80].mxu1 }
 0x17d   :  { %4979 = vst [vmem:[#allocation36_spill] sm:$0xff] %v4524_v36  ;;  %4980 = vst [vmem:[#allocation37_spill] sm:$0xff] %v4526_v3  ;;  %v3244_v24 = vpop.f32.mrb[81].mxu0  ;;  %v3348_v63 = vpop.f32.mrb[81].mxu1 }
 0x17e   :  { %v4536_v13 = vpop.f32.mrb[82].mxu0  ;;  %v4538_v12 = vpop.f32.mrb[82].mxu1 }
 0x17f   :  { %4981 = vst [vmem:[#allocation38_spill] sm:$0xff] %v4536_v13  ;;  %4982 = vst [vmem:[#allocation39_spill] sm:$0xff] %v4538_v12  ;;  %v3245_v55 = vpop.f32.mrb[83].mxu0  ;;  %v3349_v0 = vpop.f32.mrb[83].mxu1 }
 0x180   :  { %v3675_v0 = vld [vmem:[%s4887_s0 + $0x240] sm:$0xff]  }
 0x181   :  { %3459 = vmatmul.mubr.msk.bf16.gmra.mrb[188].mxu0 %vm202_vm3, %v3673_v19  ;;  %3563 = vmatmul.mubr.msk.bf16.gmra.mrb[188].mxu1 %vm202_vm3, %v3674_v43  ;;  %v3676_v19 = vld [vmem:[%s4887_s0 + $0x304] sm:$0xff]  }
 0x182   :  { %3462 = vmatprep.mubr.msk.bf16.mxu0 %vm3681_vm2, %v4954_v31  ;;  %3566 = vmatprep.mubr.msk.bf16.mxu1 %vm3681_vm2, %v4954_v31 }
 0x184   :  { %v4548_v24 = vpop.f32.mrb[84].mxu0  ;;  %v4550_v63 = vpop.f32.mrb[84].mxu1 }
 0x185   :  { %4983 = vst [vmem:[#allocation40_spill] sm:$0xff] %v4548_v24  ;;  %4984 = vst [vmem:[#allocation41_spill] sm:$0xff] %v4550_v63  ;;  %v3248_v7 = vpop.f32.mrb[85].mxu0  ;;  %v3352_v55 = vpop.f32.mrb[85].mxu1 }
 0x186   :  { %v4560_v43 = vpop.f32.mrb[86].mxu0  ;;  %v4562_v12 = vpop.f32.mrb[86].mxu1 }
 0x187   :  { %4985 = vst [vmem:[#allocation42_spill] sm:$0xff] %v4560_v43  ;;  %4986 = vst [vmem:[#allocation43_spill] sm:$0xff] %v4562_v12  ;;  %v3249_v3 = vpop.f32.mrb[87].mxu0  ;;  %v3353_v36 = vpop.f32.mrb[87].mxu1 }
 0x188   :  { %v3677_v36 = vld [vmem:[%s4887_s0 + $0x248] ss:$0 sps:$4 sm:$0xff]  }
 0x189   :  { %3463 = vmatmul.mubr.msk.bf16.gmra.mrb[192].mxu0 %vm202_vm3, %v3675_v0  ;;  %3567 = vmatmul.mubr.msk.bf16.gmra.mrb[192].mxu1 %vm202_vm3, %v3676_v19  ;;  %v3678_v0 = vld [vmem:[%s4887_s0 + $0x30c] ss:$0 sps:$4 sm:$0xff]  }
 0x18a   :  { %3466 = vmatprep.mubr.msk.bf16.mxu0 %vm3681_vm2, %v4954_v31  ;;  %3570 = vmatprep.mubr.msk.bf16.mxu1 %vm3681_vm2, %v4954_v31 }
 0x18c   :  { %v4572_v7 = vpop.f32.mrb[88].mxu0  ;;  %v4574_v55 = vpop.f32.mrb[88].mxu1 }
 0x18d   :  { %4987 = vst [vmem:[#allocation44_spill] sm:$0xff] %v4572_v7  ;;  %4988 = vst [vmem:[#allocation45_spill] sm:$0xff] %v4574_v55  ;;  %v3252_v13 = vpop.f32.mrb[89].mxu0  ;;  %v3356_v3 = vpop.f32.mrb[89].mxu1 }
 0x18e   :  { %v4584_v19 = vpop.f32.mrb[90].mxu0  ;;  %v4586_v31 = vpop.f32.mrb[90].mxu1 }
 0x18f   :  { %4989 = vst [vmem:[#allocation46_spill] sm:$0xff] %v4584_v19  ;;  %4990 = vst [vmem:[#allocation47_spill] sm:$0xff] %v4586_v31  ;;  %v3253_v43 = vpop.f32.mrb[91].mxu0  ;;  %v3357_v63 = vpop.f32.mrb[91].mxu1 }
 0x190   :  { %v4997_v63 = vmax.f32 %v4044_v61, %v4046_v62 }
 0x191   :  { %3467 = vmatmul.mubr.msk.bf16.gmra.mrb[196].mxu0 %vm202_vm3, %v3677_v36  ;;  %3571 = vmatmul.mubr.msk.bf16.gmra.mrb[196].mxu1 %vm202_vm3, %v3678_v0 }
 0x194   :  { %v4592_v13 = vpop.f32.mrb[92].mxu0  ;;  %v4594_v3 = vpop.f32.mrb[92].mxu1 }
 0x195   :  { %4991 = vst [vmem:[#allocation48_spill] sm:$0xff] %v4592_v13  ;;  %4992 = vst [vmem:[#allocation49_spill] sm:$0xff] %v4594_v3  ;;  %v3256_v55 = vpop.f32.mrb[93].mxu0  ;;  %v3360_v7 = vpop.f32.mrb[93].mxu1 }
 0x196   :  { %v4598_v24 = vpop.f32.mrb[94].mxu0  ;;  %v4600_v1 = vpop.f32.mrb[94].mxu1 }
 0x197   :  { %4993 = vst [vmem:[#allocation50_spill] sm:$0xff] %v4598_v24  ;;  %4994 = vst [vmem:[#allocation51_spill] sm:$0xff] %v4600_v1  ;;  %v3257_v43 = vpop.f32.mrb[95].mxu0  ;;  %v3361_v36 = vpop.f32.mrb[95].mxu1  ;;  %v4616_v24 = vld [vmem:[%s4888_s2] ss:$0 sm:$0xff] }
 0x19c   :  { %v4604_v12 = vpop.f32.mrb[96].mxu0  ;;  %v4606_v0 = vpop.f32.mrb[96].mxu1 }
 0x19d   :  { %4995 = vst [vmem:[#allocation52_spill] sm:$0xff] %v4604_v12  ;;  %4996 = vst [vmem:[#allocation53_spill] sm:$0xff] %v4606_v0  ;;  %v3260_v19 = vpop.f32.mrb[97].mxu0  ;;  %v3364_v48 = vpop.f32.mrb[97].mxu1  ;;  %v4999_v12 = vmax.f32 %v4068_v10, %v4070_v11 }
 0x19e   :  { %v514_v55 = vpop.f32.mrb[98].mxu0  ;;  %v994_v7 = vpop.f32.mrb[98].mxu1 }
 0x19f   :  { %v3261_v3 = vpop.f32.mrb[99].mxu0  ;;  %v3365_v13 = vpop.f32.mrb[99].mxu1 }
 0x1a0   :  { %v4998_v3 = vmax.f32 %v4056_v5, %v4058_v6 }
 0x1a4   :  { %v1328_v21 = vpop.f32.mrb[100].mxu0  ;;  %v1857_v37 = vpop.f32.mrb[100].mxu1 }
 0x1a5   :  { %v1526_v43 = vmax.f32 %v4997_v63, %v1328_v21  ;;  %v3372_v36 = vpop.f32.mrb[101].mxu0  ;;  %v3476_v1 = vpop.f32.mrb[101].mxu1 }
 0x1a6   :  { %v1331_v31 = vpop.f32.mrb[102].mxu0  ;;  %v1860_v19 = vpop.f32.mrb[102].mxu1 }
 0x1a7   :  { %v2055_v48 = vmax.f32 %v1526_v43, %v1857_v37  ;;  %v1527_v13 = vmax.f32 %v4998_v3, %v1331_v31  ;;  %v3373_v55 = vpop.f32.mrb[103].mxu0  ;;  %v3477_v7 = vpop.f32.mrb[103].mxu1 }
 0x1a9   :  { %v2111_v0 = vadd.f32 %v4616_v24, %v2055_v48  ;;  %v2056_v61 = vmax.f32 %v1527_v13, %v1860_v19  ;;  %v5000_v48 = vmax.f32 %v4080_v17, %v4082_v18 }
 0x1ab   :  { %v2112_v62 = vadd.f32 %v4616_v24, %v2056_v61  ;;  %v2160_v63 = vmax.f32 %v2111_v0, 0.0 }
 0x1ac   :  { %v1336_v21 = vpop.f32.mrb[104].mxu0  ;;  %v1865_v1 = vpop.f32.mrb[104].mxu1 }
 0x1ad   :  { %v2161_v36 = vmax.f32 %v2112_v62, 0.0  ;;  %v1528_v60 = vmax.f32 %v4999_v12, %v1336_v21  ;;  %v3376_v37 = vpop.f32.mrb[105].mxu0  ;;  %v3480_v43 = vpop.f32.mrb[105].mxu1 }
 0x1ae   :  { %v1339_v27 = vpop.f32.mrb[106].mxu0  ;;  %v1868_v5 = vpop.f32.mrb[106].mxu1 }
 0x1af   :  { %v2910_v6 = vpack.c.bf16 %v2161_v36, %v2160_v63  ;;  %v2057_v31 = vmax.f32 %v1528_v60, %v1865_v1  ;;  %v1529_v19 = vmax.f32 %v5000_v48, %v1339_v27  ;;  %v3377_v3 = vpop.f32.mrb[107].mxu0  ;;  %v3481_v13 = vpop.f32.mrb[107].mxu1  ;;  %v5001_v60 = vmax.f32 %v4092_v22, %v4094_v23 }
 0x1b0   :  { %v5002_v36 = vmax.f32 %v4104_v29, %v4106_v30  ;;  %v5003_v13 = vmax.f32 %v4116_v34, %v4118_v35 }
 0x1b1   :  { %2911 = vst [vmem:[%s4889_s3] sm:$0xff] %v2910_v6   ;;  %v2113_v0 = vadd.f32 %v4616_v24, %v2057_v31  ;;  %v2058_v10 = vmax.f32 %v1529_v19, %v1868_v5 }
 0x1b3   :  { %v2114_v11 = vadd.f32 %v4616_v24, %v2058_v10  ;;  %v2162_v7 = vmax.f32 %v2113_v0, 0.0 }
 0x1b4   :  { %v1344_v12 = vpop.f32.mrb[108].mxu0  ;;  %v1873_v55 = vpop.f32.mrb[108].mxu1 }
 0x1b5   :  { %v2163_v61 = vmax.f32 %v2114_v11, 0.0  ;;  %v1530_v17 = vmax.f32 %v5001_v60, %v1344_v12  ;;  %v3380_v18 = vpop.f32.mrb[109].mxu0  ;;  %v3484_v27 = vpop.f32.mrb[109].mxu1 }
 0x1b6   :  { %v1347_v62 = vpop.f32.mrb[110].mxu0  ;;  %v1876_v21 = vpop.f32.mrb[110].mxu1 }
 0x1b7   :  { %v2915_v1 = vpack.c.bf16 %v2163_v61, %v2162_v7  ;;  %v2059_v63 = vmax.f32 %v1530_v17, %v1873_v55  ;;  %v1531_v37 = vmax.f32 %v5002_v36, %v1347_v62  ;;  %v3381_v43 = vpop.f32.mrb[111].mxu0  ;;  %v3485_v5 = vpop.f32.mrb[111].mxu1  ;;  %v5004_v7 = vmax.f32 %v4128_v41, %v4130_v42 }
 0x1b9   :  { %3027 = vst [vmem:[%s4889_s3 + $0x8] sm:$0xff] %v2915_v1   ;;  %v2115_v6 = vadd.f32 %v4616_v24, %v2059_v63  ;;  %v2060_v22 = vmax.f32 %v1531_v37, %v1876_v21  ;;  %v5005_v63 = vmax.f32 %v4140_v46, %v4142_v47 }
 0x1bb   :  { %v2116_v23 = vadd.f32 %v4616_v24, %v2060_v22  ;;  %v2164_v19 = vmax.f32 %v2115_v6, 0.0  ;;  %v5006_v22 = vmax.f32 %v4152_v53, %v4154_v54 }
 0x1bc   :  { %v1352_v31 = vpop.f32.mrb[112].mxu0  ;;  %v1881_v48 = vpop.f32.mrb[112].mxu1 }
 0x1bd   :  { %v2165_v3 = vmax.f32 %v2116_v23, 0.0  ;;  %v1532_v29 = vmax.f32 %v5003_v13, %v1352_v31  ;;  %v3384_v30 = vpop.f32.mrb[113].mxu0  ;;  %v3488_v0 = vpop.f32.mrb[113].mxu1 }
 0x1be   :  { %v1355_v10 = vpop.f32.mrb[114].mxu0  ;;  %v1884_v11 = vpop.f32.mrb[114].mxu1  ;;  %v5007_v0 = vmax.f32 %v4164_v58, %v4166_v59 }
 0x1bf   :  { %v2920_v12 = vpack.c.bf16 %v2165_v3, %v2164_v19  ;;  %v2061_v55 = vmax.f32 %v1532_v29, %v1881_v48  ;;  %v1533_v61 = vmax.f32 %v5004_v7, %v1355_v10  ;;  %v3385_v60 = vpop.f32.mrb[115].mxu0  ;;  %v3489_v17 = vpop.f32.mrb[115].mxu1 }
 0x1c1   :  { %3028 = vst [vmem:[%s4889_s3 + $0x10] sm:$0xff] %v2920_v12   ;;  %v2117_v18 = vadd.f32 %v4616_v24, %v2061_v55  ;;  %v2062_v34 = vmax.f32 %v1533_v61, %v1884_v11  ;;  %v5008_v61 = vmax.f32 %v4176_v8, %v4178_v9 }
 0x1c3   :  { %v2118_v35 = vadd.f32 %v4616_v24, %v2062_v34  ;;  %v2166_v21 = vmax.f32 %v2117_v18, 0.0 }
 0x1c4   :  { %v1360_v27 = vpop.f32.mrb[116].mxu0  ;;  %v1889_v62 = vpop.f32.mrb[116].mxu1 }
 0x1c5   :  { %v2167_v1 = vmax.f32 %v2118_v35, 0.0  ;;  %v1534_v41 = vmax.f32 %v5005_v63, %v1360_v27  ;;  %v3388_v42 = vpop.f32.mrb[117].mxu0  ;;  %v3492_v36 = vpop.f32.mrb[117].mxu1 }
 0x1c6   :  { %v1363_v37 = vpop.f32.mrb[118].mxu0  ;;  %v1892_v43 = vpop.f32.mrb[118].mxu1 }
 0x1c7   :  { %v2925_v5 = vpack.c.bf16 %v2167_v1, %v2166_v21  ;;  %v2063_v6 = vmax.f32 %v1534_v41, %v1889_v62  ;;  %v1535_v23 = vmax.f32 %v5006_v22, %v1363_v37  ;;  %v3389_v31 = vpop.f32.mrb[119].mxu0  ;;  %v3493_v48 = vpop.f32.mrb[119].mxu1  ;;  %v5009_v1 = vmax.f32 %v4188_v16, %v4190_v20 }
 0x1c9   :  { %3029 = vst [vmem:[%s4889_s3 + $0x18] sm:$0xff] %v2925_v5   ;;  %v2119_v19 = vadd.f32 %v4616_v24, %v2063_v6  ;;  %v2064_v46 = vmax.f32 %v1535_v23, %v1892_v43  ;;  %v5010_v43 = vmax.f32 %v4200_v32, %v4202_v33 }
 0x1cb   :  { %v2120_v47 = vadd.f32 %v4616_v24, %v2064_v46  ;;  %v2168_v29 = vmax.f32 %v2119_v19, 0.0 }
 0x1cc   :  { %v1368_v3 = vpop.f32.mrb[120].mxu0  ;;  %v1897_v13 = vpop.f32.mrb[120].mxu1 }
 0x1cd   :  { %v2169_v30 = vmax.f32 %v2120_v47, 0.0  ;;  %v1536_v53 = vmax.f32 %v5007_v0, %v1368_v3  ;;  %v3392_v54 = vpop.f32.mrb[121].mxu0  ;;  %v3496_v10 = vpop.f32.mrb[121].mxu1  ;;  %v5011_v47 = vmax.f32 %v4212_v40, %v4214_v44 }
 0x1ce   :  { %v1371_v11 = vpop.f32.mrb[122].mxu0  ;;  %v1900_v12 = vpop.f32.mrb[122].mxu1 }
 0x1cf   :  { %v2930_v55 = vpack.c.bf16 %v2169_v30, %v2168_v29  ;;  %v2065_v7 = vmax.f32 %v1536_v53, %v1897_v13  ;;  %v1537_v60 = vmax.f32 %v5008_v61, %v1371_v11  ;;  %v3393_v17 = vpop.f32.mrb[123].mxu0  ;;  %v3497_v18 = vpop.f32.mrb[123].mxu1  ;;  %v5012_v53 = vmax.f32 %v4224_v56, %v4226_v57 }
 0x1d0   :  { %v5013_v17 = vmax.f32 %v4236_v4, %v4238_v14 }
 0x1d1   :  { %3030 = vst [vmem:[%s4889_s3 + $0x20] sm:$0xff] %v2930_v55   ;;  %v2121_v34 = vadd.f32 %v4616_v24, %v2065_v7  ;;  %v2066_v58 = vmax.f32 %v1537_v60, %v1900_v12 }
 0x1d3   :  { %v2122_v59 = vadd.f32 %v4616_v24, %v2066_v58  ;;  %v2170_v62 = vmax.f32 %v2121_v34, 0.0 }
 0x1d4   :  { %v1376_v35 = vpop.f32.mrb[124].mxu0  ;;  %v1905_v27 = vpop.f32.mrb[124].mxu1 }
 0x1d5   :  { %v2171_v21 = vmax.f32 %v2122_v59, 0.0  ;;  %v1538_v8 = vmax.f32 %v5009_v1, %v1376_v35  ;;  %v3396_v9 = vpop.f32.mrb[125].mxu0  ;;  %v3500_v63 = vpop.f32.mrb[125].mxu1 }
 0x1d6   :  { %v1379_v41 = vpop.f32.mrb[126].mxu0  ;;  %v1908_v42 = vpop.f32.mrb[126].mxu1 }
 0x1d7   :  { %v2935_v36 = vpack.c.bf16 %v2171_v21, %v2170_v62  ;;  %v2067_v37 = vmax.f32 %v1538_v8, %v1905_v27  ;;  %v1539_v5 = vmax.f32 %v5010_v43, %v1379_v41  ;;  %v3397_v6 = vpop.f32.mrb[127].mxu0  ;;  %v3501_v22 = vpop.f32.mrb[127].mxu1  ;;  %v5014_v27 = vmax.f32 %v4248_v38, %v4250_v39 }
 0x1d9   :  { %3031 = vst [vmem:[%s4889_s3 + $0x28] sm:$0xff] %v2935_v36   ;;  %v2123_v23 = vadd.f32 %v4616_v24, %v2067_v37  ;;  %v2068_v16 = vmax.f32 %v1539_v5, %v1908_v42  ;;  %v5015_v36 = vmax.f32 %v4260_v52, %v4262_v2 }
 0x1db   :  { %v2124_v20 = vadd.f32 %v4616_v24, %v2068_v16  ;;  %v2172_v19 = vmax.f32 %v2123_v23, 0.0  ;;  %v5016_v23 = vmax.f32 %v4272_v50, %v4274_v51 }
 0x1dc   :  { %v1384_v31 = vpop.f32.mrb[128].mxu0  ;;  %v1913_v48 = vpop.f32.mrb[128].mxu1 }
 0x1dd   :  { %v2173_v46 = vmax.f32 %v2124_v20, 0.0  ;;  %v1540_v32 = vmax.f32 %v5011_v47, %v1384_v31  ;;  %v3400_v33 = vpop.f32.mrb[129].mxu0  ;;  %v3504_v3 = vpop.f32.mrb[129].mxu1 }
 0x1de   :  { %v1387_v13 = vpop.f32.mrb[130].mxu0  ;;  %v1916_v29 = vpop.f32.mrb[130].mxu1  ;;  %v5017_v33 = vmax.f32 %v4284_v25, %v4286_v26 }
 0x1df   :  { %v2940_v30 = vpack.c.bf16 %v2173_v46, %v2172_v19  ;;  %v2069_v0 = vmax.f32 %v1540_v32, %v1913_v48  ;;  %v1541_v54 = vmax.f32 %v5012_v53, %v1387_v13  ;;  %v3401_v10 = vpop.f32.mrb[131].mxu0  ;;  %v3505_v11 = vpop.f32.mrb[131].mxu1  ;;  %v5018_v53 = vmax.f32 %v4296_v28, %v4298_v45 }
 0x1e1   :  { %3032 = vst [vmem:[%s4889_s3 + $0x30] sm:$0xff] %v2940_v30   ;;  %v2125_v12 = vadd.f32 %v4616_v24, %v2069_v0  ;;  %v2070_v40 = vmax.f32 %v1541_v54, %v1916_v29 }
 0x1e3   :  { %v2126_v44 = vadd.f32 %v4616_v24, %v2070_v40  ;;  %v2174_v61 = vmax.f32 %v2125_v12, 0.0 }
 0x1e4   :  { %v1392_v55 = vpop.f32.mrb[132].mxu0  ;;  %v1921_v7 = vpop.f32.mrb[132].mxu1 }
 0x1e5   :  { %v2175_v60 = vmax.f32 %v2126_v44, 0.0  ;;  %v1542_v56 = vmax.f32 %v5013_v17, %v1392_v55  ;;  %v3404_v57 = vpop.f32.mrb[133].mxu0  ;;  %v3508_v18 = vpop.f32.mrb[133].mxu1 }
 0x1e6   :  { %v1395_v34 = vpop.f32.mrb[134].mxu0  ;;  %v1924_v58 = vpop.f32.mrb[134].mxu1 }
 0x1e7   :  { %v2945_v59 = vpack.c.bf16 %v2175_v60, %v2174_v61  ;;  %v2071_v35 = vmax.f32 %v1542_v56, %v1921_v7  ;;  %v1543_v62 = vmax.f32 %v5014_v27, %v1395_v34  ;;  %v3405_v21 = vpop.f32.mrb[135].mxu0  ;;  %v3509_v1 = vpop.f32.mrb[135].mxu1  ;;  %v5019_v61 = vmax.f32 %v4308_v49, %v4310_v15  ;;  %v5020_v34 = vld [vmem:[#allocation2_spill] sm:$0xff] }
 0x1e9   :  { %3033 = vst [vmem:[%s4889_s3 + $0x38] sm:$0xff] %v2945_v59   ;;  %v2127_v8 = vadd.f32 %v4616_v24, %v2071_v35  ;;  %v2072_v4 = vmax.f32 %v1543_v62, %v1924_v58  ;;  %v5021_v58 = vld [vmem:[#allocation3_spill] sm:$0xff] }
 0x1ea   :  { %v5022_v59 = vmax.f32 %v5020_v34, %v5021_v58 }
 0x1eb   :  { %v2128_v14 = vadd.f32 %v4616_v24, %v2072_v4  ;;  %v2176_v41 = vmax.f32 %v2127_v8, 0.0 }
 0x1ec   :  { %v1400_v9 = vpop.f32.mrb[136].mxu0  ;;  %v1929_v63 = vpop.f32.mrb[136].mxu1 }
 0x1ed   :  { %v2177_v42 = vmax.f32 %v2128_v14, 0.0  ;;  %v1544_v38 = vmax.f32 %v5015_v36, %v1400_v9  ;;  %v3408_v39 = vpop.f32.mrb[137].mxu0  ;;  %v3512_v37 = vpop.f32.mrb[137].mxu1  ;;  %v5023_v9 = vld [vmem:[#allocation4_spill] sm:$0xff] }
 0x1ee   :  { %v1403_v43 = vpop.f32.mrb[138].mxu0  ;;  %v1932_v5 = vpop.f32.mrb[138].mxu1 }
 0x1ef   :  { %v2950_v6 = vpack.c.bf16 %v2177_v42, %v2176_v41  ;;  %v2073_v22 = vmax.f32 %v1544_v38, %v1929_v63  ;;  %v1545_v16 = vmax.f32 %v5016_v23, %v1403_v43  ;;  %v3409_v20 = vpop.f32.mrb[139].mxu0  ;;  %v3513_v31 = vpop.f32.mrb[139].mxu1  ;;  %v5024_v63 = vld [vmem:[#allocation5_spill] sm:$0xff] }
 0x1f0   :  { %v5025_v41 = vmax.f32 %v5023_v9, %v5024_v63 }
 0x1f1   :  { %3034 = vst [vmem:[%s4889_s3 + $0x40] sm:$0xff] %v2950_v6   ;;  %v2129_v48 = vadd.f32 %v4616_v24, %v2073_v22  ;;  %v2074_v52 = vmax.f32 %v1545_v16, %v1932_v5  ;;  %v5026_v6 = vld [vmem:[#allocation6_spill] sm:$0xff]  ;;  %v5027_v22 = vld [vmem:[#allocation7_spill] sm:$0xff] }
 0x1f2   :  { %v5028_v23 = vmax.f32 %v5026_v6, %v5027_v22 }
 0x1f3   :  { %v2130_v2 = vadd.f32 %v4616_v24, %v2074_v52  ;;  %v2178_v47 = vmax.f32 %v2129_v48, 0.0 }
 0x1f4   :  { %v1408_v19 = vpop.f32.mrb[140].mxu0  ;;  %v1937_v46 = vpop.f32.mrb[140].mxu1 }
 0x1f5   :  { %v2179_v32 = vmax.f32 %v2130_v2, 0.0  ;;  %v1546_v50 = vmax.f32 %v5017_v33, %v1408_v19  ;;  %v3412_v51 = vpop.f32.mrb[141].mxu0  ;;  %v3516_v3 = vpop.f32.mrb[141].mxu1  ;;  %v5029_v33 = vld [vmem:[#allocation8_spill] sm:$0xff] }
 0x1f6   :  { %v1411_v13 = vpop.f32.mrb[142].mxu0  ;;  %v1940_v29 = vpop.f32.mrb[142].mxu1 }
 0x1f7   :  { %v2955_v30 = vpack.c.bf16 %v2179_v32, %v2178_v47  ;;  %v2075_v0 = vmax.f32 %v1546_v50, %v1937_v46  ;;  %v1547_v54 = vmax.f32 %v5018_v53, %v1411_v13  ;;  %v3413_v10 = vpop.f32.mrb[143].mxu0  ;;  %v3517_v11 = vpop.f32.mrb[143].mxu1  ;;  %v5030_v50 = vld [vmem:[#allocation9_spill] sm:$0xff] }
 0x1f8   :  { %v5031_v51 = vmax.f32 %v5029_v33, %v5030_v50  ;;  %v5032_v10 = vld [vmem:[#allocation10_spill] sm:$0xff]  ;;  %v5033_v11 = vld [vmem:[#allocation11_spill] sm:$0xff] }
 0x1f9   :  { %3035 = vst [vmem:[%s4889_s3 + $0x48] sm:$0xff] %v2955_v30   ;;  %v2131_v12 = vadd.f32 %v4616_v24, %v2075_v0  ;;  %v2076_v25 = vmax.f32 %v1547_v54, %v1940_v29 }
 0x1fb   :  { %v2132_v26 = vadd.f32 %v4616_v24, %v2076_v25  ;;  %v2180_v55 = vmax.f32 %v2131_v12, 0.0  ;;  %v5034_v12 = vmax.f32 %v5032_v10, %v5033_v11 }
 0x1fc   :  { %v1416_v40 = vpop.f32.mrb[144].mxu0  ;;  %v1945_v44 = vpop.f32.mrb[144].mxu1 }
 0x1fd   :  { %v2181_v7 = vmax.f32 %v2132_v26, 0.0  ;;  %v1548_v45 = vmax.f32 %v5019_v61, %v1416_v40  ;;  %v3416_v28 = vpop.f32.mrb[145].mxu0  ;;  %v3520_v60 = vpop.f32.mrb[145].mxu1 }
 0x1fe   :  { %v1419_v17 = vpop.f32.mrb[146].mxu0  ;;  %v1948_v56 = vpop.f32.mrb[146].mxu1 }
 0x1ff   :  { %v2960_v57 = vpack.c.bf16 %v2181_v7, %v2180_v55  ;;  %v2077_v18 = vmax.f32 %v1548_v45, %v1945_v44  ;;  %v1549_v35 = vmax.f32 %v5022_v59, %v1419_v17  ;;  %v3417_v27 = vpop.f32.mrb[147].mxu0  ;;  %v3521_v62 = vpop.f32.mrb[147].mxu1  ;;  %v5035_v17 = vld [vmem:[#allocation12_spill] sm:$0xff] }
 0x201   :  { %3036 = vst [vmem:[%s4889_s3 + $0x50] sm:$0xff] %v2960_v57   ;;  %v2133_v21 = vadd.f32 %v4616_v24, %v2077_v18  ;;  %v2078_v49 = vmax.f32 %v1549_v35, %v1948_v56  ;;  %v5036_v56 = vld [vmem:[#allocation13_spill] sm:$0xff] }
 0x202   :  { %v5037_v57 = vmax.f32 %v5035_v17, %v5036_v56 }
 0x203   :  { %v2134_v15 = vadd.f32 %v4616_v24, %v2078_v49  ;;  %v2182_v4 = vmax.f32 %v2133_v21, 0.0  ;;  %v5038_v21 = vld [vmem:[#allocation14_spill] sm:$0xff]  ;;  %v5039_v49 = vld [vmem:[#allocation15_spill] sm:$0xff] }
 0x204   :  { %v1424_v1 = vpop.f32.mrb[148].mxu0  ;;  %v1953_v8 = vpop.f32.mrb[148].mxu1 }
 0x205   :  { %v2183_v14 = vmax.f32 %v2134_v15, 0.0  ;;  %v1550_v42 = vmax.f32 %v5025_v41, %v1424_v1  ;;  %v3420_v36 = vpop.f32.mrb[149].mxu0  ;;  %v3524_v38 = vpop.f32.mrb[149].mxu1  ;;  %v5040_v15 = vmax.f32 %v5038_v21, %v5039_v49 }
 0x206   :  { %v1427_v39 = vpop.f32.mrb[150].mxu0  ;;  %v1956_v37 = vpop.f32.mrb[150].mxu1 }
 0x207   :  { %v2965_v43 = vpack.c.bf16 %v2183_v14, %v2182_v4  ;;  %v2079_v5 = vmax.f32 %v1550_v42, %v1953_v8  ;;  %v1551_v16 = vmax.f32 %v5028_v23, %v1427_v39  ;;  %v3421_v20 = vpop.f32.mrb[151].mxu0  ;;  %v3525_v31 = vpop.f32.mrb[151].mxu1  ;;  %v5041_v39 = vld [vmem:[#allocation16_spill] sm:$0xff] }
 0x209   :  { %3037 = vst [vmem:[%s4889_s3 + $0x58] sm:$0xff] %v2965_v43   ;;  %v2135_v48 = vadd.f32 %v4616_v24, %v2079_v5  ;;  %v2080_v52 = vmax.f32 %v1551_v16, %v1956_v37  ;;  %v5042_v37 = vld [vmem:[#allocation17_spill] sm:$0xff] }
 0x20a   :  { %v5043_v43 = vmax.f32 %v5041_v39, %v5042_v37 }
 0x20b   :  { %v2136_v2 = vadd.f32 %v4616_v24, %v2080_v52  ;;  %v2184_v47 = vmax.f32 %v2135_v48, 0.0  ;;  %v5044_v48 = vld [vmem:[#allocation18_spill] sm:$0xff]  ;;  %v5045_v52 = vld [vmem:[#allocation19_spill] sm:$0xff] }
 0x20c   :  { %v1432_v19 = vpop.f32.mrb[152].mxu0  ;;  %v1961_v46 = vpop.f32.mrb[152].mxu1 }
 0x20d   :  { %v2185_v32 = vmax.f32 %v2136_v2, 0.0  ;;  %v1552_v3 = vmax.f32 %v5031_v51, %v1432_v19  ;;  %v3424_v13 = vpop.f32.mrb[153].mxu0  ;;  %v3528_v29 = vpop.f32.mrb[153].mxu1  ;;  %v5046_v2 = vmax.f32 %v5044_v48, %v5045_v52 }
 0x20e   :  { %v1435_v30 = vpop.f32.mrb[154].mxu0  ;;  %v1964_v0 = vpop.f32.mrb[154].mxu1 }
 0x20f   :  { %v2970_v53 = vpack.c.bf16 %v2185_v32, %v2184_v47  ;;  %v2081_v54 = vmax.f32 %v1552_v3, %v1961_v46  ;;  %v1553_v25 = vmax.f32 %v5034_v12, %v1435_v30  ;;  %v3425_v26 = vpop.f32.mrb[155].mxu0  ;;  %v3529_v40 = vpop.f32.mrb[155].mxu1  ;;  %v5047_v30 = vld [vmem:[#allocation20_spill] sm:$0xff] }
 0x211   :  { %3038 = vst [vmem:[%s4889_s3 + $0x60] sm:$0xff] %v2970_v53   ;;  %v2137_v44 = vadd.f32 %v4616_v24, %v2081_v54  ;;  %v2082_v55 = vmax.f32 %v1553_v25, %v1964_v0  ;;  %v5048_v0 = vld [vmem:[#allocation21_spill] sm:$0xff] }
 0x212   :  { %v5049_v53 = vmax.f32 %v5047_v30, %v5048_v0 }
 0x213   :  { %v2138_v7 = vadd.f32 %v4616_v24, %v2082_v55  ;;  %v2186_v28 = vmax.f32 %v2137_v44, 0.0  ;;  %v5050_v44 = vld [vmem:[#allocation22_spill] sm:$0xff]  ;;  %v5051_v55 = vld [vmem:[#allocation23_spill] sm:$0xff] }
 0x214   :  { %v1440_v61 = vpop.f32.mrb[156].mxu0  ;;  %v1969_v45 = vpop.f32.mrb[156].mxu1 }
 0x215   :  { %v2187_v60 = vmax.f32 %v2138_v7, 0.0  ;;  %v1554_v18 = vmax.f32 %v5037_v57, %v1440_v61  ;;  %v3428_v34 = vpop.f32.mrb[157].mxu0  ;;  %v3532_v58 = vpop.f32.mrb[157].mxu1  ;;  %v5052_v7 = vmax.f32 %v5050_v44, %v5051_v55 }
 0x216   :  { %v1443_v59 = vpop.f32.mrb[158].mxu0  ;;  %v1972_v35 = vpop.f32.mrb[158].mxu1 }
 0x217   :  { %v2975_v27 = vpack.c.bf16 %v2187_v60, %v2186_v28  ;;  %v2083_v62 = vmax.f32 %v1554_v18, %v1969_v45  ;;  %v1555_v1 = vmax.f32 %v5040_v15, %v1443_v59  ;;  %v3429_v8 = vpop.f32.mrb[159].mxu0  ;;  %v3533_v4 = vpop.f32.mrb[159].mxu1  ;;  %v5053_v59 = vld [vmem:[#allocation24_spill] sm:$0xff] }
 0x219   :  { %3039 = vst [vmem:[%s4889_s3 + $0x68] sm:$0xff] %v2975_v27   ;;  %v2139_v14 = vadd.f32 %v4616_v24, %v2083_v62  ;;  %v2084_v9 = vmax.f32 %v1555_v1, %v1972_v35  ;;  %v5054_v35 = vld [vmem:[#allocation25_spill] sm:$0xff] }
 0x21a   :  { %v5055_v27 = vmax.f32 %v5053_v59, %v5054_v35 }
 0x21b   :  { %v2140_v63 = vadd.f32 %v4616_v24, %v2084_v9  ;;  %v2188_v36 = vmax.f32 %v2139_v14, 0.0  ;;  %v5056_v14 = vld [vmem:[#allocation26_spill] sm:$0xff]  ;;  %v5057_v9 = vld [vmem:[#allocation27_spill] sm:$0xff] }
 0x21c   :  { %v1448_v41 = vpop.f32.mrb[160].mxu0  ;;  %v1977_v42 = vpop.f32.mrb[160].mxu1 }
 0x21d   :  { %v2189_v38 = vmax.f32 %v2140_v63, 0.0  ;;  %v1556_v5 = vmax.f32 %v5043_v43, %v1448_v41  ;;  %v3432_v6 = vpop.f32.mrb[161].mxu0  ;;  %v3536_v22 = vpop.f32.mrb[161].mxu1  ;;  %v5058_v63 = vmax.f32 %v5056_v14, %v5057_v9 }
 0x21e   :  { %v1451_v23 = vpop.f32.mrb[162].mxu0  ;;  %v1980_v16 = vpop.f32.mrb[162].mxu1 }
 0x21f   :  { %v2980_v20 = vpack.c.bf16 %v2189_v38, %v2188_v36  ;;  %v2085_v31 = vmax.f32 %v1556_v5, %v1977_v42  ;;  %v1557_v19 = vmax.f32 %v5046_v2, %v1451_v23  ;;  %v3433_v46 = vpop.f32.mrb[163].mxu0  ;;  %v3537_v47 = vpop.f32.mrb[163].mxu1  ;;  %v5059_v23 = vld [vmem:[#allocation28_spill] sm:$0xff] }
 0x221   :  { %3040 = vst [vmem:[%s4889_s3 + $0x70] sm:$0xff] %v2980_v20   ;;  %v2141_v32 = vadd.f32 %v4616_v24, %v2085_v31  ;;  %v2086_v33 = vmax.f32 %v1557_v19, %v1980_v16  ;;  %v5060_v16 = vld [vmem:[#allocation29_spill] sm:$0xff] }
 0x222   :  { %v5061_v20 = vmax.f32 %v5059_v23, %v5060_v16 }
 0x223   :  { %v2142_v50 = vadd.f32 %v4616_v24, %v2086_v33  ;;  %v2190_v13 = vmax.f32 %v2141_v32, 0.0  ;;  %v5062_v32 = vld [vmem:[#allocation30_spill] sm:$0xff]  ;;  %v5063_v33 = vld [vmem:[#allocation31_spill] sm:$0xff] }
 0x224   :  { %v1456_v51 = vpop.f32.mrb[164].mxu0  ;;  %v1985_v3 = vpop.f32.mrb[164].mxu1 }
 0x225   :  { %v2191_v29 = vmax.f32 %v2142_v50, 0.0  ;;  %v1558_v54 = vmax.f32 %v5049_v53, %v1456_v51  ;;  %v3436_v10 = vpop.f32.mrb[165].mxu0  ;;  %v3540_v11 = vpop.f32.mrb[165].mxu1  ;;  %v5064_v50 = vmax.f32 %v5062_v32, %v5063_v33 }
 0x226   :  { %v1459_v12 = vpop.f32.mrb[166].mxu0  ;;  %v1988_v25 = vpop.f32.mrb[166].mxu1 }
 0x227   :  { %v2985_v26 = vpack.c.bf16 %v2191_v29, %v2190_v13  ;;  %v2087_v40 = vmax.f32 %v1558_v54, %v1985_v3  ;;  %v1559_v61 = vmax.f32 %v5052_v7, %v1459_v12  ;;  %v3437_v45 = vpop.f32.mrb[167].mxu0  ;;  %v3541_v28 = vpop.f32.mrb[167].mxu1  ;;  %v5065_v12 = vld [vmem:[#allocation32_spill] sm:$0xff] }
 0x229   :  { %3041 = vst [vmem:[%s4889_s3 + $0x78] sm:$0xff] %v2985_v26   ;;  %v2143_v60 = vadd.f32 %v4616_v24, %v2087_v40  ;;  %v2088_v17 = vmax.f32 %v1559_v61, %v1988_v25  ;;  %v5066_v25 = vld [vmem:[#allocation33_spill] sm:$0xff] }
 0x22a   :  { %v5067_v26 = vmax.f32 %v5065_v12, %v5066_v25 }
 0x22b   :  { %v2144_v56 = vadd.f32 %v4616_v24, %v2088_v17  ;;  %v2192_v34 = vmax.f32 %v2143_v60, 0.0  ;;  %v5068_v60 = vld [vmem:[#allocation34_spill] sm:$0xff]  ;;  %v5069_v17 = vld [vmem:[#allocation35_spill] sm:$0xff] }
 0x22c   :  { %v1464_v57 = vpop.f32.mrb[168].mxu0  ;;  %v1993_v18 = vpop.f32.mrb[168].mxu1 }
 0x22d   :  { %v2193_v58 = vmax.f32 %v2144_v56, 0.0  ;;  %v1560_v62 = vmax.f32 %v5055_v27, %v1464_v57  ;;  %v3440_v21 = vpop.f32.mrb[169].mxu0  ;;  %v3544_v49 = vpop.f32.mrb[169].mxu1  ;;  %v5070_v56 = vmax.f32 %v5068_v60, %v5069_v17 }
 0x22e   :  { %v1467_v15 = vpop.f32.mrb[170].mxu0  ;;  %v1996_v1 = vpop.f32.mrb[170].mxu1 }
 0x22f   :  { %v2990_v8 = vpack.c.bf16 %v2193_v58, %v2192_v34  ;;  %v2089_v4 = vmax.f32 %v1560_v62, %v1993_v18  ;;  %v1561_v41 = vmax.f32 %v5058_v63, %v1467_v15  ;;  %v3441_v42 = vpop.f32.mrb[171].mxu0  ;;  %v3545_v36 = vpop.f32.mrb[171].mxu1  ;;  %v5071_v15 = vld [vmem:[#allocation36_spill] sm:$0xff] }
 0x231   :  { %3042 = vst [vmem:[%s4889_s3 + $0x80] sm:$0xff] %v2990_v8   ;;  %v2145_v38 = vadd.f32 %v4616_v24, %v2089_v4  ;;  %v2090_v39 = vmax.f32 %v1561_v41, %v1996_v1  ;;  %v5072_v1 = vld [vmem:[#allocation37_spill] sm:$0xff] }
 0x232   :  { %v5073_v8 = vmax.f32 %v5071_v15, %v5072_v1 }
 0x233   :  { %v2146_v37 = vadd.f32 %v4616_v24, %v2090_v39  ;;  %v2194_v6 = vmax.f32 %v2145_v38, 0.0  ;;  %v5074_v38 = vld [vmem:[#allocation38_spill] sm:$0xff]  ;;  %v5075_v39 = vld [vmem:[#allocation39_spill] sm:$0xff] }
 0x234   :  { %v1472_v43 = vpop.f32.mrb[172].mxu0  ;;  %v2001_v5 = vpop.f32.mrb[172].mxu1 }
 0x235   :  { %v2195_v22 = vmax.f32 %v2146_v37, 0.0  ;;  %v1562_v31 = vmax.f32 %v5061_v20, %v1472_v43  ;;  %v3444_v48 = vpop.f32.mrb[173].mxu0  ;;  %v3548_v52 = vpop.f32.mrb[173].mxu1  ;;  %v5076_v37 = vmax.f32 %v5074_v38, %v5075_v39 }
 0x236   :  { %v1475_v2 = vpop.f32.mrb[174].mxu0  ;;  %v2004_v19 = vpop.f32.mrb[174].mxu1 }
 0x237   :  { %v2995_v46 = vpack.c.bf16 %v2195_v22, %v2194_v6  ;;  %v2091_v47 = vmax.f32 %v1562_v31, %v2001_v5  ;;  %v1563_v51 = vmax.f32 %v5064_v50, %v1475_v2  ;;  %v3445_v3 = vpop.f32.mrb[175].mxu0  ;;  %v3549_v13 = vpop.f32.mrb[175].mxu1  ;;  %v5077_v2 = vld [vmem:[#allocation40_spill] sm:$0xff] }
 0x239   :  { %3043 = vst [vmem:[%s4889_s3 + $0x88] sm:$0xff] %v2995_v46   ;;  %v2147_v29 = vadd.f32 %v4616_v24, %v2091_v47  ;;  %v2092_v30 = vmax.f32 %v1563_v51, %v2004_v19  ;;  %v5078_v19 = vld [vmem:[#allocation41_spill] sm:$0xff] }
 0x23a   :  { %v5079_v46 = vmax.f32 %v5077_v2, %v5078_v19 }
 0x23b   :  { %v2148_v0 = vadd.f32 %v4616_v24, %v2092_v30  ;;  %v2196_v10 = vmax.f32 %v2147_v29, 0.0  ;;  %v5080_v29 = vld [vmem:[#allocation42_spill] sm:$0xff]  ;;  %v5081_v30 = vld [vmem:[#allocation43_spill] sm:$0xff] }
 0x23c   :  { %v1480_v53 = vpop.f32.mrb[176].mxu0  ;;  %v2009_v54 = vpop.f32.mrb[176].mxu1 }
 0x23d   :  { %v2197_v11 = vmax.f32 %v2148_v0, 0.0  ;;  %v1564_v40 = vmax.f32 %v5067_v26, %v1480_v53  ;;  %v3448_v44 = vpop.f32.mrb[177].mxu0  ;;  %v3552_v55 = vpop.f32.mrb[177].mxu1  ;;  %v5082_v0 = vmax.f32 %v5080_v29, %v5081_v30 }
 0x23e   :  { %v1483_v7 = vpop.f32.mrb[178].mxu0  ;;  %v2012_v61 = vpop.f32.mrb[178].mxu1 }
 0x23f   :  { %v3000_v45 = vpack.c.bf16 %v2197_v11, %v2196_v10  ;;  %v2093_v28 = vmax.f32 %v1564_v40, %v2009_v54  ;;  %v1565_v57 = vmax.f32 %v5070_v56, %v1483_v7  ;;  %v3449_v18 = vpop.f32.mrb[179].mxu0  ;;  %v3553_v34 = vpop.f32.mrb[179].mxu1  ;;  %v5083_v7 = vld [vmem:[#allocation44_spill] sm:$0xff] }
 0x241   :  { %3044 = vst [vmem:[%s4889_s3 + $0x90] sm:$0xff] %v3000_v45   ;;  %v2149_v58 = vadd.f32 %v4616_v24, %v2093_v28  ;;  %v2094_v59 = vmax.f32 %v1565_v57, %v2012_v61  ;;  %v5084_v61 = vld [vmem:[#allocation45_spill] sm:$0xff] }
 0x242   :  { %v5085_v45 = vmax.f32 %v5083_v7, %v5084_v61 }
 0x243   :  { %v2150_v35 = vadd.f32 %v4616_v24, %v2094_v59  ;;  %v2198_v21 = vmax.f32 %v2149_v58, 0.0  ;;  %v5086_v58 = vld [vmem:[#allocation46_spill] sm:$0xff]  ;;  %v5087_v59 = vld [vmem:[#allocation47_spill] sm:$0xff] }
 0x244   :  { %v1488_v27 = vpop.f32.mrb[180].mxu0  ;;  %v2017_v62 = vpop.f32.mrb[180].mxu1 }
 0x245   :  { %v2199_v49 = vmax.f32 %v2150_v35, 0.0  ;;  %v1566_v4 = vmax.f32 %v5073_v8, %v1488_v27  ;;  %v3452_v14 = vpop.f32.mrb[181].mxu0  ;;  %v3556_v9 = vpop.f32.mrb[181].mxu1  ;;  %v5088_v35 = vmax.f32 %v5086_v58, %v5087_v59 }
 0x246   :  { %v1491_v63 = vpop.f32.mrb[182].mxu0  ;;  %v2020_v41 = vpop.f32.mrb[182].mxu1 }
 0x247   :  { %v3005_v42 = vpack.c.bf16 %v2199_v49, %v2198_v21  ;;  %v2095_v36 = vmax.f32 %v1566_v4, %v2017_v62  ;;  %v1567_v43 = vmax.f32 %v5076_v37, %v1491_v63  ;;  %v3453_v5 = vpop.f32.mrb[183].mxu0  ;;  %v3557_v6 = vpop.f32.mrb[183].mxu1  ;;  %v5089_v63 = vld [vmem:[#allocation48_spill] sm:$0xff] }
 0x249   :  { %3045 = vst [vmem:[%s4889_s3 + $0x98] sm:$0xff] %v3005_v42   ;;  %v2151_v22 = vadd.f32 %v4616_v24, %v2095_v36  ;;  %v2096_v23 = vmax.f32 %v1567_v43, %v2020_v41  ;;  %v5090_v41 = vld [vmem:[#allocation49_spill] sm:$0xff] }
 0x24a   :  { %v5091_v42 = vmax.f32 %v5089_v63, %v5090_v41 }
 0x24b   :  { %v2152_v16 = vadd.f32 %v4616_v24, %v2096_v23  ;;  %v2200_v48 = vmax.f32 %v2151_v22, 0.0  ;;  %v5092_v22 = vld [vmem:[#allocation50_spill] sm:$0xff]  ;;  %v5093_v23 = vld [vmem:[#allocation51_spill] sm:$0xff] }
 0x24c   :  { %v1496_v20 = vpop.f32.mrb[184].mxu0  ;;  %v2025_v31 = vpop.f32.mrb[184].mxu1 }
 0x24d   :  { %v2201_v52 = vmax.f32 %v2152_v16, 0.0  ;;  %v1568_v47 = vmax.f32 %v5079_v46, %v1496_v20  ;;  %v3456_v32 = vpop.f32.mrb[185].mxu0  ;;  %v3560_v33 = vpop.f32.mrb[185].mxu1  ;;  %v5094_v16 = vmax.f32 %v5092_v22, %v5093_v23 }
 0x24e   :  { %v1499_v50 = vpop.f32.mrb[186].mxu0  ;;  %v2028_v51 = vpop.f32.mrb[186].mxu1 }
 0x24f   :  { %v3010_v3 = vpack.c.bf16 %v2201_v52, %v2200_v48  ;;  %v2097_v13 = vmax.f32 %v1568_v47, %v2025_v31  ;;  %v1569_v53 = vmax.f32 %v5082_v0, %v1499_v50  ;;  %v3457_v54 = vpop.f32.mrb[187].mxu0  ;;  %v3561_v10 = vpop.f32.mrb[187].mxu1  ;;  %v5095_v50 = vld [vmem:[#allocation52_spill] sm:$0xff] }
 0x251   :  { %3046 = vst [vmem:[%s4889_s3 + $0xa0] sm:$0xff] %v3010_v3   ;;  %v2153_v11 = vadd.f32 %v4616_v24, %v2097_v13  ;;  %v2098_v12 = vmax.f32 %v1569_v53, %v2028_v51  ;;  %v5096_v51 = vld [vmem:[#allocation53_spill] sm:$0xff] }
 0x252   :  { %v5097_v3 = vmax.f32 %v5095_v50, %v5096_v51 }
 0x253   :  { %v2154_v25 = vadd.f32 %v4616_v24, %v2098_v12  ;;  %v2202_v44 = vmax.f32 %v2153_v11, 0.0 }
 0x254   :  { %v1504_v26 = vpop.f32.mrb[188].mxu0  ;;  %v2033_v40 = vpop.f32.mrb[188].mxu1 }
 0x255   :  { %v2203_v55 = vmax.f32 %v2154_v25, 0.0  ;;  %v1570_v28 = vmax.f32 %v5085_v45, %v1504_v26  ;;  %v3460_v60 = vpop.f32.mrb[189].mxu0  ;;  %v3564_v17 = vpop.f32.mrb[189].mxu1 }
 0x256   :  { %v1507_v56 = vpop.f32.mrb[190].mxu0  ;;  %v2036_v57 = vpop.f32.mrb[190].mxu1 }
 0x257   :  { %v3015_v18 = vpack.c.bf16 %v2203_v55, %v2202_v44  ;;  %v2099_v34 = vmax.f32 %v1570_v28, %v2033_v40  ;;  %v1571_v27 = vmax.f32 %v5088_v35, %v1507_v56  ;;  %v3461_v62 = vpop.f32.mrb[191].mxu0  ;;  %v3565_v21 = vpop.f32.mrb[191].mxu1 }
 0x259   :  { %3047 = vst [vmem:[%s4889_s3 + $0xa8] sm:$0xff] %v3015_v18   ;;  %v2155_v49 = vadd.f32 %v4616_v24, %v2099_v34  ;;  %v2100_v15 = vmax.f32 %v1571_v27, %v2036_v57 }
 0x25b   :  { %v2156_v1 = vadd.f32 %v4616_v24, %v2100_v15  ;;  %v2204_v14 = vmax.f32 %v2155_v49, 0.0 }
 0x25c   :  { %v1512_v8 = vpop.f32.mrb[192].mxu0  ;;  %v2041_v4 = vpop.f32.mrb[192].mxu1 }
 0x25d   :  { %v2205_v9 = vmax.f32 %v2156_v1, 0.0  ;;  %v1572_v36 = vmax.f32 %v5091_v42, %v1512_v8  ;;  %v3464_v38 = vpop.f32.mrb[193].mxu0  ;;  %v3568_v39 = vpop.f32.mrb[193].mxu1 }
 0x25e   :  { %v1515_v37 = vpop.f32.mrb[194].mxu0  ;;  %v2044_v43 = vpop.f32.mrb[194].mxu1 }
 0x25f   :  { %v3020_v5 = vpack.c.bf16 %v2205_v9, %v2204_v14  ;;  %v2101_v6 = vmax.f32 %v1572_v36, %v2041_v4  ;;  %v1573_v20 = vmax.f32 %v5094_v16, %v1515_v37  ;;  %v3465_v31 = vpop.f32.mrb[195].mxu0  ;;  %v3569_v48 = vpop.f32.mrb[195].mxu1 }
 0x261   :  { %3048 = vst [vmem:[%s4889_s3 + $0xb0] sm:$0xff] %v3020_v5   ;;  %v2157_v52 = vadd.f32 %v4616_v24, %v2101_v6  ;;  %v2102_v2 = vmax.f32 %v1573_v20, %v2044_v43 }
 0x263   :  { %v2158_v19 = vadd.f32 %v4616_v24, %v2102_v2  ;;  %v2206_v32 = vmax.f32 %v2157_v52, 0.0 }
 0x264   :  { %v1520_v46 = vpop.f32.mrb[196].mxu0  ;;  %v2049_v47 = vpop.f32.mrb[196].mxu1 }
 0x265   :  { %v2207_v33 = vmax.f32 %v2158_v19, 0.0  ;;  %v1574_v13 = vmax.f32 %v5097_v3, %v1520_v46  ;;  %v3468_v29 = vpop.f32.mrb[197].mxu0  ;;  %v3572_v30 = vpop.f32.mrb[197].mxu1 }
 0x266   :  { %v1523_v0 = vpop.f32.mrb[198].mxu0  ;;  %v2052_v53 = vpop.f32.mrb[198].mxu1 }
 0x267   :  { %v3025_v54 = vpack.c.bf16 %v2207_v33, %v2206_v32  ;;  %v2103_v10 = vmax.f32 %v1574_v13, %v2049_v47  ;;  %v3469_v11 = vpop.f32.mrb[199].mxu0  ;;  %v3573_v12 = vpop.f32.mrb[199].mxu1 }
 0x269   :  { %3049 = vst [vmem:[%s4889_s3 + $0xb8] sm:$0xff] %v3025_v54   ;;  %v2159_v25 = vadd.f32 %v4616_v24, %v2103_v10 }
 0x26b   :  { %v2208_v26 = vmax.f32 %v2159_v25, 0.0 }
 0x26d   :  { %v2906_v40 = vpack.c.bf16 %v2208_v26, %v2208_v26 }
 0x26f   :  { %2454 = vst [vmem:[%s4889_s3 + $0xc0] sm:$0xf] %v2906_v40 }

// kernel: simple_cnn_forward.4
= control target key start
LH: loop header
LB: loop body
LE: loop exit
PB: predicated region body
PF: predicated region fallthrough
CT: control target
= control target key end

     0   :  { %v2395_v0 = vmov 0.0   ;;  %vm2396_vm0 = vmmov 0   ;;  %vm285_vm1 = vcmask 261120   ;;  %s3110_s1 = inlined_call_operand.vmem [shape: bf16[288,128], index: 1, kind: input, shape index: {}]   ;;  %s3111_s0 = inlined_call_operand.vmem [shape: bf16[4,104,288], index: 0, kind: input, shape index: {}]   ;;  %s3112_s2 = inlined_call_operand.vmem [shape: f32[1,128], index: 2, kind: input, shape index: {}]   ;;  %s3113_s3 = inlined_call_operand.vmem [shape: bf16[104,128], index: 3, kind: output, shape index: {}]  }
   0x1   :  { %2135 = vmatprep.subr.bf16.mxu1 %v2395_v0  ;;  %v2421_v1 = vld [vmem:[%s3110_s1 + $0x40] sm:$0xff]   ;;  %2139 = vmatprep.mubr.msk.bf16.mxu1 %vm2396_vm0, %v2395_v0  ;;  %v2440_v4 = vld [vmem:[%s3110_s1 + $0x48] sm:$0xff]   ;;  %v2462_v8 = vld [vmem:[%s3110_s1 + $0x50] sm:$0xff]  }
   0x2   :  { %v2428_v2 = vld [vmem:[%s3110_s1 + $0x80] sm:$0xff]   ;;  %1867 = vmatprep.subr.bf16.mxu0 %v2421_v1  ;;  %v2447_v5 = vld [vmem:[%s3110_s1 + $0x88] sm:$0xff]   ;;  %v2468_v9 = vld [vmem:[%s3110_s1 + $0x10] sm:$0xff]  }
   0x3   :  { %v2434_v3 = vld [vmem:[%s3110_s1] sm:$0xff]   ;;  %2136 = vmatpush3.bf16.msra.mxu1 %v2428_v2  ;;  %v2453_v6 = vld [vmem:[%s3110_s1 + $0x8] sm:$0xff]   ;;  %v2475_v10 = vld [vmem:[%s3110_s1 + $0x58] sm:$0xff]  }
   0x4   :  { %1868 = vmatpush3.bf16.msra.mxu0 %v2434_v3  ;;  %2137 = vmatprep.subr.bf16.mxu1 %v2395_v0  ;;  %v2275_v7 = vld [vmem:[%s3111_s0 + $0x8] ss:$12 sps:$4 sm:$0xff]   ;;  %v2485_v11 = vld [vmem:[%s3110_s1 + $0x18] sm:$0xff]   ;;  %v2492_v12 = vld [vmem:[%s3110_s1 + $0x60] sm:$0xff]  }
   0x5   :  { %1869 = vmatprep.subr.bf16.mxu0 %v2440_v4  ;;  %v2280_v13 = vld [vmem:[%s3111_s0 + $0x20] ss:$12 sps:$4 sm:$0xff]   ;;  %v2285_v17 = vld [vmem:[%s3111_s0 + $0x38] ss:$12 sps:$4 sm:$0xff]   ;;  %v2529_v18 = vld [vmem:[%s3110_s1 + $0x70] sm:$0xff]  }
   0x6   :  { %v2502_v14 = vld [vmem:[%s3110_s1 + $0x20] sm:$0xff]   ;;  %v2509_v15 = vld [vmem:[%s3110_s1 + $0x68] sm:$0xff]   ;;  %v2539_v20 = vld [vmem:[%s3110_s1 + $0x30] sm:$0xff]  }
   0x7   :  { %2138 = vmatpush3.bf16.msra.mxu1 %v2447_v5  ;;  %v2515_v16 = vld [vmem:[%s3110_s1 + $0x28] sm:$0xff]   ;;  %v2292_v19 = vld [vmem:[%s3111_s0 + $0x4] ss:$12 sps:$4 sm:$0xff]   ;;  %v2545_v21 = vld [vmem:[%s3110_s1 + $0x78] sm:$0xff]  }
   0x8   :  { %1870 = vmatpush3.bf16.msra.mxu0 %v2453_v6  ;;  %1934 = vmatprep.subr.bf16.mxu1 %v2421_v1  ;;  %v2556_v22 = vld [vmem:[%s3110_s1 + $0x38] sm:$0xff]   ;;  %v2290_v24 = vld [vmem:[%s3111_s0] ss:$12 sps:$4 sm:$0xff]   ;;  %v2296_v26 = vld [vmem:[%s3111_s0 + $0x68] ss:$12 sps:$4 sm:$0xff]  }
   0x9   :  { %1871 = vmatprep.subr.bf16.mxu0 %v2462_v8  ;;  %339 = vmatprep.mubr.bf16.mxu0 %v2292_v19  ;;  %v2293_v23 = vld [vmem:[%s3111_s0 + $0x50] ss:$12 sps:$4 sm:$0xff]   ;;  %v2297_v27 = vld [vmem:[%s3111_s0 + $0x18] ss:$12 sps:$4 sm:$0xff]   ;;  %v2298_v28 = vld [vmem:[%s3111_s0 + $0x34] ss:$12 sps:$4 sm:$0xff]  }
   0xa   :  { %2140 = vmatmul.mubr.msk.bf16.vlgmr.msra.gmra.mrb[0].mxu1 %vm285_vm1, %v2275_v7  ;;  %v2294_v25 = vld [vmem:[%s3111_s0 + $0x1c] ss:$12 sps:$4 sm:$0xff]   ;;  %v2300_v29 = vld [vmem:[%s3111_s0 + $0x80] ss:$12 sps:$4 sm:$0xff]   ;;  %v2304_v32 = vld [vmem:[%s3111_s0 + $0x98] ss:$0 sps:$4 sm:$0xff]  }
   0xb   :  { %2143 = vmatprep.mubr.msk.bf16.mxu1 %vm2396_vm0, %v2395_v0  ;;  %1935 = vmatpush3.bf16.msra.mxu1 %v2434_v3  ;;  %v2301_v30 = vld [vmem:[%s3111_s0 + $0x30] ss:$12 sps:$4 sm:$0xff]   ;;  %v2302_v31 = vld [vmem:[%s3111_s0 + $0x4c] ss:$12 sps:$4 sm:$0xff]   ;;  %v2305_v33 = vld [vmem:[%s3111_s0 + $0x48] ss:$12 sps:$4 sm:$0xff]  }
   0xc   :  { %1872 = vmatpush3.bf16.msra.mxu0 %v2468_v9  ;;  %1936 = vmatprep.subr.bf16.mxu1 %v2440_v4  ;;  %v2308_v34 = vld [vmem:[%s3111_s0 + $0xa0] ss:$12 sps:$4 sm:$0xff]   ;;  %v2309_v35 = vld [vmem:[%s3111_s0 + $0x64] ss:$12 sps:$4 sm:$0xff]   ;;  %v2306_v36 = vld [vmem:[%s3111_s0 + $0x9c] ss:$12 sps:$4 sm:$0xff]  }
   0xd   :  { %1873 = vmatprep.subr.bf16.mxu0 %v2475_v10  ;;  %v2311_v37 = vld [vmem:[%s3111_s0 + $0x60] ss:$12 sps:$4 sm:$0xff]   ;;  %v2312_v38 = vld [vmem:[%s3111_s0 + $0xb8] ss:$12 sps:$4 sm:$0xff]   ;;  %v2314_v39 = vld [vmem:[%s3111_s0 + $0x7c] ss:$12 sps:$4 sm:$0xff]  }
   0xe   :  { %v2316_v40 = vld [vmem:[%s3111_s0 + $0xb4] ss:$12 sps:$4 sm:$0xff]   ;;  %v2317_v42 = vld [vmem:[%s3111_s0 + $0x78] ss:$12 sps:$4 sm:$0xff]   ;;  %v2318_v43 = vld [vmem:[%s3111_s0 + $0xd0] ss:$12 sps:$4 sm:$0xff]  }
   0xf   :  { %1937 = vmatpush3.bf16.msra.mxu1 %v2453_v6  ;;  %v75_v41 = vld [vmem:[%s3111_s0 + $0x90] sm:$0xff]  ;;  %v2321_v45 = vld [vmem:[%s3111_s0 + $0xcc] ss:$12 sps:$4 sm:$0xff]   ;;  %v2329_v51 = vld [vmem:[%s3111_s0 + $0xfc] ss:$12 sps:$4 sm:$0xff]  }
  0x10   :  { %1874 = vmatpush3.bf16.msra.mxu0 %v2485_v11  ;;  %1938 = vmatprep.subr.bf16.mxu1 %v2462_v8  ;;  %v1616_v44 = vcombine.high %v75_v41, %v75_v41  ;;  %v1615_v46 = vcombine.low %v75_v41, %v75_v41  ;;  %v2323_v47 = vld [vmem:[%s3111_s0 + $0xe8] ss:$12 sps:$4 sm:$0xff]   ;;  %v2325_v48 = vld [vmem:[%s3111_s0 + $0xe4] ss:$12 sps:$4 sm:$0xff]   ;;  %v2327_v50 = vld [vmem:[%s3111_s0 + $0x100] ss:$12 sps:$4 sm:$0xff]  }
  0x11   :  { %1875 = vmatprep.subr.bf16.mxu0 %v2492_v12  ;;  %v2326_v49 = vld [vmem:[%s3111_s0 + $0xa4] ss:$12 sps:$4 sm:$0xff]   ;;  %v2330_v52 = vld [vmem:[%s3111_s0 + $0xbc] ss:$12 sps:$4 sm:$0xff]   ;;  %v2333_v55 = vld [vmem:[%s3111_s0 + $0x114] ss:$12 sps:$4 sm:$0xff]  }
  0x12   :  { %2144 = vmatmul.mubr.msk.bf16.gmra.mrb[4].mxu1 %vm285_vm1, %v2280_v13  ;;  %v2331_v53 = vld [vmem:[%s3111_s0 + $0x118] ss:$12 sps:$4 sm:$0xff]   ;;  %v1667_v54 = vld [vmem:[%s3111_s0 + $0x12c] sm:$0xff]  ;;  %v2334_v56 = vld [vmem:[%s3111_s0 + $0xd4] ss:$12 sps:$4 sm:$0xff]  }
  0x13   :  { %2147 = vmatprep.mubr.msk.bf16.mxu1 %vm2396_vm0, %v2395_v0  ;;  %1939 = vmatpush3.bf16.msra.mxu1 %v2468_v9  ;;  %v1688_v57 = vcombine.high %v1667_v54, %v1667_v54  ;;  %v1687_v58 = vcombine.low %v1667_v54, %v1667_v54  ;;  %v2337_v59 = vld [vmem:[%s3111_s0 + $0xec] ss:$12 sps:$4 sm:$0xff]   ;;  %v2340_v60 = vld [vmem:[%s3111_s0 + $0x13c] ss:$12 sps:$4 sm:$0xff]   ;;  %v2341_v62 = vld [vmem:[%s3111_s0 + $0x104] ss:$12 sps:$4 sm:$0xff]  }
  0x14   :  { %1876 = vmatpush3.bf16.msra.mxu0 %v2502_v14  ;;  %1940 = vmatprep.subr.bf16.mxu1 %v2475_v10  ;;  %v2338_v61 = vld [vmem:[%s3111_s0 + $0x138] ss:$12 sps:$4 sm:$0xff]   ;;  %v2342_v63 = vld [vmem:[%s3111_s0 + $0x154] ss:$12 sps:$4 sm:$0xff]   ;;  %v2345_v7 = vld [vmem:[%s3111_s0 + $0x11c] ss:$12 sps:$4 sm:$0xff]  }
  0x15   :  { %1877 = vmatprep.subr.bf16.mxu0 %v2509_v15  ;;  %v2346_v13 = vld [vmem:[%s3111_s0 + $0x16c] ss:$12 sps:$4 sm:$0xff]  }
  0x17   :  { %1941 = vmatpush3.bf16.msra.mxu1 %v2485_v11 }
  0x18   :  { %1878 = vmatpush3.bf16.msra.mxu0 %v2515_v16  ;;  %1942 = vmatprep.subr.bf16.mxu1 %v2492_v12 }
  0x19   :  { %1879 = vmatprep.subr.bf16.mxu0 %v2529_v18 }
  0x1a   :  { %2148 = vmatmul.mubr.msk.bf16.gmra.mrb[8].mxu1 %vm285_vm1, %v2285_v17  ;;  %v2361_v17 = vld [vmem:[%s3111_s0 + $0x170] ss:$12 sps:$4 sm:$0xff]  }
  0x1b   :  { %2151 = vmatprep.mubr.msk.bf16.mxu1 %vm2396_vm0, %v2395_v0  ;;  %1943 = vmatpush3.bf16.msra.mxu1 %v2502_v14 }
  0x1c   :  { %1880 = vmatpush3.bf16.msra.mxu0 %v2539_v20  ;;  %1944 = vmatprep.subr.bf16.mxu1 %v2509_v15 }
  0x1d   :  { %1881 = vmatprep.subr.bf16.mxu0 %v2545_v21 }
  0x1f   :  { %1945 = vmatpush3.bf16.msra.mxu1 %v2515_v16 }
  0x20   :  { %1882 = vmatpush3.bf16.msra.mxu0 %v2556_v22  ;;  %1946 = vmatprep.subr.bf16.mxu1 %v2529_v18 }
  0x21   :  { %2167 = vmatprep.subr.bf16.mxu0 %v2395_v0 }
  0x22   :  { %2152 = vmatmul.mubr.msk.bf16.gmra.mrb[12].mxu1 %vm285_vm1, %v2293_v23  ;;  %v2368_v23 = vld [vmem:[%s3111_s0 + $0x1a0] ss:$12 sps:$4 sm:$0xff]  }
  0x23   :  { %340 = vmatmul.mubr.bf16.vlgmr.msra.gmra.mrb[0].mxu0 %v2290_v24  ;;  %2155 = vmatprep.mubr.msk.bf16.mxu1 %vm2396_vm0, %v2395_v0  ;;  %v2369_v24 = vld [vmem:[%s3111_s0 + $0x1f0] ss:$12 sps:$4 sm:$0xff]  }
  0x24   :  { %2168 = vmatpush3.bf16.msra.mxu0 %v2428_v2  ;;  %347 = vmatprep.mubr.bf16.mxu0 %v2294_v25  ;;  %v2371_v25 = vld [vmem:[%s3111_s0 + $0x1ec] ss:$12 sps:$4 sm:$0xff]  }
  0x25   :  { %1947 = vmatpush3.bf16.msra.mxu1 %v2539_v20  ;;  %2169 = vmatprep.subr.bf16.mxu0 %v2395_v0 }
  0x26   :  { %1948 = vmatprep.subr.bf16.mxu1 %v2545_v21 }
  0x28   :  { %2170 = vmatpush3.bf16.msra.mxu0 %v2447_v5 }
  0x29   :  { %1949 = vmatpush3.bf16.msra.mxu1 %v2556_v22  ;;  %2199 = vmatprep.subr.bf16.mxu0 %v2395_v0 }
  0x2a   :  { %2156 = vmatmul.mubr.msk.bf16.gmra.mrb[16].mxu1 %vm285_vm1, %v2296_v26  ;;  %2001 = vmatprep.subr.bf16.mxu1 %v2421_v1  ;;  %v2372_v26 = vld [vmem:[%s3111_s0 + $0x1b8] ss:$12 sps:$4 sm:$0xff]  }
  0x2b   :  { %348 = vmatmul.mubr.bf16.gmra.mrb[4].mxu0 %v2297_v27  ;;  %2159 = vmatprep.mubr.msk.bf16.mxu1 %vm2396_vm0, %v2395_v0  ;;  %v2373_v27 = vld [vmem:[%s3111_s0 + $0x208] ss:$12 sps:$4 sm:$0xff]  }
  0x2c   :  { %355 = vmatprep.mubr.bf16.mxu0 %v2298_v28  ;;  %v2376_v28 = vld [vmem:[%s3111_s0 + $0x1d0] ss:$0 sps:$4 sm:$0xff]  }
  0x32   :  { %2160 = vmatmul.mubr.msk.bf16.gmra.mrb[20].mxu1 %vm285_vm1, %v2300_v29  ;;  %v2377_v29 = vld [vmem:[%s3111_s0 + $0x220] ss:$12 sps:$4 sm:$0xff]  }
  0x33   :  { %356 = vmatmul.mubr.bf16.gmra.mrb[8].mxu0 %v2301_v30  ;;  %2163 = vmatprep.mubr.msk.bf16.mxu1 %vm2396_vm0, %v2395_v0  ;;  %v2380_v30 = vld [vmem:[%s3111_s0 + $0x1dc] ss:$12 sps:$4 sm:$0xff]  }
  0x34   :  { %363 = vmatprep.mubr.bf16.mxu0 %v2302_v31  ;;  %v2381_v31 = vld [vmem:[%s3111_s0 + $0x238] ss:$12 sps:$4 sm:$0xff]  }
  0x3a   :  { %2164 = vmatmul.mubr.msk.bf16.gmra.mrb[24].mxu1 %vm285_vm1, %v2304_v32  ;;  %v2383_v32 = vld [vmem:[%s3111_s0 + $0x234] ss:$12 sps:$4 sm:$0xff]  }
  0x3b   :  { %364 = vmatmul.mubr.bf16.gmra.mrb[12].mxu0 %v2305_v33  ;;  %663 = vmatprep.mubr.bf16.mxu1 %v2308_v34  ;;  %v2384_v33 = vld [vmem:[%s3111_s0 + $0x1f4] ss:$12 sps:$4 sm:$0xff]   ;;  %v2385_v34 = vld [vmem:[%s3111_s0 + $0x250] ss:$12 sps:$4 sm:$0xff]  }
  0x3c   :  { %371 = vmatprep.mubr.bf16.mxu0 %v2309_v35  ;;  %v1775_v35 = vld [vmem:[%s3111_s0 + $0x264] sm:$0xff] }
  0x42   :  { %664 = vmatmul.mubr.bf16.vlgmr.msra.gmra.mrb[28].mxu1 %v2306_v36  ;;  %v2387_v36 = vld [vmem:[%s3111_s0 + $0x24c] ss:$12 sps:$4 sm:$0xff]  }
  0x43   :  { %372 = vmatmul.mubr.bf16.gmra.mrb[16].mxu0 %v2311_v37  ;;  %671 = vmatprep.mubr.bf16.mxu1 %v2312_v38  ;;  %v2388_v37 = vld [vmem:[%s3111_s0 + $0x20c] ss:$12 sps:$4 sm:$0xff]   ;;  %v1796_v38 = vcombine.high %v1775_v35, %v1775_v35 }
  0x44   :  { %379 = vmatprep.mubr.bf16.mxu0 %v2314_v39  ;;  %2002 = vmatpush3.bf16.msra.mxu1 %v2434_v3 }
  0x45   :  { %2003 = vmatprep.subr.bf16.mxu1 %v2440_v4 }
  0x48   :  { %2004 = vmatpush3.bf16.msra.mxu1 %v2453_v6 }
  0x49   :  { %2005 = vmatprep.subr.bf16.mxu1 %v2462_v8 }
  0x4a   :  { %672 = vmatmul.mubr.bf16.gmra.mrb[32].mxu1 %v2316_v40  ;;  %v1795_v40 = vcombine.low %v1775_v35, %v1775_v35 }
  0x4b   :  { %380 = vmatmul.mubr.bf16.gmra.mrb[20].mxu0 %v2317_v42  ;;  %679 = vmatprep.mubr.bf16.mxu1 %v2318_v43  ;;  %v2391_v42 = vld [vmem:[%s3111_s0 + $0x224] ss:$12 sps:$4 sm:$0xff]  }
  0x4c   :  { %387 = vmatprep.mubr.bf16.mxu0 %v1616_v44  ;;  %2006 = vmatpush3.bf16.msra.mxu1 %v2468_v9 }
  0x4d   :  { %2007 = vmatprep.subr.bf16.mxu1 %v2475_v10 }
  0x50   :  { %2008 = vmatpush3.bf16.msra.mxu1 %v2485_v11 }
  0x51   :  { %2009 = vmatprep.subr.bf16.mxu1 %v2492_v12 }
  0x52   :  { %680 = vmatmul.mubr.bf16.gmra.mrb[36].mxu1 %v2321_v45 }
  0x53   :  { %388 = vmatmul.mubr.bf16.gmra.mrb[24].mxu0 %v1615_v46  ;;  %687 = vmatprep.mubr.bf16.mxu1 %v2323_v47  ;;  %v2392_v46 = vld [vmem:[%s3111_s0 + $0x26c] ss:$0 sps:$4 sm:$0xff]  }
  0x54   :  { %2171 = vmatprep.mubr.msk.bf16.mxu0 %vm2396_vm0, %v2395_v0  ;;  %2010 = vmatpush3.bf16.msra.mxu1 %v2502_v14 }
  0x55   :  { %2011 = vmatprep.subr.bf16.mxu1 %v2509_v15 }
  0x58   :  { %2012 = vmatpush3.bf16.msra.mxu1 %v2515_v16 }
  0x59   :  { %2013 = vmatprep.subr.bf16.mxu1 %v2529_v18 }
  0x5a   :  { %688 = vmatmul.mubr.bf16.gmra.mrb[40].mxu1 %v2325_v48  ;;  %v2393_v48 = vld [vmem:[%s3111_s0 + $0x23c] ss:$12 sps:$4 sm:$0xff]  }
  0x5b   :  { %2172 = vmatmul.mubr.msk.bf16.vlgmr.msra.gmra.mrb[28].mxu0 %vm285_vm1, %v2326_v49  ;;  %695 = vmatprep.mubr.bf16.mxu1 %v2327_v50 }
  0x5c   :  { %2200 = vmatpush3.bf16.msra.mxu0 %v2428_v2  ;;  %2175 = vmatprep.mubr.msk.bf16.mxu0 %vm2396_vm0, %v2395_v0 }
  0x5d   :  { %2014 = vmatpush3.bf16.msra.mxu1 %v2539_v20  ;;  %2201 = vmatprep.subr.bf16.mxu0 %v2395_v0 }
  0x5e   :  { %2015 = vmatprep.subr.bf16.mxu1 %v2545_v21 }
  0x60   :  { %2202 = vmatpush3.bf16.msra.mxu0 %v2447_v5 }
  0x61   :  { %2016 = vmatpush3.bf16.msra.mxu1 %v2556_v22  ;;  %2231 = vmatprep.subr.bf16.mxu0 %v2395_v0 }
  0x62   :  { %696 = vmatmul.mubr.bf16.gmra.mrb[44].mxu1 %v2329_v51  ;;  %2068 = vmatprep.subr.bf16.mxu1 %v2421_v1  ;;  %v2344_v1 = vld [vmem:[%s3111_s0 + $0x150] ss:$12 sps:$4 sm:$0xff]  }
  0x63   :  { %2176 = vmatmul.mubr.msk.bf16.gmra.mrb[32].mxu0 %vm285_vm1, %v2330_v52  ;;  %703 = vmatprep.mubr.bf16.mxu1 %v2331_v53  ;;  %v2394_v53 = vld [vmem:[%s3111_s0 + $0x254] ss:$12 sps:$4 sm:$0xff]  }
  0x64   :  { %2179 = vmatprep.mubr.msk.bf16.mxu0 %vm2396_vm0, %v2395_v0 }
  0x6a   :  { %704 = vmatmul.mubr.bf16.gmra.mrb[48].mxu1 %v2333_v55 }
  0x6b   :  { %2180 = vmatmul.mubr.msk.bf16.gmra.mrb[36].mxu0 %vm285_vm1, %v2334_v56  ;;  %711 = vmatprep.mubr.bf16.mxu1 %v1688_v57 }
  0x6c   :  { %2183 = vmatprep.mubr.msk.bf16.mxu0 %vm2396_vm0, %v2395_v0 }
  0x72   :  { %712 = vmatmul.mubr.bf16.gmra.mrb[52].mxu1 %v1687_v58 }
  0x73   :  { %2184 = vmatmul.mubr.msk.bf16.gmra.mrb[40].mxu0 %vm285_vm1, %v2337_v59  ;;  %1000 = vmatprep.mubr.bf16.mxu1 %v2340_v60 }
  0x74   :  { %2187 = vmatprep.mubr.msk.bf16.mxu0 %vm2396_vm0, %v2395_v0 }
  0x7a   :  { %1001 = vmatmul.mubr.bf16.vlgmr.msra.gmra.mrb[56].mxu1 %v2338_v61 }
  0x7b   :  { %2188 = vmatmul.mubr.msk.bf16.gmra.mrb[44].mxu0 %vm285_vm1, %v2341_v62  ;;  %1008 = vmatprep.mubr.bf16.mxu1 %v2342_v63 }
  0x7c   :  { %2191 = vmatprep.mubr.msk.bf16.mxu0 %vm2396_vm0, %v2395_v0  ;;  %2069 = vmatpush3.bf16.msra.mxu1 %v2434_v3  ;;  %v2348_v3 = vld [vmem:[%s3111_s0 + $0x168] ss:$12 sps:$4 sm:$0xff]  }
  0x7d   :  { %2070 = vmatprep.subr.bf16.mxu1 %v2440_v4  ;;  %v2349_v4 = vld [vmem:[%s3111_s0 + $0x134] ss:$0 sps:$4 sm:$0xff]  }
  0x80   :  { %2071 = vmatpush3.bf16.msra.mxu1 %v2453_v6  ;;  %v2350_v6 = vld [vmem:[%s3111_s0 + $0x184] ss:$12 sps:$4 sm:$0xff]  }
  0x81   :  { %2072 = vmatprep.subr.bf16.mxu1 %v2462_v8  ;;  %v2352_v8 = vld [vmem:[%s3111_s0 + $0x180] ss:$12 sps:$4 sm:$0xff]  }
  0x82   :  { %1009 = vmatmul.mubr.bf16.gmra.mrb[60].mxu1 %v2344_v1 }
  0x83   :  { %2192 = vmatmul.mubr.msk.bf16.gmra.mrb[48].mxu0 %vm285_vm1, %v2345_v7  ;;  %1016 = vmatprep.mubr.bf16.mxu1 %v2346_v13 }
  0x84   :  { %2195 = vmatprep.mubr.msk.bf16.mxu0 %vm2396_vm0, %v2395_v0  ;;  %2073 = vmatpush3.bf16.msra.mxu1 %v2468_v9  ;;  %v2353_v9 = vld [vmem:[%s3111_s0 + $0x140] ss:$12 sps:$4 sm:$0xff]  }
  0x85   :  { %2074 = vmatprep.subr.bf16.mxu1 %v2475_v10  ;;  %v2354_v10 = vld [vmem:[%s3111_s0 + $0x19c] ss:$12 sps:$4 sm:$0xff]  }
  0x88   :  { %2075 = vmatpush3.bf16.msra.mxu1 %v2485_v11  ;;  %v2356_v11 = vld [vmem:[%s3111_s0 + $0x198] ss:$12 sps:$4 sm:$0xff]  }
  0x89   :  { %2076 = vmatprep.subr.bf16.mxu1 %v2492_v12  ;;  %v2357_v12 = vld [vmem:[%s3111_s0 + $0x158] ss:$12 sps:$4 sm:$0xff]  }
  0x8a   :  { %1017 = vmatmul.mubr.bf16.gmra.mrb[64].mxu1 %v2348_v3 }
  0x8b   :  { %2196 = vmatmul.mubr.msk.bf16.gmra.mrb[52].mxu0 %vm285_vm1, %v2349_v4  ;;  %1024 = vmatprep.mubr.bf16.mxu1 %v2350_v6 }
  0x8c   :  { %2203 = vmatprep.mubr.msk.bf16.mxu0 %vm2396_vm0, %v2395_v0  ;;  %2077 = vmatpush3.bf16.msra.mxu1 %v2502_v14  ;;  %v2358_v14 = vld [vmem:[%s3111_s0 + $0x1b4] ss:$12 sps:$4 sm:$0xff]  }
  0x8d   :  { %2078 = vmatprep.subr.bf16.mxu1 %v2509_v15  ;;  %v1721_v15 = vld [vmem:[%s3111_s0 + $0x1c8] sm:$0xff] }
  0x8e   :  { %v1741_v19 = vcombine.low %v1721_v15, %v1721_v15 }
  0x90   :  { %2079 = vmatpush3.bf16.msra.mxu1 %v2515_v16  ;;  %v2360_v16 = vld [vmem:[%s3111_s0 + $0x1b0] ss:$12 sps:$4 sm:$0xff]  }
  0x91   :  { %2080 = vmatprep.subr.bf16.mxu1 %v2529_v18  ;;  %v1742_v18 = vcombine.high %v1721_v15, %v1721_v15 }
  0x92   :  { %1025 = vmatmul.mubr.bf16.gmra.mrb[68].mxu1 %v2352_v8 }
  0x93   :  { %2204 = vmatmul.mubr.msk.bf16.vlgmr.msra.gmra.mrb[56].mxu0 %vm285_vm1, %v2353_v9  ;;  %1032 = vmatprep.mubr.bf16.mxu1 %v2354_v10 }
  0x94   :  { %2232 = vmatpush3.bf16.msra.mxu0 %v2428_v2  ;;  %2207 = vmatprep.mubr.msk.bf16.mxu0 %vm2396_vm0, %v2395_v0 }
  0x95   :  { %2081 = vmatpush3.bf16.msra.mxu1 %v2539_v20  ;;  %2233 = vmatprep.subr.bf16.mxu0 %v2395_v0  ;;  %v2364_v20 = vld [vmem:[%s3111_s0 + $0x188] ss:$12 sps:$4 sm:$0xff]  }
  0x96   :  { %2082 = vmatprep.subr.bf16.mxu1 %v2545_v21  ;;  %v2367_v21 = vld [vmem:[%s3111_s0 + $0x1d8] ss:$12 sps:$4 sm:$0xff]  }
  0x98   :  { %2234 = vmatpush3.bf16.msra.mxu0 %v2447_v5 }
  0x99   :  { %2083 = vmatpush3.bf16.msra.mxu1 %v2556_v22  ;;  %v2365_v22 = vld [vmem:[%s3111_s0 + $0x1d4] ss:$12 sps:$4 sm:$0xff]  }
  0x9a   :  { %1033 = vmatmul.mubr.bf16.gmra.mrb[72].mxu1 %v2356_v11  ;;  %2263 = vmatprep.subr.bf16.mxu1 %v2395_v0 }
  0x9b   :  { %2208 = vmatmul.mubr.msk.bf16.gmra.mrb[60].mxu0 %vm285_vm1, %v2357_v12  ;;  %1040 = vmatprep.mubr.bf16.mxu1 %v2358_v14 }
  0x9c   :  { %2211 = vmatprep.mubr.msk.bf16.mxu0 %vm2396_vm0, %v2395_v0 }
  0xa2   :  { %1041 = vmatmul.mubr.bf16.gmra.mrb[76].mxu1 %v2360_v16 }
  0xa3   :  { %2212 = vmatmul.mubr.msk.bf16.gmra.mrb[64].mxu0 %vm285_vm1, %v2361_v17  ;;  %1048 = vmatprep.mubr.bf16.mxu1 %v1742_v18 }
  0xa4   :  { %2215 = vmatprep.mubr.msk.bf16.mxu0 %vm2396_vm0, %v2395_v0 }
  0xaa   :  { %1049 = vmatmul.mubr.bf16.gmra.mrb[80].mxu1 %v1741_v19 }
  0xab   :  { %2216 = vmatmul.mubr.msk.bf16.gmra.mrb[68].mxu0 %vm285_vm1, %v2364_v20  ;;  %1337 = vmatprep.mubr.bf16.mxu1 %v2367_v21 }
  0xac   :  { %2219 = vmatprep.mubr.msk.bf16.mxu0 %vm2396_vm0, %v2395_v0 }
  0xb2   :  { %1338 = vmatmul.mubr.bf16.vlgmr.msra.gmra.mrb[84].mxu1 %v2365_v22 }
  0xb3   :  { %2220 = vmatmul.mubr.msk.bf16.gmra.mrb[72].mxu0 %vm285_vm1, %v2368_v23  ;;  %1345 = vmatprep.mubr.bf16.mxu1 %v2369_v24 }
  0xb4   :  { %2223 = vmatprep.mubr.msk.bf16.mxu0 %vm2396_vm0, %v2395_v0  ;;  %2265 = vmatpush3.bf16.msra.mxu1 %v2428_v2  ;;  %v2375_v2 = vld [vmem:[%s3111_s0 + $0x204] ss:$12 sps:$4 sm:$0xff]  }
  0xb5   :  { %2264 = vmatprep.subr.bf16.mxu1 %v2395_v0 }
  0xb8   :  { %2266 = vmatpush3.bf16.msra.mxu1 %v2447_v5  ;;  %v2379_v5 = vld [vmem:[%s3111_s0 + $0x21c] ss:$12 sps:$4 sm:$0xff]  }
  0xba   :  { %1346 = vmatmul.mubr.bf16.gmra.mrb[88].mxu1 %v2371_v25 }
  0xbb   :  { %2224 = vmatmul.mubr.msk.bf16.gmra.mrb[76].mxu0 %vm285_vm1, %v2372_v26  ;;  %1353 = vmatprep.mubr.bf16.mxu1 %v2373_v27 }
  0xbc   :  { %2227 = vmatprep.mubr.msk.bf16.mxu0 %vm2396_vm0, %v2395_v0 }
  0xc2   :  { %1354 = vmatmul.mubr.bf16.gmra.mrb[92].mxu1 %v2375_v2 }
  0xc3   :  { %2228 = vmatmul.mubr.msk.bf16.gmra.mrb[80].mxu0 %vm285_vm1, %v2376_v28  ;;  %1361 = vmatprep.mubr.bf16.mxu1 %v2377_v29 }
  0xc4   :  { %2235 = vmatprep.mubr.msk.bf16.mxu0 %vm2396_vm0, %v2395_v0 }
  0xca   :  { %1362 = vmatmul.mubr.bf16.gmra.mrb[96].mxu1 %v2379_v5 }
  0xcb   :  { %2236 = vmatmul.mubr.msk.bf16.vlgmr.msra.gmra.mrb[84].mxu0 %vm285_vm1, %v2380_v30  ;;  %1369 = vmatprep.mubr.bf16.mxu1 %v2381_v31 }
  0xcc   :  { %2239 = vmatprep.mubr.msk.bf16.mxu0 %vm2396_vm0, %v2395_v0 }
  0xd2   :  { %1370 = vmatmul.mubr.bf16.gmra.mrb[100].mxu1 %v2383_v32 }
  0xd3   :  { %2240 = vmatmul.mubr.msk.bf16.gmra.mrb[88].mxu0 %vm285_vm1, %v2384_v33  ;;  %1377 = vmatprep.mubr.bf16.mxu1 %v2385_v34 }
  0xd4   :  { %2243 = vmatprep.mubr.msk.bf16.mxu0 %vm2396_vm0, %v2395_v0 }
  0xda   :  { %1378 = vmatmul.mubr.bf16.gmra.mrb[104].mxu1 %v2387_v36 }
  0xdb   :  { %2244 = vmatmul.mubr.msk.bf16.gmra.mrb[92].mxu0 %vm285_vm1, %v2388_v37  ;;  %1385 = vmatprep.mubr.bf16.mxu1 %v1796_v38 }
  0xdc   :  { %2247 = vmatprep.mubr.msk.bf16.mxu0 %vm2396_vm0, %v2395_v0 }
  0xdd   :  { %v429_v39 = vpop.f32.mrb[0].mxu1 }
  0xde   :  { %v2141_v41 = vpop.f32.mrb[1].mxu1 }
  0xdf   :  { %v432_v43 = vpop.f32.mrb[2].mxu1 }
  0xe0   :  { %v2142_v44 = vpop.f32.mrb[3].mxu1 }
  0xe2   :  { %1386 = vmatmul.mubr.bf16.gmra.mrb[108].mxu1 %v1795_v40 }
  0xe3   :  { %2248 = vmatmul.mubr.msk.bf16.gmra.mrb[96].mxu0 %vm285_vm1, %v2391_v42  ;;  %2259 = vmatprep.mubr.msk.bf16.mxu1 %vm2396_vm0, %v2395_v0 }
  0xe4   :  { %2251 = vmatprep.mubr.msk.bf16.mxu0 %vm2396_vm0, %v2395_v0 }
  0xe5   :  { %v437_v45 = vpop.f32.mrb[4].mxu1 }
  0xe6   :  { %v2145_v47 = vpop.f32.mrb[5].mxu1 }
  0xe7   :  { %v440_v49 = vpop.f32.mrb[6].mxu1 }
  0xe8   :  { %v2146_v50 = vpop.f32.mrb[7].mxu1 }
  0xea   :  { %2260 = vmatmul.mubr.msk.bf16.vlgmr.msra.gmra.mrb[112].mxu1 %vm285_vm1, %v2392_v46 }
  0xeb   :  { %2252 = vmatmul.mubr.msk.bf16.gmra.mrb[100].mxu0 %vm285_vm1, %v2393_v48 }
  0xec   :  { %2255 = vmatprep.mubr.msk.bf16.mxu0 %vm2396_vm0, %v2395_v0 }
  0xed   :  { %v445_v51 = vpop.f32.mrb[8].mxu1 }
  0xee   :  { %v2149_v52 = vpop.f32.mrb[9].mxu1 }
  0xef   :  { %v448_v54 = vpop.f32.mrb[10].mxu1 }
  0xf0   :  { %v2150_v55 = vpop.f32.mrb[11].mxu1 }
  0xf3   :  { %2256 = vmatmul.mubr.msk.bf16.gmra.mrb[104].mxu0 %vm285_vm1, %v2394_v53 }
  0xf5   :  { %v453_v56 = vpop.f32.mrb[12].mxu1 }
  0xf6   :  { %v1883_v57 = vpop.f32.mrb[0].mxu0  ;;  %v2153_v58 = vpop.f32.mrb[13].mxu1 }
  0xf7   :  { %v1884_v59 = vpop.f32.mrb[1].mxu0  ;;  %v456_v60 = vpop.f32.mrb[14].mxu1 }
  0xf8   :  { %v1885_v61 = vadd.f32 %v1884_v59, %v1883_v57  ;;  %v1886_v62 = vpop.f32.mrb[2].mxu0  ;;  %v2154_v63 = vpop.f32.mrb[15].mxu1 }
  0xf9   :  { %v1887_v1 = vpop.f32.mrb[3].mxu0 }
  0xfa   :  { %v2915_v0 = vadd.f32 %v1885_v61, %v429_v39  ;;  %v1888_v7 = vadd.f32 %v1887_v1, %v1886_v62 }
  0xfc   :  { %v2917_v13 = vadd.f32 %v1888_v7, %v432_v43 }
  0xfd   :  { %v461_v3 = vpop.f32.mrb[16].mxu1 }
  0xfe   :  { %v1889_v4 = vpop.f32.mrb[4].mxu0  ;;  %v2157_v6 = vpop.f32.mrb[17].mxu1 }
  0xff   :  { %v1890_v8 = vpop.f32.mrb[5].mxu0  ;;  %v464_v9 = vpop.f32.mrb[18].mxu1 }
 0x100   :  { %v1891_v10 = vadd.f32 %v1890_v8, %v1889_v4  ;;  %v1892_v11 = vpop.f32.mrb[6].mxu0  ;;  %v2158_v12 = vpop.f32.mrb[19].mxu1 }
 0x101   :  { %v1893_v14 = vpop.f32.mrb[7].mxu0 }
 0x102   :  { %v2919_v15 = vadd.f32 %v1891_v10, %v437_v45  ;;  %v1894_v16 = vadd.f32 %v1893_v14, %v1892_v11 }
 0x104   :  { %v2921_v17 = vadd.f32 %v1894_v16, %v440_v49 }
 0x105   :  { %v469_v18 = vpop.f32.mrb[20].mxu1 }
 0x106   :  { %v1895_v19 = vpop.f32.mrb[8].mxu0  ;;  %v2161_v20 = vpop.f32.mrb[21].mxu1 }
 0x107   :  { %v1896_v21 = vpop.f32.mrb[9].mxu0  ;;  %v472_v22 = vpop.f32.mrb[22].mxu1 }
 0x108   :  { %v1897_v23 = vadd.f32 %v1896_v21, %v1895_v19  ;;  %v1898_v24 = vpop.f32.mrb[10].mxu0  ;;  %v2162_v25 = vpop.f32.mrb[23].mxu1 }
 0x109   :  { %v1899_v26 = vpop.f32.mrb[11].mxu0 }
 0x10a   :  { %v2923_v27 = vadd.f32 %v1897_v23, %v445_v51  ;;  %v1900_v2 = vadd.f32 %v1899_v26, %v1898_v24 }
 0x10c   :  { %v2925_v28 = vadd.f32 %v1900_v2, %v448_v54 }
 0x10d   :  { %v477_v29 = vpop.f32.mrb[24].mxu1 }
 0x10e   :  { %v1901_v5 = vpop.f32.mrb[12].mxu0  ;;  %v2165_v30 = vpop.f32.mrb[25].mxu1 }
 0x10f   :  { %v1902_v31 = vpop.f32.mrb[13].mxu0  ;;  %v480_v32 = vpop.f32.mrb[26].mxu1 }
 0x110   :  { %v1903_v33 = vadd.f32 %v1902_v31, %v1901_v5  ;;  %v1904_v34 = vpop.f32.mrb[14].mxu0  ;;  %v2166_v35 = vpop.f32.mrb[27].mxu1 }
 0x111   :  { %v1905_v36 = vpop.f32.mrb[15].mxu0 }
 0x112   :  { %v2927_v37 = vadd.f32 %v1903_v33, %v453_v56  ;;  %v1906_v38 = vadd.f32 %v1905_v36, %v1904_v34 }
 0x114   :  { %v2929_v39 = vadd.f32 %v1906_v38, %v456_v60 }
 0x115   :  { %v1950_v40 = vpop.f32.mrb[28].mxu1 }
 0x116   :  { %v1907_v41 = vpop.f32.mrb[16].mxu0  ;;  %v1951_v42 = vpop.f32.mrb[29].mxu1 }
 0x117   :  { %v1908_v43 = vpop.f32.mrb[17].mxu0  ;;  %v1952_v44 = vadd.f32 %v1951_v42, %v1950_v40  ;;  %v1953_v45 = vpop.f32.mrb[30].mxu1 }
 0x118   :  { %v1909_v46 = vadd.f32 %v1908_v43, %v1907_v41  ;;  %v1910_v47 = vpop.f32.mrb[18].mxu0  ;;  %v1954_v48 = vpop.f32.mrb[31].mxu1 }
 0x119   :  { %v1911_v49 = vpop.f32.mrb[19].mxu0  ;;  %v1955_v50 = vadd.f32 %v1954_v48, %v1953_v45 }
 0x11a   :  { %v2931_v51 = vadd.f32 %v1909_v46, %v461_v3  ;;  %v1912_v52 = vadd.f32 %v1911_v49, %v1910_v47 }
 0x11c   :  { %v2933_v53 = vadd.f32 %v1912_v52, %v464_v9 }
 0x11d   :  { %v1956_v54 = vpop.f32.mrb[32].mxu1 }
 0x11e   :  { %v1913_v55 = vpop.f32.mrb[20].mxu0  ;;  %v1957_v56 = vpop.f32.mrb[33].mxu1 }
 0x11f   :  { %v1914_v57 = vpop.f32.mrb[21].mxu0  ;;  %v1958_v58 = vadd.f32 %v1957_v56, %v1956_v54  ;;  %v1959_v59 = vpop.f32.mrb[34].mxu1 }
 0x120   :  { %v1915_v60 = vadd.f32 %v1914_v57, %v1913_v55  ;;  %v1916_v61 = vpop.f32.mrb[22].mxu0  ;;  %v1960_v62 = vpop.f32.mrb[35].mxu1 }
 0x121   :  { %v1917_v63 = vpop.f32.mrb[23].mxu0  ;;  %v1961_v1 = vadd.f32 %v1960_v62, %v1959_v59 }
 0x122   :  { %v2935_v7 = vadd.f32 %v1915_v60, %v469_v18  ;;  %v1918_v4 = vadd.f32 %v1917_v63, %v1916_v61 }
 0x124   :  { %v2937_v6 = vadd.f32 %v1918_v4, %v472_v22 }
 0x125   :  { %v1962_v3 = vpop.f32.mrb[36].mxu1 }
 0x126   :  { %v1919_v8 = vpop.f32.mrb[24].mxu0  ;;  %v1963_v9 = vpop.f32.mrb[37].mxu1 }
 0x127   :  { %v1920_v10 = vpop.f32.mrb[25].mxu0  ;;  %v1964_v11 = vadd.f32 %v1963_v9, %v1962_v3  ;;  %v1965_v12 = vpop.f32.mrb[38].mxu1 }
 0x128   :  { %v1921_v14 = vadd.f32 %v1920_v10, %v1919_v8  ;;  %v1922_v16 = vpop.f32.mrb[26].mxu0  ;;  %v1966_v19 = vpop.f32.mrb[39].mxu1 }
 0x129   :  { %v1923_v20 = vpop.f32.mrb[27].mxu0  ;;  %v1967_v21 = vadd.f32 %v1966_v19, %v1965_v12 }
 0x12a   :  { %v2939_v23 = vadd.f32 %v1921_v14, %v477_v29 }
 0x12d   :  { %v1968_v24 = vpop.f32.mrb[40].mxu1 }
 0x12e   :  { %v753_v25 = vpop.f32.mrb[28].mxu0  ;;  %v1969_v18 = vpop.f32.mrb[41].mxu1 }
 0x12f   :  { %v2941_v26 = vadd.f32 %v1952_v44, %v753_v25  ;;  %v2173_v22 = vpop.f32.mrb[29].mxu0  ;;  %v1970_v2 = vadd.f32 %v1969_v18, %v1968_v24  ;;  %v1971_v5 = vpop.f32.mrb[42].mxu1 }
 0x130   :  { %v756_v30 = vpop.f32.mrb[30].mxu0  ;;  %v1972_v31 = vpop.f32.mrb[43].mxu1 }
 0x131   :  { %v807_v32 = vmax.f32 %v2915_v0, %v2941_v26  ;;  %v2945_v33 = vadd.f32 %v1955_v50, %v756_v30  ;;  %v2174_v34 = vpop.f32.mrb[31].mxu0  ;;  %v1973_v35 = vadd.f32 %v1972_v31, %v1971_v5 }
 0x133   :  { %v808_v29 = vmax.f32 %v2917_v13, %v2945_v33 }
 0x135   :  { %v1974_v36 = vpop.f32.mrb[44].mxu1 }
 0x136   :  { %v761_v38 = vpop.f32.mrb[32].mxu0  ;;  %v1975_v40 = vpop.f32.mrb[45].mxu1 }
 0x137   :  { %v2949_v41 = vadd.f32 %v1958_v58, %v761_v38  ;;  %v2177_v42 = vpop.f32.mrb[33].mxu0  ;;  %v1976_v43 = vadd.f32 %v1975_v40, %v1974_v36  ;;  %v1977_v44 = vpop.f32.mrb[46].mxu1 }
 0x138   :  { %v764_v45 = vpop.f32.mrb[34].mxu0  ;;  %v1978_v46 = vpop.f32.mrb[47].mxu1 }
 0x139   :  { %v809_v47 = vmax.f32 %v2919_v15, %v2949_v41  ;;  %v2953_v48 = vadd.f32 %v1961_v1, %v764_v45  ;;  %v2178_v49 = vpop.f32.mrb[35].mxu0  ;;  %v1979_v50 = vadd.f32 %v1978_v46, %v1977_v44 }
 0x13b   :  { %v810_v52 = vmax.f32 %v2921_v17, %v2953_v48 }
 0x13d   :  { %v1980_v54 = vpop.f32.mrb[48].mxu1 }
 0x13e   :  { %v769_v55 = vpop.f32.mrb[36].mxu0  ;;  %v1981_v56 = vpop.f32.mrb[49].mxu1 }
 0x13f   :  { %v2957_v57 = vadd.f32 %v1964_v11, %v769_v55  ;;  %v2181_v58 = vpop.f32.mrb[37].mxu0  ;;  %v1982_v59 = vadd.f32 %v1981_v56, %v1980_v54  ;;  %v1983_v60 = vpop.f32.mrb[50].mxu1 }
 0x140   :  { %v772_v61 = vpop.f32.mrb[38].mxu0  ;;  %v1984_v62 = vpop.f32.mrb[51].mxu1 }
 0x141   :  { %v811_v63 = vmax.f32 %v2923_v27, %v2957_v57  ;;  %v2961_v1 = vadd.f32 %v1967_v21, %v772_v61  ;;  %v2182_v4 = vpop.f32.mrb[39].mxu0  ;;  %v1985_v3 = vadd.f32 %v1984_v62, %v1983_v60 }
 0x143   :  { %v812_v8 = vmax.f32 %v2925_v28, %v2961_v1 }
 0x145   :  { %v1986_v9 = vpop.f32.mrb[52].mxu1 }
 0x146   :  { %v777_v10 = vpop.f32.mrb[40].mxu0  ;;  %v1987_v12 = vpop.f32.mrb[53].mxu1 }
 0x147   :  { %v2965_v11 = vadd.f32 %v1970_v2, %v777_v10  ;;  %v2185_v14 = vpop.f32.mrb[41].mxu0  ;;  %v1988_v16 = vadd.f32 %v1987_v12, %v1986_v9  ;;  %v1989_v19 = vpop.f32.mrb[54].mxu1 }
 0x148   :  { %v780_v20 = vpop.f32.mrb[42].mxu0  ;;  %v1990_v24 = vpop.f32.mrb[55].mxu1 }
 0x149   :  { %v813_v25 = vmax.f32 %v2927_v37, %v2965_v11  ;;  %v2969_v21 = vadd.f32 %v1973_v35, %v780_v20  ;;  %v2186_v18 = vpop.f32.mrb[43].mxu0 }
 0x14b   :  { %v814_v22 = vmax.f32 %v2929_v39, %v2969_v21 }
 0x14d   :  { %v2017_v5 = vpop.f32.mrb[56].mxu1 }
 0x14e   :  { %v785_v30 = vpop.f32.mrb[44].mxu0  ;;  %v2018_v31 = vpop.f32.mrb[57].mxu1 }
 0x14f   :  { %v2973_v34 = vadd.f32 %v1976_v43, %v785_v30  ;;  %v2189_v2 = vpop.f32.mrb[45].mxu0  ;;  %v2019_v36 = vadd.f32 %v2018_v31, %v2017_v5  ;;  %v2020_v38 = vpop.f32.mrb[58].mxu1 }
 0x150   :  { %v788_v40 = vpop.f32.mrb[46].mxu0  ;;  %v2021_v42 = vpop.f32.mrb[59].mxu1 }
 0x151   :  { %v815_v44 = vmax.f32 %v2931_v51, %v2973_v34  ;;  %v2977_v45 = vadd.f32 %v1979_v50, %v788_v40  ;;  %v2190_v35 = vpop.f32.mrb[47].mxu0  ;;  %v2022_v46 = vadd.f32 %v2021_v42, %v2020_v38 }
 0x153   :  { %v816_v49 = vmax.f32 %v2933_v53, %v2977_v45 }
 0x155   :  { %v2023_v54 = vpop.f32.mrb[60].mxu1 }
 0x156   :  { %v793_v55 = vpop.f32.mrb[48].mxu0  ;;  %v2024_v56 = vpop.f32.mrb[61].mxu1 }
 0x157   :  { %v2981_v43 = vadd.f32 %v1982_v59, %v793_v55  ;;  %v2193_v58 = vpop.f32.mrb[49].mxu0  ;;  %v2025_v60 = vadd.f32 %v2024_v56, %v2023_v54  ;;  %v2026_v61 = vpop.f32.mrb[62].mxu1 }
 0x158   :  { %v796_v62 = vpop.f32.mrb[50].mxu0  ;;  %v2027_v4 = vpop.f32.mrb[63].mxu1 }
 0x159   :  { %v817_v9 = vmax.f32 %v2935_v7, %v2981_v43  ;;  %v2985_v50 = vadd.f32 %v1985_v3, %v796_v62  ;;  %v2194_v10 = vpop.f32.mrb[51].mxu0  ;;  %v2028_v12 = vadd.f32 %v2027_v4, %v2026_v61 }
 0x15b   :  { %v818_v14 = vmax.f32 %v2937_v6, %v2985_v50 }
 0x15d   :  { %v2029_v19 = vpop.f32.mrb[64].mxu1 }
 0x15e   :  { %v801_v20 = vpop.f32.mrb[52].mxu0  ;;  %v2030_v24 = vpop.f32.mrb[65].mxu1 }
 0x15f   :  { %v2989_v59 = vadd.f32 %v1988_v16, %v801_v20  ;;  %v2197_v18 = vpop.f32.mrb[53].mxu0  ;;  %v2031_v5 = vadd.f32 %v2030_v24, %v2029_v19  ;;  %v2032_v30 = vpop.f32.mrb[66].mxu1 }
 0x160   :  { %v804_v31 = vpop.f32.mrb[54].mxu0  ;;  %v2033_v2 = vpop.f32.mrb[67].mxu1 }
 0x161   :  { %v819_v38 = vmax.f32 %v2939_v23, %v2989_v59  ;;  %v2198_v3 = vpop.f32.mrb[55].mxu0  ;;  %v2034_v40 = vadd.f32 %v2033_v2, %v2032_v30 }
 0x165   :  { %v2035_v42 = vpop.f32.mrb[68].mxu1 }
 0x166   :  { %v1090_v35 = vpop.f32.mrb[56].mxu0  ;;  %v2036_v54 = vpop.f32.mrb[69].mxu1 }
 0x167   :  { %v1091_v55 = vadd.f32 %v2019_v36, %v1090_v35  ;;  %v2205_v56 = vpop.f32.mrb[57].mxu0  ;;  %v2037_v58 = vadd.f32 %v2036_v54, %v2035_v42  ;;  %v2038_v61 = vpop.f32.mrb[70].mxu1 }
 0x168   :  { %v1093_v62 = vpop.f32.mrb[58].mxu0  ;;  %v2039_v16 = vpop.f32.mrb[71].mxu1 }
 0x169   :  { %v2996_v4 = vmax.f32 %v807_v32, %v1091_v55  ;;  %v1094_v10 = vadd.f32 %v2022_v46, %v1093_v62  ;;  %v2206_v19 = vpop.f32.mrb[59].mxu0  ;;  %v2040_v20 = vadd.f32 %v2039_v16, %v2038_v61 }
 0x16b   :  { %v3001_v24 = vmax.f32 %v808_v29, %v1094_v10 }
 0x16d   :  { %v2041_v18 = vpop.f32.mrb[72].mxu1 }
 0x16e   :  { %v1098_v36 = vpop.f32.mrb[60].mxu0  ;;  %v2042_v30 = vpop.f32.mrb[73].mxu1 }
 0x16f   :  { %v1099_v31 = vadd.f32 %v2025_v60, %v1098_v36  ;;  %v2209_v2 = vpop.f32.mrb[61].mxu0  ;;  %v2043_v3 = vadd.f32 %v2042_v30, %v2041_v18  ;;  %v2044_v42 = vpop.f32.mrb[74].mxu1 }
 0x170   :  { %v1101_v35 = vpop.f32.mrb[62].mxu0  ;;  %v2045_v54 = vpop.f32.mrb[75].mxu1 }
 0x171   :  { %v3006_v0 = vmax.f32 %v809_v47, %v1099_v31  ;;  %v1102_v26 = vadd.f32 %v2028_v12, %v1101_v35  ;;  %v2210_v32 = vpop.f32.mrb[63].mxu0  ;;  %v2046_v46 = vadd.f32 %v2045_v54, %v2044_v42 }
 0x173   :  { %v3011_v13 = vmax.f32 %v810_v52, %v1102_v26 }
 0x175   :  { %v2047_v33 = vpop.f32.mrb[76].mxu1 }
 0x176   :  { %v1106_v29 = vpop.f32.mrb[64].mxu0  ;;  %v2048_v60 = vpop.f32.mrb[77].mxu1 }
 0x177   :  { %v1107_v55 = vadd.f32 %v2031_v5, %v1106_v29  ;;  %v2213_v56 = vpop.f32.mrb[65].mxu0  ;;  %v2049_v61 = vadd.f32 %v2048_v60, %v2047_v33  ;;  %v2050_v62 = vpop.f32.mrb[78].mxu1 }
 0x178   :  { %v1109_v16 = vpop.f32.mrb[66].mxu0  ;;  %v2051_v10 = vpop.f32.mrb[79].mxu1 }
 0x179   :  { %v3016_v15 = vmax.f32 %v811_v63, %v1107_v55  ;;  %v1110_v41 = vadd.f32 %v2034_v40, %v1109_v16  ;;  %v2214_v47 = vpop.f32.mrb[67].mxu0  ;;  %v2052_v12 = vadd.f32 %v2051_v10, %v2050_v62 }
 0x17b   :  { %v3021_v17 = vmax.f32 %v812_v8, %v1110_v41 }
 0x17d   :  { %v2053_v48 = vpop.f32.mrb[80].mxu1 }
 0x17e   :  { %v1114_v52 = vpop.f32.mrb[68].mxu0  ;;  %v2054_v5 = vpop.f32.mrb[81].mxu1 }
 0x17f   :  { %v1115_v19 = vadd.f32 %v2037_v58, %v1114_v52  ;;  %v2217_v18 = vpop.f32.mrb[69].mxu0  ;;  %v2055_v36 = vadd.f32 %v2054_v5, %v2053_v48  ;;  %v2056_v30 = vpop.f32.mrb[82].mxu1 }
 0x180   :  { %v1117_v31 = vpop.f32.mrb[70].mxu0  ;;  %v2057_v2 = vpop.f32.mrb[83].mxu1 }
 0x181   :  { %v3026_v27 = vmax.f32 %v813_v25, %v1115_v19  ;;  %v1118_v57 = vadd.f32 %v2040_v20, %v1117_v31  ;;  %v2218_v63 = vpop.f32.mrb[71].mxu0 }
 0x183   :  { %v3031_v28 = vmax.f32 %v814_v22, %v1118_v57 }
 0x185   :  { %v2084_v1 = vpop.f32.mrb[84].mxu1 }
 0x186   :  { %v1122_v8 = vpop.f32.mrb[72].mxu0  ;;  %v2085_v40 = vpop.f32.mrb[85].mxu1 }
 0x187   :  { %v1123_v58 = vadd.f32 %v2043_v3, %v1122_v8  ;;  %v2221_v42 = vpop.f32.mrb[73].mxu0  ;;  %v2086_v35 = vadd.f32 %v2085_v40, %v2084_v1  ;;  %v2087_v54 = vpop.f32.mrb[86].mxu1 }
 0x188   :  { %v1125_v26 = vpop.f32.mrb[74].mxu0  ;;  %v2088_v32 = vpop.f32.mrb[87].mxu1 }
 0x189   :  { %v3036_v37 = vmax.f32 %v815_v44, %v1123_v58  ;;  %v1126_v11 = vadd.f32 %v2046_v46, %v1125_v26  ;;  %v2222_v25 = vpop.f32.mrb[75].mxu0  ;;  %v2089_v20 = vadd.f32 %v2088_v32, %v2087_v54 }
 0x18b   :  { %v3041_v39 = vmax.f32 %v816_v49, %v1126_v11 }
 0x18d   :  { %v2090_v21 = vpop.f32.mrb[88].mxu1 }
 0x18e   :  { %v1130_v22 = vpop.f32.mrb[76].mxu0  ;;  %v2091_v3 = vpop.f32.mrb[89].mxu1 }
 0x18f   :  { %v1131_v33 = vadd.f32 %v2049_v61, %v1130_v22  ;;  %v2225_v29 = vpop.f32.mrb[77].mxu0  ;;  %v2092_v60 = vadd.f32 %v2091_v3, %v2090_v21  ;;  %v2093_v55 = vpop.f32.mrb[90].mxu1 }
 0x190   :  { %v1133_v56 = vpop.f32.mrb[78].mxu0  ;;  %v2094_v62 = vpop.f32.mrb[91].mxu1 }
 0x191   :  { %v3046_v51 = vmax.f32 %v817_v9, %v1131_v33  ;;  %v1134_v34 = vadd.f32 %v2052_v12, %v1133_v56  ;;  %v2226_v44 = vpop.f32.mrb[79].mxu0  ;;  %v2095_v46 = vadd.f32 %v2094_v62, %v2093_v55 }
 0x193   :  { %v3051_v53 = vmax.f32 %v818_v14, %v1134_v34 }
 0x195   :  { %v2096_v45 = vpop.f32.mrb[92].mxu1 }
 0x196   :  { %v1138_v49 = vpop.f32.mrb[80].mxu0  ;;  %v2097_v61 = vpop.f32.mrb[93].mxu1 }
 0x197   :  { %v1139_v16 = vadd.f32 %v2055_v36, %v1138_v49  ;;  %v2229_v10 = vpop.f32.mrb[81].mxu0  ;;  %v2098_v41 = vadd.f32 %v2097_v61, %v2096_v45  ;;  %v2099_v47 = vpop.f32.mrb[94].mxu1  ;;  %v3061_v36 = vld [vmem:[%s3112_s2] ss:$0 sm:$0xff] }
 0x198   :  { %v1141_v48 = vpop.f32.mrb[82].mxu0  ;;  %v2100_v52 = vpop.f32.mrb[95].mxu1 }
 0x199   :  { %v3056_v7 = vmax.f32 %v819_v38, %v1139_v16  ;;  %v2230_v43 = vpop.f32.mrb[83].mxu0  ;;  %v2101_v9 = vadd.f32 %v2100_v52, %v2099_v47 }
 0x19d   :  { %v2102_v12 = vpop.f32.mrb[96].mxu1 }
 0x19e   :  { %v1427_v6 = vpop.f32.mrb[84].mxu0  ;;  %v2103_v50 = vpop.f32.mrb[97].mxu1 }
 0x19f   :  { %v1428_v14 = vadd.f32 %v2086_v35, %v1427_v6  ;;  %v2237_v5 = vpop.f32.mrb[85].mxu0  ;;  %v2104_v19 = vadd.f32 %v2103_v50, %v2102_v12  ;;  %v2105_v18 = vpop.f32.mrb[98].mxu1 }
 0x1a0   :  { %v1430_v30 = vpop.f32.mrb[86].mxu0  ;;  %v2106_v31 = vpop.f32.mrb[99].mxu1 }
 0x1a1   :  { %v1481_v23 = vmax.f32 %v2996_v4, %v1428_v14  ;;  %v1431_v59 = vadd.f32 %v2089_v20, %v1430_v30  ;;  %v2238_v38 = vpop.f32.mrb[87].mxu0  ;;  %v2107_v2 = vadd.f32 %v2106_v31, %v2105_v18 }
 0x1a3   :  { %v1501_v57 = vadd.f32 %v3061_v36, %v1481_v23  ;;  %v1482_v63 = vmax.f32 %v3001_v24, %v1431_v59 }
 0x1a5   :  { %v1502_v1 = vadd.f32 %v3061_v36, %v1482_v63  ;;  %v2108_v8 = vpop.f32.mrb[100].mxu1  ;;  %v1514_v42 = vmax.f32 %v1501_v57, 0.0 }
 0x1a6   :  { %v1435_v40 = vpop.f32.mrb[88].mxu0  ;;  %v2109_v58 = vpop.f32.mrb[101].mxu1 }
 0x1a7   :  { %v1515_v35 = vmax.f32 %v1502_v1, 0.0  ;;  %v1436_v54 = vadd.f32 %v2092_v60, %v1435_v40  ;;  %v2241_v26 = vpop.f32.mrb[89].mxu0  ;;  %v2110_v32 = vadd.f32 %v2109_v58, %v2108_v8  ;;  %v2111_v11 = vpop.f32.mrb[102].mxu1 }
 0x1a8   :  { %v1438_v25 = vpop.f32.mrb[90].mxu0  ;;  %v2112_v4 = vpop.f32.mrb[103].mxu1 }
 0x1a9   :  { %v1835_v20 = vpack.c.bf16 %v1515_v35, %v1514_v42  ;;  %v1483_v21 = vmax.f32 %v3006_v0, %v1436_v54  ;;  %v1439_v22 = vadd.f32 %v2095_v46, %v1438_v25  ;;  %v2242_v3 = vpop.f32.mrb[91].mxu0  ;;  %v2113_v33 = vadd.f32 %v2112_v4, %v2111_v11 }
 0x1ab   :  { %1836 = vst [vmem:[%s3113_s3] sm:$0xff] %v1835_v20   ;;  %v1503_v24 = vadd.f32 %v3061_v36, %v1483_v21  ;;  %v1484_v29 = vmax.f32 %v3011_v13, %v1439_v22 }
 0x1ad   :  { %v1504_v60 = vadd.f32 %v3061_v36, %v1484_v29  ;;  %v2114_v55 = vpop.f32.mrb[104].mxu1  ;;  %v1516_v34 = vmax.f32 %v1503_v24, 0.0 }
 0x1ae   :  { %v1443_v56 = vpop.f32.mrb[92].mxu0  ;;  %v2115_v62 = vpop.f32.mrb[105].mxu1 }
 0x1af   :  { %v1517_v44 = vmax.f32 %v1504_v60, 0.0  ;;  %v1444_v45 = vadd.f32 %v2098_v41, %v1443_v56  ;;  %v2245_v0 = vpop.f32.mrb[93].mxu0  ;;  %v2116_v46 = vadd.f32 %v2115_v62, %v2114_v55  ;;  %v2117_v49 = vpop.f32.mrb[106].mxu1 }
 0x1b0   :  { %v1446_v61 = vpop.f32.mrb[94].mxu0  ;;  %v2118_v16 = vpop.f32.mrb[107].mxu1 }
 0x1b1   :  { %v1840_v10 = vpack.c.bf16 %v1517_v44, %v1516_v34  ;;  %v1485_v47 = vmax.f32 %v3016_v15, %v1444_v45  ;;  %v1447_v48 = vadd.f32 %v2101_v9, %v1446_v61  ;;  %v2246_v52 = vpop.f32.mrb[95].mxu0  ;;  %v2119_v43 = vadd.f32 %v2118_v16, %v2117_v49 }
 0x1b3   :  { %1862 = vst [vmem:[%s3113_s3 + $0x8] sm:$0xff] %v1840_v10   ;;  %v1505_v13 = vadd.f32 %v3061_v36, %v1485_v47  ;;  %v1486_v12 = vmax.f32 %v3021_v17, %v1447_v48 }
 0x1b5   :  { %v1506_v41 = vadd.f32 %v3061_v36, %v1486_v12  ;;  %v2120_v6 = vpop.f32.mrb[108].mxu1  ;;  %v1518_v5 = vmax.f32 %v1505_v13, 0.0 }
 0x1b6   :  { %v1451_v50 = vpop.f32.mrb[96].mxu0  ;;  %v2121_v14 = vpop.f32.mrb[109].mxu1 }
 0x1b7   :  { %v1519_v18 = vmax.f32 %v1506_v41, 0.0  ;;  %v1452_v30 = vadd.f32 %v2104_v19, %v1451_v50  ;;  %v2249_v15 = vpop.f32.mrb[97].mxu0  ;;  %v2122_v9 = vadd.f32 %v2121_v14, %v2120_v6  ;;  %v2123_v31 = vpop.f32.mrb[110].mxu1 }
 0x1b8   :  { %v1454_v23 = vpop.f32.mrb[98].mxu0  ;;  %v2124_v59 = vpop.f32.mrb[111].mxu1 }
 0x1b9   :  { %v1845_v38 = vpack.c.bf16 %v1519_v18, %v1518_v5  ;;  %v1487_v57 = vmax.f32 %v3026_v27, %v1452_v30  ;;  %v1455_v63 = vadd.f32 %v2107_v2, %v1454_v23  ;;  %v2250_v1 = vpop.f32.mrb[99].mxu0 }
 0x1bb   :  { %1863 = vst [vmem:[%s3113_s3 + $0x10] sm:$0xff] %v1845_v38   ;;  %v1507_v17 = vadd.f32 %v3061_v36, %v1487_v57  ;;  %v1488_v8 = vmax.f32 %v3031_v28, %v1455_v63 }
 0x1bd   :  { %v1508_v19 = vadd.f32 %v3061_v36, %v1488_v8  ;;  %v1475_v40 = vpop.f32.mrb[112].mxu1  ;;  %v1520_v54 = vmax.f32 %v1507_v17, 0.0 }
 0x1be   :  { %v1476_v58 = vadd.f32 %v2122_v9, %v1475_v40  ;;  %v1459_v42 = vpop.f32.mrb[100].mxu0  ;;  %v2261_v35 = vpop.f32.mrb[113].mxu1 }
 0x1bf   :  { %v1521_v26 = vmax.f32 %v1508_v19, 0.0  ;;  %v1460_v11 = vadd.f32 %v2110_v32, %v1459_v42  ;;  %v2253_v27 = vpop.f32.mrb[101].mxu0  ;;  %v1478_v2 = vpop.f32.mrb[114].mxu1 }
 0x1c0   :  { %v1493_v25 = vmax.f32 %v3056_v7, %v1476_v58  ;;  %v1462_v4 = vpop.f32.mrb[102].mxu0  ;;  %v2262_v20 = vpop.f32.mrb[115].mxu1 }
 0x1c1   :  { %v1850_v21 = vpack.c.bf16 %v1521_v26, %v1520_v54  ;;  %v1489_v22 = vmax.f32 %v3036_v37, %v1460_v11  ;;  %v1463_v3 = vadd.f32 %v2113_v33, %v1462_v4  ;;  %v2254_v28 = vpop.f32.mrb[103].mxu0 }
 0x1c2   :  { %v1513_v24 = vadd.f32 %v3061_v36, %v1493_v25 }
 0x1c3   :  { %1864 = vst [vmem:[%s3113_s3 + $0x18] sm:$0xff] %v1850_v21   ;;  %v1509_v29 = vadd.f32 %v3061_v36, %v1489_v22  ;;  %v1490_v32 = vmax.f32 %v3041_v39, %v1463_v3 }
 0x1c4   :  { %v1526_v60 = vmax.f32 %v1513_v24, 0.0 }
 0x1c5   :  { %v1510_v7 = vadd.f32 %v3061_v36, %v1490_v32  ;;  %v1522_v62 = vmax.f32 %v1509_v29, 0.0 }
 0x1c6   :  { %v1831_v55 = vpack.c.bf16 %v1526_v60, %v1526_v60  ;;  %v1467_v56 = vpop.f32.mrb[104].mxu0 }
 0x1c7   :  { %v1523_v34 = vmax.f32 %v1510_v7, 0.0  ;;  %v1468_v37 = vadd.f32 %v2116_v46, %v1467_v56  ;;  %v2257_v33 = vpop.f32.mrb[105].mxu0 }
 0x1c8   :  { %1592 = vst [vmem:[%s3113_s3 + $0x30] sm:$0xf] %v1831_v55  ;;  %v1470_v44 = vpop.f32.mrb[106].mxu0 }
 0x1c9   :  { %v1855_v45 = vpack.c.bf16 %v1523_v34, %v1522_v62  ;;  %v1491_v0 = vmax.f32 %v3046_v51, %v1468_v37  ;;  %v1471_v49 = vadd.f32 %v2119_v43, %v1470_v44  ;;  %v2258_v61 = vpop.f32.mrb[107].mxu0 }
 0x1cb   :  { %1865 = vst [vmem:[%s3113_s3 + $0x20] sm:$0xff] %v1855_v45   ;;  %v1511_v39 = vadd.f32 %v3061_v36, %v1491_v0  ;;  %v1492_v16 = vmax.f32 %v3051_v53, %v1471_v49 }
 0x1cd   :  { %v1512_v46 = vadd.f32 %v3061_v36, %v1492_v16  ;;  %v1524_v10 = vmax.f32 %v1511_v39, 0.0 }
 0x1cf   :  { %v1525_v47 = vmax.f32 %v1512_v46, 0.0 }
 0x1d1   :  { %v1860_v48 = vpack.c.bf16 %v1525_v47, %v1524_v10 }
 0x1d3   :  { %1866 = vst [vmem:[%s3113_s3 + $0x28] sm:$0xff] %v1860_v48  }

// kernel: simple_cnn_forward.5
= control target key start
LH: loop header
LB: loop body
LE: loop exit
PB: predicated region body
PF: predicated region fallthrough
CT: control target
= control target key end

     0   :  { %vm5968_vm0 = vmmov 0   ;;  %s7313_s1 = inlined_call_operand.vmem [shape: bf16[6272,128], index: 1, kind: input, shape index: {}]   ;;  %s7314_s0 = inlined_call_operand.vmem [shape: bf16[8,6272], index: 0, kind: input, shape index: {}]   ;;  %s7315_s2 = inlined_call_operand.vmem [shape: f32[1,128], index: 2, kind: input, shape index: {}]   ;;  %s7316_s3 = inlined_call_operand.vmem [shape: bf16[128,128], index: 3, kind: input, shape index: {}]   ;;  %s7317_s4 = inlined_call_operand.vmem [shape: f32[1,128], index: 4, kind: input, shape index: {}]   ;;  %s7318_s5 = inlined_call_operand.vmem [shape: f32[8,128], index: 5, kind: output, shape index: {}]  }
   0x1   :  { %v5518_v0 = vld [vmem:[%s7313_s1 + $0x40] sm:$0xff]   ;;  %v5522_v4 = vld [vmem:[%s7313_s1 + $0x48] sm:$0xff]   ;;  %v5526_v8 = vld [vmem:[%s7313_s1 + $0x50] sm:$0xff]  }
   0x2   :  { %v5519_v1 = vld [vmem:[%s7313_s1] sm:$0xff]   ;;  %4930 = vmatprep.subr.bf16.mxu0 %v5518_v0  ;;  %v5523_v5 = vld [vmem:[%s7313_s1 + $0x8] sm:$0xff]   ;;  %v5527_v9 = vld [vmem:[%s7313_s1 + $0x10] sm:$0xff]  }
   0x3   :  { %v5520_v2 = vld [vmem:[%s7313_s1 + $0xc0] sm:$0xff]   ;;  %4931 = vmatpush3.bf16.msra.mxu0 %v5519_v1  ;;  %v5524_v6 = vld [vmem:[%s7313_s1 + $0xc8] sm:$0xff]   ;;  %v5528_v10 = vld [vmem:[%s7313_s1 + $0xd0] sm:$0xff]  }
   0x4   :  { %v5521_v3 = vld [vmem:[%s7313_s1 + $0x80] sm:$0xff]   ;;  %4952 = vmatprep.subr.bf16.mxu1 %v5520_v2  ;;  %4932 = vmatprep.subr.bf16.mxu0 %v5522_v4  ;;  %v5525_v7 = vld [vmem:[%s7313_s1 + $0x88] sm:$0xff]   ;;  %v5529_v11 = vld [vmem:[%s7313_s1 + $0x90] sm:$0xff]  }
   0x5   :  { %4953 = vmatpush3.bf16.msra.mxu1 %v5521_v3  ;;  %v5530_v12 = vld [vmem:[%s7313_s1 + $0x58] sm:$0xff]   ;;  %v5534_v16 = vld [vmem:[%s7313_s1 + $0x60] sm:$0xff]   ;;  %v5538_v20 = vld [vmem:[%s7313_s1 + $0x68] sm:$0xff]  }
   0x6   :  { %4954 = vmatprep.subr.bf16.mxu1 %v5524_v6  ;;  %v5531_v13 = vld [vmem:[%s7313_s1 + $0x18] sm:$0xff]   ;;  %v5535_v17 = vld [vmem:[%s7313_s1 + $0x20] sm:$0xff]   ;;  %v5539_v21 = vld [vmem:[%s7313_s1 + $0x28] sm:$0xff]  }
   0x7   :  { %4933 = vmatpush3.bf16.msra.mxu0 %v5523_v5  ;;  %v5532_v14 = vld [vmem:[%s7313_s1 + $0xd8] sm:$0xff]   ;;  %v5536_v18 = vld [vmem:[%s7313_s1 + $0xe0] sm:$0xff]   ;;  %v5540_v22 = vld [vmem:[%s7313_s1 + $0xe8] sm:$0xff]  }
   0x8   :  { %4934 = vmatprep.subr.bf16.mxu0 %v5526_v8  ;;  %v5533_v15 = vld [vmem:[%s7313_s1 + $0x98] sm:$0xff]   ;;  %v5537_v19 = vld [vmem:[%s7313_s1 + $0xa0] sm:$0xff]   ;;  %v5541_v23 = vld [vmem:[%s7313_s1 + $0xa8] sm:$0xff]  }
   0x9   :  { %4955 = vmatpush3.bf16.msra.mxu1 %v5525_v7  ;;  %v5542_v24 = vld [vmem:[%s7313_s1 + $0x70] sm:$0xff]   ;;  %v5546_v28 = vld [vmem:[%s7313_s1 + $0x78] sm:$0xff]   ;;  %v21_v31 = vld [vmem:[%s7314_s0] sm:$0xff] }
   0xa   :  { %4956 = vmatprep.subr.bf16.mxu1 %v5528_v10  ;;  %v5543_v25 = vld [vmem:[%s7313_s1 + $0x30] sm:$0xff]   ;;  %v5547_v29 = vld [vmem:[%s7313_s1 + $0x38] sm:$0xff]   ;;  %v4480_v32 = vcombine.low %v21_v31, %v21_v31  ;;  %v4481_v33 = vcombine.high %v21_v31, %v21_v31  ;;  %v5552_v35 = vld [vmem:[%s7313_s1 + $0x140] sm:$0xff]  }
   0xb   :  { %4935 = vmatpush3.bf16.msra.mxu0 %v5527_v9  ;;  %v5544_v26 = vld [vmem:[%s7313_s1 + $0xf0] sm:$0xff]   ;;  %v5548_v30 = vld [vmem:[%s7313_s1 + $0xf8] sm:$0xff]   ;;  %v22_v36 = vld [vmem:[%s7314_s0 + $0x8] sm:$0xff] }
   0xc   :  { %4936 = vmatprep.subr.bf16.mxu0 %v5530_v12  ;;  %v5545_v27 = vld [vmem:[%s7313_s1 + $0xb0] sm:$0xff]   ;;  %v5551_v34 = vld [vmem:[%s7313_s1 + $0xb8] sm:$0xff]   ;;  %3393 = vmatprep.mubr.bf16.mxu0 %v4481_v33  ;;  %v4482_v37 = vcombine.low %v22_v36, %v22_v36  ;;  %v4483_v38 = vcombine.high %v22_v36, %v22_v36  ;;  %v5555_v39 = vld [vmem:[%s7313_s1 + $0x100] sm:$0xff]  }
   0xd   :  { %4957 = vmatpush3.bf16.msra.mxu1 %v5529_v11  ;;  %v5556_v40 = vld [vmem:[%s7313_s1 + $0x1c0] sm:$0xff]   ;;  %v5558_v42 = vld [vmem:[%s7313_s1 + $0x148] sm:$0xff]   ;;  %v5562_v46 = vld [vmem:[%s7313_s1 + $0x150] sm:$0xff]  }
   0xe   :  { %4958 = vmatprep.subr.bf16.mxu1 %v5532_v14  ;;  %3433 = vmatprep.mubr.bf16.mxu1 %v4483_v38  ;;  %v5557_v41 = vld [vmem:[%s7313_s1 + $0x180] sm:$0xff]   ;;  %v5559_v43 = vld [vmem:[%s7313_s1 + $0x108] sm:$0xff]   ;;  %v5563_v47 = vld [vmem:[%s7313_s1 + $0x110] sm:$0xff]  }
   0xf   :  { %4937 = vmatpush3.bf16.msra.mxu0 %v5531_v13  ;;  %v5560_v44 = vld [vmem:[%s7313_s1 + $0x1c8] sm:$0xff]   ;;  %v5564_v48 = vld [vmem:[%s7313_s1 + $0x1d0] sm:$0xff]   ;;  %v5566_v50 = vld [vmem:[%s7313_s1 + $0x158] sm:$0xff]  }
  0x10   :  { %4938 = vmatprep.subr.bf16.mxu0 %v5534_v16  ;;  %v5561_v45 = vld [vmem:[%s7313_s1 + $0x188] sm:$0xff]   ;;  %v5565_v49 = vld [vmem:[%s7313_s1 + $0x190] sm:$0xff]   ;;  %v5567_v51 = vld [vmem:[%s7313_s1 + $0x118] sm:$0xff]  }
  0x11   :  { %4959 = vmatpush3.bf16.msra.mxu1 %v5533_v15  ;;  %v5568_v52 = vld [vmem:[%s7313_s1 + $0x1d8] sm:$0xff]   ;;  %v5570_v54 = vld [vmem:[%s7313_s1 + $0x160] sm:$0xff]   ;;  %v5574_v58 = vld [vmem:[%s7313_s1 + $0x168] sm:$0xff]  }
  0x12   :  { %4960 = vmatprep.subr.bf16.mxu1 %v5536_v18  ;;  %v5569_v53 = vld [vmem:[%s7313_s1 + $0x198] sm:$0xff]   ;;  %v5571_v55 = vld [vmem:[%s7313_s1 + $0x120] sm:$0xff]   ;;  %v5575_v59 = vld [vmem:[%s7313_s1 + $0x128] sm:$0xff]  }
  0x13   :  { %4939 = vmatpush3.bf16.msra.mxu0 %v5535_v17  ;;  %v5572_v56 = vld [vmem:[%s7313_s1 + $0x1e0] sm:$0xff]   ;;  %v5576_v60 = vld [vmem:[%s7313_s1 + $0x1e8] sm:$0xff]   ;;  %v5578_v62 = vld [vmem:[%s7313_s1 + $0x170] sm:$0xff]  }
  0x14   :  { %4940 = vmatprep.subr.bf16.mxu0 %v5538_v20  ;;  %v5573_v57 = vld [vmem:[%s7313_s1 + $0x1a0] sm:$0xff]   ;;  %v5577_v61 = vld [vmem:[%s7313_s1 + $0x1a8] sm:$0xff]   ;;  %v5579_v63 = vld [vmem:[%s7313_s1 + $0x130] sm:$0xff]  }
  0x15   :  { %4961 = vmatpush3.bf16.msra.mxu1 %v5537_v19  ;;  %v5580_v0 = vld [vmem:[%s7313_s1 + $0x1f0] sm:$0xff]   ;;  %v5582_v2 = vld [vmem:[%s7313_s1 + $0x178] sm:$0xff]   ;;  %v5588_v9 = vld [vmem:[%s7313_s1 + $0x240] sm:$0xff]  }
  0x16   :  { %4962 = vmatprep.subr.bf16.mxu1 %v5540_v22  ;;  %v5581_v1 = vld [vmem:[%s7313_s1 + $0x1b0] sm:$0xff]   ;;  %v5583_v3 = vld [vmem:[%s7313_s1 + $0x138] sm:$0xff]   ;;  %v5591_v13 = vld [vmem:[%s7313_s1 + $0x200] sm:$0xff]  }
  0x17   :  { %4941 = vmatpush3.bf16.msra.mxu0 %v5539_v21  ;;  %v5584_v4 = vld [vmem:[%s7313_s1 + $0x1f8] sm:$0xff]   ;;  %v23_v5 = vld [vmem:[%s7314_s0 + $0x10] sm:$0xff]  ;;  %v5592_v14 = vld [vmem:[%s7313_s1 + $0x2c0] sm:$0xff]  }
  0x18   :  { %4942 = vmatprep.subr.bf16.mxu0 %v5542_v24  ;;  %v4484_v6 = vcombine.low %v23_v5, %v23_v5  ;;  %v4485_v7 = vcombine.high %v23_v5, %v23_v5  ;;  %v5587_v8 = vld [vmem:[%s7313_s1 + $0x1b8] sm:$0xff]   ;;  %v5593_v15 = vld [vmem:[%s7313_s1 + $0x280] sm:$0xff]   ;;  %v5594_v16 = vld [vmem:[%s7313_s1 + $0x248] sm:$0xff]  }
  0x19   :  { %4963 = vmatpush3.bf16.msra.mxu1 %v5541_v23  ;;  %v24_v10 = vld [vmem:[%s7314_s0 + $0x18] sm:$0xff]  ;;  %v5595_v17 = vld [vmem:[%s7313_s1 + $0x208] sm:$0xff]   ;;  %v5598_v20 = vld [vmem:[%s7313_s1 + $0x250] sm:$0xff]  }
  0x1a   :  { %4964 = vmatprep.subr.bf16.mxu1 %v5544_v26  ;;  %v4486_v11 = vcombine.low %v24_v10, %v24_v10  ;;  %v4487_v12 = vcombine.high %v24_v10, %v24_v10  ;;  %v5596_v18 = vld [vmem:[%s7313_s1 + $0x2c8] sm:$0xff]   ;;  %v5599_v21 = vld [vmem:[%s7313_s1 + $0x210] sm:$0xff]   ;;  %v5602_v24 = vld [vmem:[%s7313_s1 + $0x258] sm:$0xff]  }
  0x1b   :  { %4943 = vmatpush3.bf16.msra.mxu0 %v5543_v25  ;;  %v5597_v19 = vld [vmem:[%s7313_s1 + $0x288] sm:$0xff]   ;;  %v5600_v22 = vld [vmem:[%s7313_s1 + $0x2d0] sm:$0xff]   ;;  %v5603_v25 = vld [vmem:[%s7313_s1 + $0x218] sm:$0xff]  }
  0x1c   :  { %4944 = vmatprep.subr.bf16.mxu0 %v5546_v28  ;;  %v5601_v23 = vld [vmem:[%s7313_s1 + $0x290] sm:$0xff]   ;;  %v5604_v26 = vld [vmem:[%s7313_s1 + $0x2d8] sm:$0xff]   ;;  %v5606_v28 = vld [vmem:[%s7313_s1 + $0x260] sm:$0xff]  }
  0x1d   :  { %4965 = vmatpush3.bf16.msra.mxu1 %v5545_v27  ;;  %v5605_v27 = vld [vmem:[%s7313_s1 + $0x298] sm:$0xff]   ;;  %v5609_v31 = vld [vmem:[%s7313_s1 + $0x2a0] sm:$0xff]   ;;  %v5611_v33 = vld [vmem:[%s7313_s1 + $0x228] sm:$0xff]  }
  0x1e   :  { %4966 = vmatprep.subr.bf16.mxu1 %v5548_v30  ;;  %v5608_v30 = vld [vmem:[%s7313_s1 + $0x2e0] sm:$0xff]   ;;  %v5614_v36 = vld [vmem:[%s7313_s1 + $0x270] sm:$0xff]  }
  0x1f   :  { %4945 = vmatpush3.bf16.msra.mxu0 %v5547_v29  ;;  %v5607_v29 = vld [vmem:[%s7313_s1 + $0x220] sm:$0xff]   ;;  %v5616_v38 = vld [vmem:[%s7313_s1 + $0x2f0] sm:$0xff]  }
  0x20   :  { %4974 = vmatprep.subr.bf16.mxu0 %v5552_v35  ;;  %v5613_v35 = vld [vmem:[%s7313_s1 + $0x2a8] sm:$0xff]   ;;  %v5645_v5 = vld [vmem:[%s7313_s1 + $0x3a0] sm:$0xff]   ;;  %v5650_v10 = vld [vmem:[%s7313_s1 + $0x370] sm:$0xff]  }
  0x21   :  { %4967 = vmatpush3.bf16.msra.mxu1 %v5551_v34  ;;  %v5612_v34 = vld [vmem:[%s7313_s1 + $0x2e8] sm:$0xff]  }
  0x22   :  { %3394 = vmatmul.mubr.bf16.vlgmr.msra.gmra.mrb[0].mxu0 %v4480_v32  ;;  %4996 = vmatprep.subr.bf16.mxu1 %v5556_v40  ;;  %v5610_v32 = vld [vmem:[%s7313_s1 + $0x268] sm:$0xff]   ;;  %v5618_v40 = vld [vmem:[%s7313_s1 + $0x278] sm:$0xff]  }
  0x23   :  { %4975 = vmatpush3.bf16.msra.mxu0 %v5555_v39  ;;  %3473 = vmatprep.mubr.bf16.mxu0 %v4485_v7  ;;  %v5617_v39 = vld [vmem:[%s7313_s1 + $0x2b0] sm:$0xff]   ;;  %v5647_v7 = vld [vmem:[%s7313_s1 + $0x328] sm:$0xff]  }
  0x24   :  { %3434 = vmatmul.mubr.bf16.vlgmr.msra.gmra.mrb[0].mxu1 %v4482_v37  ;;  %4976 = vmatprep.subr.bf16.mxu0 %v5558_v42  ;;  %v5615_v37 = vld [vmem:[%s7313_s1 + $0x230] sm:$0xff]   ;;  %v5620_v42 = vld [vmem:[%s7313_s1 + $0x2f8] sm:$0xff]  }
  0x25   :  { %4997 = vmatpush3.bf16.msra.mxu1 %v5557_v41  ;;  %3513 = vmatprep.mubr.bf16.mxu1 %v4487_v12  ;;  %v5619_v41 = vld [vmem:[%s7313_s1 + $0x238] sm:$0xff]   ;;  %v5652_v12 = vld [vmem:[%s7313_s1 + $0x3f0] sm:$0xff]  }
  0x26   :  { %4998 = vmatprep.subr.bf16.mxu1 %v5560_v44 }
  0x27   :  { %4977 = vmatpush3.bf16.msra.mxu0 %v5559_v43  ;;  %v25_v43 = vld [vmem:[%s7314_s0 + $0x20] sm:$0xff] }
  0x28   :  { %4978 = vmatprep.subr.bf16.mxu0 %v5562_v46  ;;  %v4488_v44 = vcombine.low %v25_v43, %v25_v43  ;;  %v5623_v46 = vld [vmem:[%s7313_s1 + $0x2b8] sm:$0xff]  }
  0x29   :  { %4999 = vmatpush3.bf16.msra.mxu1 %v5561_v45  ;;  %v4489_v45 = vcombine.high %v25_v43, %v25_v43  ;;  %v5681_v43 = vld [vmem:[%s7313_s1 + $0x4a0] sm:$0xff]  }
  0x2a   :  { %5000 = vmatprep.subr.bf16.mxu1 %v5564_v48  ;;  %v26_v48 = vld [vmem:[%s7314_s0 + $0x28] sm:$0xff] }
  0x2b   :  { %4979 = vmatpush3.bf16.msra.mxu0 %v5563_v47  ;;  %v5624_v47 = vld [vmem:[%s7313_s1 + $0x340] sm:$0xff]  }
  0x2c   :  { %4980 = vmatprep.subr.bf16.mxu0 %v5566_v50  ;;  %v4491_v50 = vcombine.high %v26_v48, %v26_v48 }
  0x2d   :  { %5001 = vmatpush3.bf16.msra.mxu1 %v5565_v49  ;;  %v4490_v49 = vcombine.low %v26_v48, %v26_v48  ;;  %v5686_v48 = vld [vmem:[%s7313_s1 + $0x470] sm:$0xff]  }
  0x2e   :  { %5002 = vmatprep.subr.bf16.mxu1 %v5568_v52  ;;  %v5628_v52 = vld [vmem:[%s7313_s1 + $0x3c0] sm:$0xff]  }
  0x2f   :  { %4981 = vmatpush3.bf16.msra.mxu0 %v5567_v51  ;;  %v5627_v51 = vld [vmem:[%s7313_s1 + $0x300] sm:$0xff]  }
  0x30   :  { %4982 = vmatprep.subr.bf16.mxu0 %v5570_v54  ;;  %v5630_v54 = vld [vmem:[%s7313_s1 + $0x348] sm:$0xff]  }
  0x31   :  { %5003 = vmatpush3.bf16.msra.mxu1 %v5569_v53  ;;  %v5629_v53 = vld [vmem:[%s7313_s1 + $0x380] sm:$0xff]  }
  0x32   :  { %5004 = vmatprep.subr.bf16.mxu1 %v5572_v56  ;;  %v5632_v56 = vld [vmem:[%s7313_s1 + $0x3c8] sm:$0xff]  }
  0x33   :  { %4983 = vmatpush3.bf16.msra.mxu0 %v5571_v55  ;;  %v5631_v55 = vld [vmem:[%s7313_s1 + $0x308] sm:$0xff]  }
  0x34   :  { %4984 = vmatprep.subr.bf16.mxu0 %v5574_v58  ;;  %v5634_v58 = vld [vmem:[%s7313_s1 + $0x350] sm:$0xff]  }
  0x35   :  { %5005 = vmatpush3.bf16.msra.mxu1 %v5573_v57  ;;  %v5633_v57 = vld [vmem:[%s7313_s1 + $0x388] sm:$0xff]  }
  0x36   :  { %5006 = vmatprep.subr.bf16.mxu1 %v5576_v60  ;;  %v5636_v60 = vld [vmem:[%s7313_s1 + $0x3d0] sm:$0xff]  }
  0x37   :  { %4985 = vmatpush3.bf16.msra.mxu0 %v5575_v59  ;;  %v5635_v59 = vld [vmem:[%s7313_s1 + $0x310] sm:$0xff]  }
  0x38   :  { %4986 = vmatprep.subr.bf16.mxu0 %v5578_v62  ;;  %v5638_v62 = vld [vmem:[%s7313_s1 + $0x358] sm:$0xff]  }
  0x39   :  { %5007 = vmatpush3.bf16.msra.mxu1 %v5577_v61  ;;  %v5637_v61 = vld [vmem:[%s7313_s1 + $0x390] sm:$0xff]  }
  0x3a   :  { %5008 = vmatprep.subr.bf16.mxu1 %v5580_v0  ;;  %v5640_v0 = vld [vmem:[%s7313_s1 + $0x3d8] sm:$0xff]  }
  0x3b   :  { %4987 = vmatpush3.bf16.msra.mxu0 %v5579_v63  ;;  %v5639_v63 = vld [vmem:[%s7313_s1 + $0x318] sm:$0xff]  }
  0x3c   :  { %4988 = vmatprep.subr.bf16.mxu0 %v5582_v2  ;;  %v5642_v2 = vld [vmem:[%s7313_s1 + $0x360] sm:$0xff]  }
  0x3d   :  { %5009 = vmatpush3.bf16.msra.mxu1 %v5581_v1  ;;  %v5641_v1 = vld [vmem:[%s7313_s1 + $0x398] sm:$0xff]  }
  0x3e   :  { %5010 = vmatprep.subr.bf16.mxu1 %v5584_v4  ;;  %v5644_v4 = vld [vmem:[%s7313_s1 + $0x3e0] sm:$0xff]  }
  0x3f   :  { %4989 = vmatpush3.bf16.msra.mxu0 %v5583_v3  ;;  %v5643_v3 = vld [vmem:[%s7313_s1 + $0x320] sm:$0xff]  }
  0x40   :  { %5018 = vmatprep.subr.bf16.mxu0 %v5588_v9  ;;  %v5649_v9 = vld [vmem:[%s7313_s1 + $0x3a8] sm:$0xff]  }
  0x41   :  { %5011 = vmatpush3.bf16.msra.mxu1 %v5587_v8  ;;  %v5648_v8 = vld [vmem:[%s7313_s1 + $0x3e8] sm:$0xff]  }
  0x42   :  { %3474 = vmatmul.mubr.bf16.vlgmr.msra.gmra.mrb[4].mxu0 %v4484_v6  ;;  %5040 = vmatprep.subr.bf16.mxu1 %v5592_v14  ;;  %v5646_v6 = vld [vmem:[%s7313_s1 + $0x368] sm:$0xff]   ;;  %v5654_v14 = vld [vmem:[%s7313_s1 + $0x378] sm:$0xff]  }
  0x43   :  { %5019 = vmatpush3.bf16.msra.mxu0 %v5591_v13  ;;  %3553 = vmatprep.mubr.bf16.mxu0 %v4489_v45  ;;  %v5653_v13 = vld [vmem:[%s7313_s1 + $0x3b0] sm:$0xff]   ;;  %v5683_v45 = vld [vmem:[%s7313_s1 + $0x428] sm:$0xff]  }
  0x44   :  { %3514 = vmatmul.mubr.bf16.vlgmr.msra.gmra.mrb[4].mxu1 %v4486_v11  ;;  %5020 = vmatprep.subr.bf16.mxu0 %v5594_v16  ;;  %v5651_v11 = vld [vmem:[%s7313_s1 + $0x330] sm:$0xff]   ;;  %v5656_v16 = vld [vmem:[%s7313_s1 + $0x3f8] sm:$0xff]  }
  0x45   :  { %5041 = vmatpush3.bf16.msra.mxu1 %v5593_v15  ;;  %3593 = vmatprep.mubr.bf16.mxu1 %v4491_v50  ;;  %v5655_v15 = vld [vmem:[%s7313_s1 + $0x338] sm:$0xff]   ;;  %v5688_v50 = vld [vmem:[%s7313_s1 + $0x4f0] sm:$0xff]  }
  0x46   :  { %5042 = vmatprep.subr.bf16.mxu1 %v5596_v18 }
  0x47   :  { %5021 = vmatpush3.bf16.msra.mxu0 %v5595_v17  ;;  %v27_v17 = vld [vmem:[%s7314_s0 + $0x30] sm:$0xff] }
  0x48   :  { %5022 = vmatprep.subr.bf16.mxu0 %v5598_v20  ;;  %v4492_v18 = vcombine.low %v27_v17, %v27_v17  ;;  %v5659_v20 = vld [vmem:[%s7313_s1 + $0x3b8] sm:$0xff]  }
  0x49   :  { %5043 = vmatpush3.bf16.msra.mxu1 %v5597_v19  ;;  %v4493_v19 = vcombine.high %v27_v17, %v27_v17  ;;  %v5717_v17 = vld [vmem:[%s7313_s1 + $0x5a0] sm:$0xff]  }
  0x4a   :  { %5044 = vmatprep.subr.bf16.mxu1 %v5600_v22  ;;  %v28_v22 = vld [vmem:[%s7314_s0 + $0x38] sm:$0xff] }
  0x4b   :  { %5023 = vmatpush3.bf16.msra.mxu0 %v5599_v21  ;;  %v5660_v21 = vld [vmem:[%s7313_s1 + $0x440] sm:$0xff]  }
  0x4c   :  { %5024 = vmatprep.subr.bf16.mxu0 %v5602_v24  ;;  %v4495_v24 = vcombine.high %v28_v22, %v28_v22 }
  0x4d   :  { %5045 = vmatpush3.bf16.msra.mxu1 %v5601_v23  ;;  %v4494_v23 = vcombine.low %v28_v22, %v28_v22  ;;  %v5722_v22 = vld [vmem:[%s7313_s1 + $0x570] sm:$0xff]  }
  0x4e   :  { %5046 = vmatprep.subr.bf16.mxu1 %v5604_v26  ;;  %v5664_v26 = vld [vmem:[%s7313_s1 + $0x4c0] sm:$0xff]  }
  0x4f   :  { %5025 = vmatpush3.bf16.msra.mxu0 %v5603_v25  ;;  %v5663_v25 = vld [vmem:[%s7313_s1 + $0x400] sm:$0xff]  }
  0x50   :  { %5026 = vmatprep.subr.bf16.mxu0 %v5606_v28  ;;  %v5666_v28 = vld [vmem:[%s7313_s1 + $0x448] sm:$0xff]  }
  0x51   :  { %5047 = vmatpush3.bf16.msra.mxu1 %v5605_v27  ;;  %v5665_v27 = vld [vmem:[%s7313_s1 + $0x480] sm:$0xff]  }
  0x52   :  { %5048 = vmatprep.subr.bf16.mxu1 %v5608_v30  ;;  %v5668_v30 = vld [vmem:[%s7313_s1 + $0x4c8] sm:$0xff]  }
  0x53   :  { %5027 = vmatpush3.bf16.msra.mxu0 %v5607_v29  ;;  %v5667_v29 = vld [vmem:[%s7313_s1 + $0x408] sm:$0xff]  }
  0x54   :  { %5028 = vmatprep.subr.bf16.mxu0 %v5610_v32  ;;  %v5670_v32 = vld [vmem:[%s7313_s1 + $0x450] sm:$0xff]  }
  0x55   :  { %5049 = vmatpush3.bf16.msra.mxu1 %v5609_v31  ;;  %v5669_v31 = vld [vmem:[%s7313_s1 + $0x488] sm:$0xff]  }
  0x56   :  { %5050 = vmatprep.subr.bf16.mxu1 %v5612_v34  ;;  %v5672_v34 = vld [vmem:[%s7313_s1 + $0x4d0] sm:$0xff]  }
  0x57   :  { %5029 = vmatpush3.bf16.msra.mxu0 %v5611_v33  ;;  %v5671_v33 = vld [vmem:[%s7313_s1 + $0x410] sm:$0xff]  }
  0x58   :  { %5030 = vmatprep.subr.bf16.mxu0 %v5614_v36  ;;  %v5674_v36 = vld [vmem:[%s7313_s1 + $0x458] sm:$0xff]  }
  0x59   :  { %5051 = vmatpush3.bf16.msra.mxu1 %v5613_v35  ;;  %v5673_v35 = vld [vmem:[%s7313_s1 + $0x490] sm:$0xff]  }
  0x5a   :  { %5052 = vmatprep.subr.bf16.mxu1 %v5616_v38  ;;  %v5676_v38 = vld [vmem:[%s7313_s1 + $0x4d8] sm:$0xff]  }
  0x5b   :  { %5031 = vmatpush3.bf16.msra.mxu0 %v5615_v37  ;;  %v5675_v37 = vld [vmem:[%s7313_s1 + $0x418] sm:$0xff]  }
  0x5c   :  { %5032 = vmatprep.subr.bf16.mxu0 %v5618_v40  ;;  %v5678_v40 = vld [vmem:[%s7313_s1 + $0x460] sm:$0xff]  }
  0x5d   :  { %5053 = vmatpush3.bf16.msra.mxu1 %v5617_v39  ;;  %v5677_v39 = vld [vmem:[%s7313_s1 + $0x498] sm:$0xff]  }
  0x5e   :  { %5054 = vmatprep.subr.bf16.mxu1 %v5620_v42  ;;  %v5680_v42 = vld [vmem:[%s7313_s1 + $0x4e0] sm:$0xff]  }
  0x5f   :  { %5033 = vmatpush3.bf16.msra.mxu0 %v5619_v41  ;;  %v5679_v41 = vld [vmem:[%s7313_s1 + $0x420] sm:$0xff]  }
  0x60   :  { %5062 = vmatprep.subr.bf16.mxu0 %v5624_v47  ;;  %v5685_v47 = vld [vmem:[%s7313_s1 + $0x4a8] sm:$0xff]  }
  0x61   :  { %5055 = vmatpush3.bf16.msra.mxu1 %v5623_v46  ;;  %v5684_v46 = vld [vmem:[%s7313_s1 + $0x4e8] sm:$0xff]  }
  0x62   :  { %3554 = vmatmul.mubr.bf16.vlgmr.msra.gmra.mrb[8].mxu0 %v4488_v44  ;;  %5084 = vmatprep.subr.bf16.mxu1 %v5628_v52  ;;  %v5682_v44 = vld [vmem:[%s7313_s1 + $0x468] sm:$0xff]   ;;  %v5690_v52 = vld [vmem:[%s7313_s1 + $0x478] sm:$0xff]  }
  0x63   :  { %5063 = vmatpush3.bf16.msra.mxu0 %v5627_v51  ;;  %3633 = vmatprep.mubr.bf16.mxu0 %v4493_v19  ;;  %v5689_v51 = vld [vmem:[%s7313_s1 + $0x4b0] sm:$0xff]   ;;  %v5719_v19 = vld [vmem:[%s7313_s1 + $0x528] sm:$0xff]  }
  0x64   :  { %3594 = vmatmul.mubr.bf16.vlgmr.msra.gmra.mrb[8].mxu1 %v4490_v49  ;;  %5064 = vmatprep.subr.bf16.mxu0 %v5630_v54  ;;  %v5687_v49 = vld [vmem:[%s7313_s1 + $0x430] sm:$0xff]   ;;  %v5692_v54 = vld [vmem:[%s7313_s1 + $0x4f8] sm:$0xff]  }
  0x65   :  { %5085 = vmatpush3.bf16.msra.mxu1 %v5629_v53  ;;  %3673 = vmatprep.mubr.bf16.mxu1 %v4495_v24  ;;  %v5691_v53 = vld [vmem:[%s7313_s1 + $0x438] sm:$0xff]   ;;  %v5724_v24 = vld [vmem:[%s7313_s1 + $0x5f0] sm:$0xff]  }
  0x66   :  { %5086 = vmatprep.subr.bf16.mxu1 %v5632_v56 }
  0x67   :  { %5065 = vmatpush3.bf16.msra.mxu0 %v5631_v55  ;;  %v29_v55 = vld [vmem:[%s7314_s0 + $0x40] sm:$0xff] }
  0x68   :  { %5066 = vmatprep.subr.bf16.mxu0 %v5634_v58  ;;  %v4496_v56 = vcombine.low %v29_v55, %v29_v55  ;;  %v5695_v58 = vld [vmem:[%s7313_s1 + $0x4b8] sm:$0xff]  }
  0x69   :  { %5087 = vmatpush3.bf16.msra.mxu1 %v5633_v57  ;;  %v4497_v57 = vcombine.high %v29_v55, %v29_v55  ;;  %v5753_v55 = vld [vmem:[%s7313_s1 + $0x6a0] sm:$0xff]  }
  0x6a   :  { %5088 = vmatprep.subr.bf16.mxu1 %v5636_v60  ;;  %v30_v60 = vld [vmem:[%s7314_s0 + $0x48] sm:$0xff] }
  0x6b   :  { %5067 = vmatpush3.bf16.msra.mxu0 %v5635_v59  ;;  %v5696_v59 = vld [vmem:[%s7313_s1 + $0x540] sm:$0xff]  }
  0x6c   :  { %5068 = vmatprep.subr.bf16.mxu0 %v5638_v62  ;;  %v4499_v62 = vcombine.high %v30_v60, %v30_v60 }
  0x6d   :  { %5089 = vmatpush3.bf16.msra.mxu1 %v5637_v61  ;;  %v4498_v61 = vcombine.low %v30_v60, %v30_v60  ;;  %v5758_v60 = vld [vmem:[%s7313_s1 + $0x670] sm:$0xff]  }
  0x6e   :  { %5090 = vmatprep.subr.bf16.mxu1 %v5640_v0  ;;  %v5700_v0 = vld [vmem:[%s7313_s1 + $0x5c0] sm:$0xff]  }
  0x6f   :  { %5069 = vmatpush3.bf16.msra.mxu0 %v5639_v63  ;;  %v5699_v63 = vld [vmem:[%s7313_s1 + $0x500] sm:$0xff]  }
  0x70   :  { %5070 = vmatprep.subr.bf16.mxu0 %v5642_v2  ;;  %v5702_v2 = vld [vmem:[%s7313_s1 + $0x548] sm:$0xff]  }
  0x71   :  { %5091 = vmatpush3.bf16.msra.mxu1 %v5641_v1  ;;  %v5701_v1 = vld [vmem:[%s7313_s1 + $0x580] sm:$0xff]  }
  0x72   :  { %5092 = vmatprep.subr.bf16.mxu1 %v5644_v4  ;;  %v5704_v4 = vld [vmem:[%s7313_s1 + $0x5c8] sm:$0xff]  }
  0x73   :  { %5071 = vmatpush3.bf16.msra.mxu0 %v5643_v3  ;;  %v5703_v3 = vld [vmem:[%s7313_s1 + $0x508] sm:$0xff]  }
  0x74   :  { %5072 = vmatprep.subr.bf16.mxu0 %v5646_v6  ;;  %v5706_v6 = vld [vmem:[%s7313_s1 + $0x550] sm:$0xff]  }
  0x75   :  { %5093 = vmatpush3.bf16.msra.mxu1 %v5645_v5  ;;  %v5705_v5 = vld [vmem:[%s7313_s1 + $0x588] sm:$0xff]  }
  0x76   :  { %5094 = vmatprep.subr.bf16.mxu1 %v5648_v8  ;;  %v5708_v8 = vld [vmem:[%s7313_s1 + $0x5d0] sm:$0xff]  }
  0x77   :  { %5073 = vmatpush3.bf16.msra.mxu0 %v5647_v7  ;;  %v5707_v7 = vld [vmem:[%s7313_s1 + $0x510] sm:$0xff]  }
  0x78   :  { %5074 = vmatprep.subr.bf16.mxu0 %v5650_v10  ;;  %v5710_v10 = vld [vmem:[%s7313_s1 + $0x558] sm:$0xff]  }
  0x79   :  { %5095 = vmatpush3.bf16.msra.mxu1 %v5649_v9  ;;  %v5709_v9 = vld [vmem:[%s7313_s1 + $0x590] sm:$0xff]  }
  0x7a   :  { %5096 = vmatprep.subr.bf16.mxu1 %v5652_v12  ;;  %v5712_v12 = vld [vmem:[%s7313_s1 + $0x5d8] sm:$0xff]  }
  0x7b   :  { %5075 = vmatpush3.bf16.msra.mxu0 %v5651_v11  ;;  %v5711_v11 = vld [vmem:[%s7313_s1 + $0x518] sm:$0xff]  }
  0x7c   :  { %5076 = vmatprep.subr.bf16.mxu0 %v5654_v14  ;;  %v5714_v14 = vld [vmem:[%s7313_s1 + $0x560] sm:$0xff]  }
  0x7d   :  { %5097 = vmatpush3.bf16.msra.mxu1 %v5653_v13  ;;  %v5713_v13 = vld [vmem:[%s7313_s1 + $0x598] sm:$0xff]  }
  0x7e   :  { %5098 = vmatprep.subr.bf16.mxu1 %v5656_v16  ;;  %v5716_v16 = vld [vmem:[%s7313_s1 + $0x5e0] sm:$0xff]  }
  0x7f   :  { %5077 = vmatpush3.bf16.msra.mxu0 %v5655_v15  ;;  %v5715_v15 = vld [vmem:[%s7313_s1 + $0x520] sm:$0xff]  }
  0x80   :  { %5106 = vmatprep.subr.bf16.mxu0 %v5660_v21  ;;  %v5721_v21 = vld [vmem:[%s7313_s1 + $0x5a8] sm:$0xff]  }
  0x81   :  { %5099 = vmatpush3.bf16.msra.mxu1 %v5659_v20  ;;  %v5720_v20 = vld [vmem:[%s7313_s1 + $0x5e8] sm:$0xff]  }
  0x82   :  { %3634 = vmatmul.mubr.bf16.vlgmr.msra.gmra.mrb[12].mxu0 %v4492_v18  ;;  %5128 = vmatprep.subr.bf16.mxu1 %v5664_v26  ;;  %v5718_v18 = vld [vmem:[%s7313_s1 + $0x568] sm:$0xff]   ;;  %v5726_v26 = vld [vmem:[%s7313_s1 + $0x578] sm:$0xff]  }
  0x83   :  { %5107 = vmatpush3.bf16.msra.mxu0 %v5663_v25  ;;  %3713 = vmatprep.mubr.bf16.mxu0 %v4497_v57  ;;  %v5725_v25 = vld [vmem:[%s7313_s1 + $0x5b0] sm:$0xff]   ;;  %v5755_v57 = vld [vmem:[%s7313_s1 + $0x628] sm:$0xff]  }
  0x84   :  { %3674 = vmatmul.mubr.bf16.vlgmr.msra.gmra.mrb[12].mxu1 %v4494_v23  ;;  %5108 = vmatprep.subr.bf16.mxu0 %v5666_v28  ;;  %v5723_v23 = vld [vmem:[%s7313_s1 + $0x530] sm:$0xff]   ;;  %v5728_v28 = vld [vmem:[%s7313_s1 + $0x5f8] sm:$0xff]  }
  0x85   :  { %5129 = vmatpush3.bf16.msra.mxu1 %v5665_v27  ;;  %3753 = vmatprep.mubr.bf16.mxu1 %v4499_v62  ;;  %v5727_v27 = vld [vmem:[%s7313_s1 + $0x538] sm:$0xff]   ;;  %v5760_v62 = vld [vmem:[%s7313_s1 + $0x6f0] sm:$0xff]  }
  0x86   :  { %5130 = vmatprep.subr.bf16.mxu1 %v5668_v30 }
  0x87   :  { %5109 = vmatpush3.bf16.msra.mxu0 %v5667_v29  ;;  %v31_v29 = vld [vmem:[%s7314_s0 + $0x50] sm:$0xff] }
  0x88   :  { %5110 = vmatprep.subr.bf16.mxu0 %v5670_v32  ;;  %v4500_v30 = vcombine.low %v31_v29, %v31_v29  ;;  %v5731_v32 = vld [vmem:[%s7313_s1 + $0x5b8] sm:$0xff]  }
  0x89   :  { %5131 = vmatpush3.bf16.msra.mxu1 %v5669_v31  ;;  %v4501_v31 = vcombine.high %v31_v29, %v31_v29  ;;  %v5788_v29 = vld [vmem:[%s7313_s1 + $0x7e0] sm:$0xff]  }
  0x8a   :  { %5132 = vmatprep.subr.bf16.mxu1 %v5672_v34  ;;  %v32_v34 = vld [vmem:[%s7314_s0 + $0x58] sm:$0xff] }
  0x8b   :  { %5111 = vmatpush3.bf16.msra.mxu0 %v5671_v33  ;;  %v5732_v33 = vld [vmem:[%s7313_s1 + $0x640] sm:$0xff]  }
  0x8c   :  { %5112 = vmatprep.subr.bf16.mxu0 %v5674_v36  ;;  %v4503_v36 = vcombine.high %v32_v34, %v32_v34 }
  0x8d   :  { %5133 = vmatpush3.bf16.msra.mxu1 %v5673_v35  ;;  %v4502_v35 = vcombine.low %v32_v34, %v32_v34 }
  0x8e   :  { %5134 = vmatprep.subr.bf16.mxu1 %v5676_v38  ;;  %v5736_v38 = vld [vmem:[%s7313_s1 + $0x6c0] sm:$0xff]  }
  0x8f   :  { %5113 = vmatpush3.bf16.msra.mxu0 %v5675_v37  ;;  %v5735_v37 = vld [vmem:[%s7313_s1 + $0x600] sm:$0xff]  }
  0x90   :  { %5114 = vmatprep.subr.bf16.mxu0 %v5678_v40  ;;  %v5738_v40 = vld [vmem:[%s7313_s1 + $0x648] sm:$0xff]  }
  0x91   :  { %5135 = vmatpush3.bf16.msra.mxu1 %v5677_v39  ;;  %v5737_v39 = vld [vmem:[%s7313_s1 + $0x680] sm:$0xff]  }
  0x92   :  { %5136 = vmatprep.subr.bf16.mxu1 %v5680_v42  ;;  %v5740_v42 = vld [vmem:[%s7313_s1 + $0x6c8] sm:$0xff]  }
  0x93   :  { %5115 = vmatpush3.bf16.msra.mxu0 %v5679_v41  ;;  %v5739_v41 = vld [vmem:[%s7313_s1 + $0x608] sm:$0xff]  }
  0x94   :  { %5116 = vmatprep.subr.bf16.mxu0 %v5682_v44  ;;  %v5742_v44 = vld [vmem:[%s7313_s1 + $0x650] sm:$0xff]  }
  0x95   :  { %5137 = vmatpush3.bf16.msra.mxu1 %v5681_v43  ;;  %v5741_v43 = vld [vmem:[%s7313_s1 + $0x688] sm:$0xff]  }
  0x96   :  { %5138 = vmatprep.subr.bf16.mxu1 %v5684_v46  ;;  %v5744_v46 = vld [vmem:[%s7313_s1 + $0x6d0] sm:$0xff]  }
  0x97   :  { %5117 = vmatpush3.bf16.msra.mxu0 %v5683_v45  ;;  %v5743_v45 = vld [vmem:[%s7313_s1 + $0x610] sm:$0xff]  }
  0x98   :  { %5118 = vmatprep.subr.bf16.mxu0 %v5686_v48  ;;  %v5746_v48 = vld [vmem:[%s7313_s1 + $0x658] sm:$0xff]  }
  0x99   :  { %5139 = vmatpush3.bf16.msra.mxu1 %v5685_v47  ;;  %v5745_v47 = vld [vmem:[%s7313_s1 + $0x690] sm:$0xff]  }
  0x9a   :  { %5140 = vmatprep.subr.bf16.mxu1 %v5688_v50  ;;  %v5748_v50 = vld [vmem:[%s7313_s1 + $0x6d8] sm:$0xff]  }
  0x9b   :  { %5119 = vmatpush3.bf16.msra.mxu0 %v5687_v49  ;;  %v5747_v49 = vld [vmem:[%s7313_s1 + $0x618] sm:$0xff]  }
  0x9c   :  { %5120 = vmatprep.subr.bf16.mxu0 %v5690_v52  ;;  %v5750_v52 = vld [vmem:[%s7313_s1 + $0x660] sm:$0xff]  }
  0x9d   :  { %5141 = vmatpush3.bf16.msra.mxu1 %v5689_v51  ;;  %v5749_v51 = vld [vmem:[%s7313_s1 + $0x698] sm:$0xff]  }
  0x9e   :  { %5142 = vmatprep.subr.bf16.mxu1 %v5692_v54  ;;  %v5752_v54 = vld [vmem:[%s7313_s1 + $0x6e0] sm:$0xff]  }
  0x9f   :  { %5121 = vmatpush3.bf16.msra.mxu0 %v5691_v53  ;;  %v5751_v53 = vld [vmem:[%s7313_s1 + $0x620] sm:$0xff]  }
  0xa0   :  { %5150 = vmatprep.subr.bf16.mxu0 %v5696_v59  ;;  %v5757_v59 = vld [vmem:[%s7313_s1 + $0x6a8] sm:$0xff]  }
  0xa1   :  { %5143 = vmatpush3.bf16.msra.mxu1 %v5695_v58  ;;  %v5756_v58 = vld [vmem:[%s7313_s1 + $0x6e8] sm:$0xff]  }
  0xa2   :  { %3714 = vmatmul.mubr.bf16.vlgmr.msra.gmra.mrb[16].mxu0 %v4496_v56  ;;  %5172 = vmatprep.subr.bf16.mxu1 %v5700_v0  ;;  %v5754_v56 = vld [vmem:[%s7313_s1 + $0x668] sm:$0xff]   ;;  %v5762_v0 = vld [vmem:[%s7313_s1 + $0x678] sm:$0xff]  }
  0xa3   :  { %5151 = vmatpush3.bf16.msra.mxu0 %v5699_v63  ;;  %3793 = vmatprep.mubr.bf16.mxu0 %v4501_v31  ;;  %v5761_v63 = vld [vmem:[%s7313_s1 + $0x6b0] sm:$0xff]   ;;  %v5789_v31 = vld [vmem:[%s7313_s1 + $0x7a0] sm:$0xff]  }
  0xa4   :  { %3754 = vmatmul.mubr.bf16.vlgmr.msra.gmra.mrb[16].mxu1 %v4498_v61  ;;  %5152 = vmatprep.subr.bf16.mxu0 %v5702_v2  ;;  %v5759_v61 = vld [vmem:[%s7313_s1 + $0x630] sm:$0xff]   ;;  %v5764_v2 = vld [vmem:[%s7313_s1 + $0x6f8] sm:$0xff]  }
  0xa5   :  { %5173 = vmatpush3.bf16.msra.mxu1 %v5701_v1  ;;  %3833 = vmatprep.mubr.bf16.mxu1 %v4503_v36  ;;  %v5763_v1 = vld [vmem:[%s7313_s1 + $0x638] sm:$0xff]  }
  0xa6   :  { %5174 = vmatprep.subr.bf16.mxu1 %v5704_v4 }
  0xa7   :  { %5153 = vmatpush3.bf16.msra.mxu0 %v5703_v3  ;;  %v33_v3 = vld [vmem:[%s7314_s0 + $0x60] sm:$0xff] }
  0xa8   :  { %5154 = vmatprep.subr.bf16.mxu0 %v5706_v6  ;;  %v4504_v4 = vcombine.low %v33_v3, %v33_v3  ;;  %v5767_v6 = vld [vmem:[%s7313_s1 + $0x6b8] sm:$0xff]  }
  0xa9   :  { %5175 = vmatpush3.bf16.msra.mxu1 %v5705_v5  ;;  %v4505_v5 = vcombine.high %v33_v3, %v33_v3  ;;  %v5812_v3 = vld [vmem:[%s7313_s1 + $0x8c8] sm:$0xff]  }
  0xaa   :  { %5176 = vmatprep.subr.bf16.mxu1 %v5708_v8  ;;  %v34_v8 = vld [vmem:[%s7314_s0 + $0x68] sm:$0xff] }
  0xab   :  { %5155 = vmatpush3.bf16.msra.mxu0 %v5707_v7  ;;  %v5768_v7 = vld [vmem:[%s7313_s1 + $0x740] sm:$0xff]  }
  0xac   :  { %5156 = vmatprep.subr.bf16.mxu0 %v5710_v10  ;;  %v4507_v10 = vcombine.high %v34_v8, %v34_v8 }
  0xad   :  { %5177 = vmatpush3.bf16.msra.mxu1 %v5709_v9  ;;  %v4506_v9 = vcombine.low %v34_v8, %v34_v8  ;;  %v5817_v8 = vld [vmem:[%s7313_s1 + $0x890] sm:$0xff]  }
  0xae   :  { %5178 = vmatprep.subr.bf16.mxu1 %v5712_v12  ;;  %v5772_v12 = vld [vmem:[%s7313_s1 + $0x7c0] sm:$0xff]  }
  0xaf   :  { %5157 = vmatpush3.bf16.msra.mxu0 %v5711_v11  ;;  %v5771_v11 = vld [vmem:[%s7313_s1 + $0x700] sm:$0xff]  }
  0xb0   :  { %5158 = vmatprep.subr.bf16.mxu0 %v5714_v14  ;;  %v5774_v14 = vld [vmem:[%s7313_s1 + $0x748] sm:$0xff]  }
  0xb1   :  { %5179 = vmatpush3.bf16.msra.mxu1 %v5713_v13  ;;  %v5773_v13 = vld [vmem:[%s7313_s1 + $0x780] sm:$0xff]  }
  0xb2   :  { %5180 = vmatprep.subr.bf16.mxu1 %v5716_v16  ;;  %v5776_v16 = vld [vmem:[%s7313_s1 + $0x7c8] sm:$0xff]  }
  0xb3   :  { %5159 = vmatpush3.bf16.msra.mxu0 %v5715_v15  ;;  %v5775_v15 = vld [vmem:[%s7313_s1 + $0x708] sm:$0xff]  }
  0xb4   :  { %5160 = vmatprep.subr.bf16.mxu0 %v5718_v18  ;;  %v5778_v18 = vld [vmem:[%s7313_s1 + $0x750] sm:$0xff]  }
  0xb5   :  { %5181 = vmatpush3.bf16.msra.mxu1 %v5717_v17  ;;  %v5777_v17 = vld [vmem:[%s7313_s1 + $0x788] sm:$0xff]  }
  0xb6   :  { %5182 = vmatprep.subr.bf16.mxu1 %v5720_v20  ;;  %v5780_v20 = vld [vmem:[%s7313_s1 + $0x7d0] sm:$0xff]  }
  0xb7   :  { %5161 = vmatpush3.bf16.msra.mxu0 %v5719_v19  ;;  %v5779_v19 = vld [vmem:[%s7313_s1 + $0x710] sm:$0xff]  }
  0xb8   :  { %5162 = vmatprep.subr.bf16.mxu0 %v5722_v22  ;;  %v5782_v22 = vld [vmem:[%s7313_s1 + $0x758] sm:$0xff]  }
  0xb9   :  { %5183 = vmatpush3.bf16.msra.mxu1 %v5721_v21  ;;  %v5781_v21 = vld [vmem:[%s7313_s1 + $0x790] sm:$0xff]  }
  0xba   :  { %5184 = vmatprep.subr.bf16.mxu1 %v5724_v24  ;;  %v5784_v24 = vld [vmem:[%s7313_s1 + $0x7d8] sm:$0xff]  }
  0xbb   :  { %5163 = vmatpush3.bf16.msra.mxu0 %v5723_v23  ;;  %v5783_v23 = vld [vmem:[%s7313_s1 + $0x718] sm:$0xff]  }
  0xbc   :  { %5164 = vmatprep.subr.bf16.mxu0 %v5726_v26  ;;  %v5786_v26 = vld [vmem:[%s7313_s1 + $0x760] sm:$0xff]  }
  0xbd   :  { %5185 = vmatpush3.bf16.msra.mxu1 %v5725_v25  ;;  %v5785_v25 = vld [vmem:[%s7313_s1 + $0x798] sm:$0xff]  }
  0xbe   :  { %5186 = vmatprep.subr.bf16.mxu1 %v5728_v28 }
  0xbf   :  { %5165 = vmatpush3.bf16.msra.mxu0 %v5727_v27  ;;  %v5787_v27 = vld [vmem:[%s7313_s1 + $0x720] sm:$0xff]  }
  0xc0   :  { %5194 = vmatprep.subr.bf16.mxu0 %v5732_v33 }
  0xc1   :  { %5187 = vmatpush3.bf16.msra.mxu1 %v5731_v32  ;;  %v4479_v32 = vld [vmem:[%s7315_s2] ss:$0 sm:$0xff] }
  0xc2   :  { %3794 = vmatmul.mubr.bf16.vlgmr.msra.gmra.mrb[20].mxu0 %v4500_v30  ;;  %5216 = vmatprep.subr.bf16.mxu1 %v5736_v38  ;;  %v5791_v38 = vld [vmem:[%s7313_s1 + $0x728] sm:$0xff]  }
  0xc3   :  { %5195 = vmatpush3.bf16.msra.mxu0 %v5735_v37  ;;  %3873 = vmatprep.mubr.bf16.mxu0 %v4505_v5  ;;  %v5814_v5 = vld [vmem:[%s7313_s1 + $0x850] sm:$0xff]  }
  0xc4   :  { %3834 = vmatmul.mubr.bf16.vlgmr.msra.gmra.mrb[20].mxu1 %v4502_v35  ;;  %5196 = vmatprep.subr.bf16.mxu0 %v5738_v40  ;;  %v5790_v35 = vld [vmem:[%s7313_s1 + $0x768] sm:$0xff]  }
  0xc5   :  { %5217 = vmatpush3.bf16.msra.mxu1 %v5737_v39  ;;  %3913 = vmatprep.mubr.bf16.mxu1 %v4507_v10  ;;  %v5819_v10 = vld [vmem:[%s7313_s1 + $0x818] sm:$0xff]  }
  0xc6   :  { %5218 = vmatprep.subr.bf16.mxu1 %v5740_v42 }
  0xc7   :  { %5197 = vmatpush3.bf16.msra.mxu0 %v5739_v41  ;;  %v5792_v41 = vld [vmem:[%s7313_s1 + $0x7e8] sm:$0xff]  }
  0xc8   :  { %5198 = vmatprep.subr.bf16.mxu0 %v5742_v44 }
  0xc9   :  { %5219 = vmatpush3.bf16.msra.mxu1 %v5741_v43  ;;  %v5793_v43 = vld [vmem:[%s7313_s1 + $0x7a8] sm:$0xff]  }
  0xca   :  { %5220 = vmatprep.subr.bf16.mxu1 %v5744_v46 }
  0xcb   :  { %5199 = vmatpush3.bf16.msra.mxu0 %v5743_v45  ;;  %v5794_v45 = vld [vmem:[%s7313_s1 + $0x770] sm:$0xff]  }
  0xcc   :  { %5200 = vmatprep.subr.bf16.mxu0 %v5746_v48  ;;  %v5795_v48 = vld [vmem:[%s7313_s1 + $0x730] sm:$0xff]  }
  0xcd   :  { %5221 = vmatpush3.bf16.msra.mxu1 %v5745_v47 }
  0xce   :  { %5222 = vmatprep.subr.bf16.mxu1 %v5748_v50  ;;  %v5797_v50 = vld [vmem:[%s7313_s1 + $0x7b0] sm:$0xff]  }
  0xcf   :  { %5201 = vmatpush3.bf16.msra.mxu0 %v5747_v49  ;;  %v5796_v49 = vld [vmem:[%s7313_s1 + $0x7f0] sm:$0xff]  }
  0xd0   :  { %5202 = vmatprep.subr.bf16.mxu0 %v5750_v52  ;;  %v5799_v52 = vld [vmem:[%s7313_s1 + $0x738] sm:$0xff]  }
  0xd1   :  { %5223 = vmatpush3.bf16.msra.mxu1 %v5749_v51  ;;  %v5798_v51 = vld [vmem:[%s7313_s1 + $0x778] sm:$0xff]  }
  0xd2   :  { %5224 = vmatprep.subr.bf16.mxu1 %v5752_v54  ;;  %v35_v54 = vld [vmem:[%s7314_s0 + $0x70] sm:$0xff] }
  0xd3   :  { %5203 = vmatpush3.bf16.msra.mxu0 %v5751_v53  ;;  %v5800_v53 = vld [vmem:[%s7313_s1 + $0x7f8] sm:$0xff]  }
  0xd4   :  { %5204 = vmatprep.subr.bf16.mxu0 %v5754_v56  ;;  %v4509_v56 = vcombine.high %v35_v54, %v35_v54 }
  0xd5   :  { %5225 = vmatpush3.bf16.msra.mxu1 %v5753_v55  ;;  %v4508_v55 = vcombine.low %v35_v54, %v35_v54  ;;  %v5849_v54 = vld [vmem:[%s7313_s1 + $0x988] sm:$0xff]  }
  0xd6   :  { %5226 = vmatprep.subr.bf16.mxu1 %v5756_v58  ;;  %v5804_v58 = vld [vmem:[%s7313_s1 + $0x840] sm:$0xff]  }
  0xd7   :  { %5205 = vmatpush3.bf16.msra.mxu0 %v5755_v57  ;;  %v5803_v57 = vld [vmem:[%s7313_s1 + $0x7b8] sm:$0xff]  }
  0xd8   :  { %5206 = vmatprep.subr.bf16.mxu0 %v5758_v60 }
  0xd9   :  { %5227 = vmatpush3.bf16.msra.mxu1 %v5757_v59  ;;  %v36_v59 = vld [vmem:[%s7314_s0 + $0x78] sm:$0xff] }
  0xda   :  { %5228 = vmatprep.subr.bf16.mxu1 %v5760_v62  ;;  %v4510_v60 = vcombine.low %v36_v59, %v36_v59  ;;  %v5807_v62 = vld [vmem:[%s7313_s1 + $0x800] sm:$0xff]  }
  0xdb   :  { %5207 = vmatpush3.bf16.msra.mxu0 %v5759_v61  ;;  %v4511_v61 = vcombine.high %v36_v59, %v36_v59  ;;  %v5854_v59 = vld [vmem:[%s7313_s1 + $0x958] sm:$0xff]  }
  0xdc   :  { %5208 = vmatprep.subr.bf16.mxu0 %v5762_v0  ;;  %v5809_v0 = vld [vmem:[%s7313_s1 + $0x880] sm:$0xff]  }
  0xdd   :  { %5229 = vmatpush3.bf16.msra.mxu1 %v5761_v63  ;;  %v5808_v63 = vld [vmem:[%s7313_s1 + $0x8c0] sm:$0xff]  }
  0xde   :  { %5230 = vmatprep.subr.bf16.mxu1 %v5764_v2  ;;  %v5811_v2 = vld [vmem:[%s7313_s1 + $0x808] sm:$0xff]  }
  0xdf   :  { %5209 = vmatpush3.bf16.msra.mxu0 %v5763_v1  ;;  %v5810_v1 = vld [vmem:[%s7313_s1 + $0x848] sm:$0xff]  }
  0xe0   :  { %5238 = vmatprep.subr.bf16.mxu0 %v5768_v7  ;;  %v5816_v7 = vld [vmem:[%s7313_s1 + $0x8d0] sm:$0xff]  }
  0xe1   :  { %5231 = vmatpush3.bf16.msra.mxu1 %v5767_v6  ;;  %v5815_v6 = vld [vmem:[%s7313_s1 + $0x810] sm:$0xff]  }
  0xe2   :  { %3874 = vmatmul.mubr.bf16.vlgmr.msra.gmra.mrb[24].mxu0 %v4504_v4  ;;  %5260 = vmatprep.subr.bf16.mxu1 %v5772_v12  ;;  %v5813_v4 = vld [vmem:[%s7313_s1 + $0x888] sm:$0xff]   ;;  %v5821_v12 = vld [vmem:[%s7313_s1 + $0x898] sm:$0xff]  }
  0xe3   :  { %5239 = vmatpush3.bf16.msra.mxu0 %v5771_v11  ;;  %3953 = vmatprep.mubr.bf16.mxu0 %v4509_v56  ;;  %v5820_v11 = vld [vmem:[%s7313_s1 + $0x8d8] sm:$0xff]   ;;  %v5851_v56 = vld [vmem:[%s7313_s1 + $0x910] sm:$0xff]  }
  0xe4   :  { %3914 = vmatmul.mubr.bf16.vlgmr.msra.gmra.mrb[24].mxu1 %v4506_v9  ;;  %5240 = vmatprep.subr.bf16.mxu0 %v5774_v14  ;;  %v5818_v9 = vld [vmem:[%s7313_s1 + $0x858] sm:$0xff]  }
  0xe5   :  { %5261 = vmatpush3.bf16.msra.mxu1 %v5773_v13  ;;  %3993 = vmatprep.mubr.bf16.mxu1 %v4511_v61  ;;  %v5822_v13 = vld [vmem:[%s7313_s1 + $0x860] sm:$0xff]   ;;  %v5856_v61 = vld [vmem:[%s7313_s1 + $0x9d8] sm:$0xff]  }
  0xe6   :  { %5262 = vmatprep.subr.bf16.mxu1 %v5776_v16 }
  0xe7   :  { %5241 = vmatpush3.bf16.msra.mxu0 %v5775_v15  ;;  %v5823_v15 = vld [vmem:[%s7313_s1 + $0x820] sm:$0xff]  }
  0xe8   :  { %5242 = vmatprep.subr.bf16.mxu0 %v5778_v18 }
  0xe9   :  { %5263 = vmatpush3.bf16.msra.mxu1 %v5777_v17  ;;  %v5824_v17 = vld [vmem:[%s7313_s1 + $0x8e0] sm:$0xff]  }
  0xea   :  { %5264 = vmatprep.subr.bf16.mxu1 %v5780_v20  ;;  %v5825_v20 = vld [vmem:[%s7313_s1 + $0x8a0] sm:$0xff]  }
  0xeb   :  { %5243 = vmatpush3.bf16.msra.mxu0 %v5779_v19 }
  0xec   :  { %5244 = vmatprep.subr.bf16.mxu0 %v5782_v22 }
  0xed   :  { %5265 = vmatpush3.bf16.msra.mxu1 %v5781_v21 }
  0xee   :  { %5266 = vmatprep.subr.bf16.mxu1 %v5784_v24 }
  0xef   :  { %5245 = vmatpush3.bf16.msra.mxu0 %v5783_v23  ;;  %v5826_v23 = vld [vmem:[%s7313_s1 + $0x868] sm:$0xff]  }
  0xf0   :  { %5246 = vmatprep.subr.bf16.mxu0 %v5786_v26 }
  0xf1   :  { %5267 = vmatpush3.bf16.msra.mxu1 %v5785_v25  ;;  %v5827_v25 = vld [vmem:[%s7313_s1 + $0x828] sm:$0xff]  }
  0xf2   :  { %5268 = vmatprep.subr.bf16.mxu1 %v5788_v29 }
  0xf3   :  { %5247 = vmatpush3.bf16.msra.mxu0 %v5787_v27 }
  0xf4   :  { %5248 = vmatprep.subr.bf16.mxu0 %v5790_v35  ;;  %v5832_v35 = vld [vmem:[%s7313_s1 + $0x8f0] sm:$0xff]  }
  0xf5   :  { %v4946_v28 = vpop.f32.mrb[0].mxu0  ;;  %5269 = vmatpush3.bf16.msra.mxu1 %v5789_v31 }
  0xf6   :  { %v4947_v30 = vpop.f32.mrb[1].mxu0  ;;  %5270 = vmatprep.subr.bf16.mxu1 %v5792_v41 }
  0xf7   :  { %v4948_v33 = vadd.f32 %v4947_v30, %v4946_v28  ;;  %v4949_v34 = vpop.f32.mrb[2].mxu0  ;;  %v4968_v36 = vpop.f32.mrb[0].mxu1  ;;  %5249 = vmatpush3.bf16.msra.mxu0 %v5791_v38  ;;  %v5828_v28 = vld [vmem:[%s7313_s1 + $0x8e8] sm:$0xff]   ;;  %v5835_v38 = vld [vmem:[%s7313_s1 + $0x838] sm:$0xff]  }
  0xf8   :  { %v4950_v39 = vpop.f32.mrb[3].mxu0  ;;  %v4969_v40 = vpop.f32.mrb[1].mxu1  ;;  %5250 = vmatprep.subr.bf16.mxu0 %v5794_v45  ;;  %v5829_v30 = vld [vmem:[%s7313_s1 + $0x8a8] sm:$0xff]   ;;  %v5831_v34 = vld [vmem:[%s7313_s1 + $0x830] sm:$0xff]  }
  0xf9   :  { %v3396_v37 = vadd.f32 %v4948_v33, %v4479_v32  ;;  %v4970_v42 = vadd.f32 %v4969_v40, %v4968_v36  ;;  %v4971_v44 = vpop.f32.mrb[2].mxu1  ;;  %5271 = vmatpush3.bf16.msra.mxu1 %v5793_v43  ;;  %v5830_v33 = vld [vmem:[%s7313_s1 + $0x870] sm:$0xff]   ;;  %v5836_v39 = vld [vmem:[%s7313_s1 + $0x8f8] sm:$0xff]   ;;  %v37_v40 = vld [vmem:[%s7314_s0 + $0x80] sm:$0xff] }
  0xfa   :  { %v4972_v46 = vpop.f32.mrb[3].mxu1  ;;  %5272 = vmatprep.subr.bf16.mxu1 %v5796_v49  ;;  %v5833_v36 = vld [vmem:[%s7313_s1 + $0x8b0] sm:$0xff]   ;;  %v4512_v41 = vcombine.low %v37_v40, %v37_v40  ;;  %v5839_v43 = vld [vmem:[%s7313_s1 + $0x8b8] sm:$0xff]   ;;  %v5840_v44 = vld [vmem:[%s7313_s1 + $0x940] sm:$0xff]  }
  0xfb   :  { %v6791_v47 = vadd.f32 %v4970_v42, %v3396_v37  ;;  %5251 = vmatpush3.bf16.msra.mxu0 %v5795_v48  ;;  %v5834_v37 = vld [vmem:[%s7313_s1 + $0x878] sm:$0xff]   ;;  %v4513_v42 = vcombine.high %v37_v40, %v37_v40  ;;  %v38_v45 = vld [vmem:[%s7314_s0 + $0x88] sm:$0xff]  ;;  %v5843_v48 = vld [vmem:[%s7313_s1 + $0x900] sm:$0xff]  }
  0xfc   :  { %5252 = vmatprep.subr.bf16.mxu0 %v5798_v51  ;;  %v4514_v46 = vcombine.low %v38_v45, %v38_v45  ;;  %v5844_v49 = vld [vmem:[%s7313_s1 + $0x9c0] sm:$0xff]   ;;  %v5846_v51 = vld [vmem:[%s7313_s1 + $0x948] sm:$0xff]  }
  0xfd   :  { %5273 = vmatpush3.bf16.msra.mxu1 %v5797_v50  ;;  %v5845_v50 = vld [vmem:[%s7313_s1 + $0x980] sm:$0xff]   ;;  %v5885_v40 = vld [vmem:[%s7313_s1 + $0xa88] sm:$0xff]  }
  0xfe   :  { %5274 = vmatprep.subr.bf16.mxu1 %v5800_v53  ;;  %v5848_v53 = vld [vmem:[%s7313_s1 + $0x9c8] sm:$0xff]  }
  0xff   :  { %5253 = vmatpush3.bf16.msra.mxu0 %v5799_v52  ;;  %v5847_v52 = vld [vmem:[%s7313_s1 + $0x908] sm:$0xff]  }
 0x100   :  { %5282 = vmatprep.subr.bf16.mxu0 %v5804_v58  ;;  %v5853_v58 = vld [vmem:[%s7313_s1 + $0x990] sm:$0xff]  }
 0x101   :  { %5275 = vmatpush3.bf16.msra.mxu1 %v5803_v57  ;;  %v5852_v57 = vld [vmem:[%s7313_s1 + $0x9d0] sm:$0xff]  }
 0x102   :  { %3954 = vmatmul.mubr.bf16.vlgmr.msra.gmra.mrb[28].mxu0 %v4508_v55  ;;  %5304 = vmatprep.subr.bf16.mxu1 %v5808_v63  ;;  %v5850_v55 = vld [vmem:[%s7313_s1 + $0x950] sm:$0xff]   ;;  %v5858_v63 = vld [vmem:[%s7313_s1 + $0x960] sm:$0xff]  }
 0x103   :  { %5283 = vmatpush3.bf16.msra.mxu0 %v5807_v62  ;;  %4033 = vmatprep.mubr.bf16.mxu0 %v4513_v42  ;;  %v5857_v62 = vld [vmem:[%s7313_s1 + $0x998] sm:$0xff]   ;;  %v5887_v42 = vld [vmem:[%s7313_s1 + $0xa10] sm:$0xff]  }
 0x104   :  { %3994 = vmatmul.mubr.bf16.vlgmr.msra.gmra.mrb[28].mxu1 %v4510_v60  ;;  %5284 = vmatprep.subr.bf16.mxu0 %v5810_v1  ;;  %v5855_v60 = vld [vmem:[%s7313_s1 + $0x918] sm:$0xff]   ;;  %v5859_v1 = vld [vmem:[%s7313_s1 + $0x920] sm:$0xff]  }
 0x105   :  { %5305 = vmatpush3.bf16.msra.mxu1 %v5809_v0 }
 0x106   :  { %5306 = vmatprep.subr.bf16.mxu1 %v5812_v3  ;;  %v5860_v3 = vld [vmem:[%s7313_s1 + $0x9e0] sm:$0xff]  }
 0x107   :  { %5285 = vmatpush3.bf16.msra.mxu0 %v5811_v2 }
 0x108   :  { %5286 = vmatprep.subr.bf16.mxu0 %v5814_v5 }
 0x109   :  { %5307 = vmatpush3.bf16.msra.mxu1 %v5813_v4 }
 0x10a   :  { %5308 = vmatprep.subr.bf16.mxu1 %v5816_v7 }
 0x10b   :  { %5287 = vmatpush3.bf16.msra.mxu0 %v5815_v6  ;;  %v5861_v6 = vld [vmem:[%s7313_s1 + $0x9a0] sm:$0xff]  }
 0x10c   :  { %5288 = vmatprep.subr.bf16.mxu0 %v5818_v9  ;;  %v5862_v9 = vld [vmem:[%s7313_s1 + $0x968] sm:$0xff]  }
 0x10d   :  { %5309 = vmatpush3.bf16.msra.mxu1 %v5817_v8 }
 0x10e   :  { %5310 = vmatprep.subr.bf16.mxu1 %v5820_v11  ;;  %v5863_v11 = vld [vmem:[%s7313_s1 + $0x928] sm:$0xff]  }
 0x10f   :  { %5289 = vmatpush3.bf16.msra.mxu0 %v5819_v10 }
 0x110   :  { %5290 = vmatprep.subr.bf16.mxu0 %v5822_v13 }
 0x111   :  { %5311 = vmatpush3.bf16.msra.mxu1 %v5821_v12 }
 0x112   :  { %5312 = vmatprep.subr.bf16.mxu1 %v5824_v17 }
 0x113   :  { %5291 = vmatpush3.bf16.msra.mxu0 %v5823_v15 }
 0x114   :  { %5292 = vmatprep.subr.bf16.mxu0 %v5826_v23  ;;  %v5870_v23 = vld [vmem:[%s7313_s1 + $0x978] sm:$0xff]  }
 0x115   :  { %v4990_v14 = vpop.f32.mrb[4].mxu0  ;;  %5313 = vmatpush3.bf16.msra.mxu1 %v5825_v20  ;;  %v5867_v20 = vld [vmem:[%s7313_s1 + $0x930] sm:$0xff]  }
 0x116   :  { %v4991_v16 = vpop.f32.mrb[5].mxu0  ;;  %5314 = vmatprep.subr.bf16.mxu1 %v5828_v28 }
 0x117   :  { %v4992_v18 = vadd.f32 %v4991_v16, %v4990_v14  ;;  %v4993_v19 = vpop.f32.mrb[6].mxu0  ;;  %v5012_v21 = vpop.f32.mrb[4].mxu1  ;;  %5293 = vmatpush3.bf16.msra.mxu0 %v5827_v25  ;;  %v5864_v14 = vld [vmem:[%s7313_s1 + $0x9e8] sm:$0xff]   ;;  %v5872_v25 = vld [vmem:[%s7313_s1 + $0x9f8] sm:$0xff]  }
 0x118   :  { %v4994_v24 = vpop.f32.mrb[7].mxu0  ;;  %v5013_v26 = vpop.f32.mrb[5].mxu1  ;;  %5294 = vmatprep.subr.bf16.mxu0 %v5830_v33  ;;  %v5865_v16 = vld [vmem:[%s7313_s1 + $0x9a8] sm:$0xff]   ;;  %v5866_v19 = vld [vmem:[%s7313_s1 + $0x970] sm:$0xff]  }
 0x119   :  { %v3476_v22 = vadd.f32 %v4992_v18, %v6791_v47  ;;  %v5014_v27 = vadd.f32 %v5013_v26, %v5012_v21  ;;  %v5015_v29 = vpop.f32.mrb[6].mxu1  ;;  %5315 = vmatpush3.bf16.msra.mxu1 %v5829_v30  ;;  %v4515_v47 = vcombine.high %v38_v45, %v38_v45  ;;  %v5868_v21 = vld [vmem:[%s7313_s1 + $0x9f0] sm:$0xff]   ;;  %v5871_v24 = vld [vmem:[%s7313_s1 + $0x938] sm:$0xff]   ;;  %v5876_v30 = vld [vmem:[%s7313_s1 + $0xa40] sm:$0xff]  }
 0x11a   :  { %v5016_v31 = vpop.f32.mrb[7].mxu1  ;;  %5316 = vmatprep.subr.bf16.mxu1 %v5832_v35  ;;  %v39_v26 = vld [vmem:[%s7314_s0 + $0x90] sm:$0xff]  ;;  %v5875_v29 = vld [vmem:[%s7313_s1 + $0x9b8] sm:$0xff]   ;;  %v5880_v35 = vld [vmem:[%s7313_s1 + $0xac0] sm:$0xff]  }
 0x11b   :  { %v6893_v32 = vadd.f32 %v5014_v27, %v3476_v22  ;;  %5295 = vmatpush3.bf16.msra.mxu0 %v5831_v34  ;;  %4073 = vmatprep.mubr.bf16.mxu1 %v4515_v47  ;;  %v5869_v22 = vld [vmem:[%s7313_s1 + $0x9b0] sm:$0xff]   ;;  %v4516_v27 = vcombine.low %v39_v26, %v39_v26  ;;  %v4517_v28 = vcombine.high %v39_v26, %v39_v26  ;;  %v40_v31 = vld [vmem:[%s7314_s0 + $0x98] sm:$0xff]  ;;  %v5879_v34 = vld [vmem:[%s7313_s1 + $0xa00] sm:$0xff]  }
 0x11c   :  { %5296 = vmatprep.subr.bf16.mxu0 %v5834_v37  ;;  %v4519_v33 = vcombine.high %v40_v31, %v40_v31  ;;  %v5882_v37 = vld [vmem:[%s7313_s1 + $0xa48] sm:$0xff]   ;;  %v5890_v45 = vld [vmem:[%s7313_s1 + $0xa58] sm:$0xff]  }
 0x11d   :  { %5317 = vmatpush3.bf16.msra.mxu1 %v5833_v36  ;;  %v5881_v36 = vld [vmem:[%s7313_s1 + $0xa80] sm:$0xff]   ;;  %v5892_v47 = vld [vmem:[%s7313_s1 + $0xad8] sm:$0xff]   ;;  %v5921_v26 = vld [vmem:[%s7313_s1 + $0xb88] sm:$0xff]  }
 0x11e   :  { %5318 = vmatprep.subr.bf16.mxu1 %v5836_v39  ;;  %v5884_v39 = vld [vmem:[%s7313_s1 + $0xac8] sm:$0xff]  }
 0x11f   :  { %5297 = vmatpush3.bf16.msra.mxu0 %v5835_v38  ;;  %v5883_v38 = vld [vmem:[%s7313_s1 + $0xa08] sm:$0xff]  }
 0x120   :  { %5326 = vmatprep.subr.bf16.mxu0 %v5840_v44  ;;  %v5889_v44 = vld [vmem:[%s7313_s1 + $0xa90] sm:$0xff]  }
 0x121   :  { %5319 = vmatpush3.bf16.msra.mxu1 %v5839_v43  ;;  %v5888_v43 = vld [vmem:[%s7313_s1 + $0xad0] sm:$0xff]  }
 0x122   :  { %4034 = vmatmul.mubr.bf16.vlgmr.msra.gmra.mrb[32].mxu0 %v4512_v41  ;;  %5348 = vmatprep.subr.bf16.mxu1 %v5844_v49  ;;  %v5886_v41 = vld [vmem:[%s7313_s1 + $0xa50] sm:$0xff]   ;;  %v5894_v49 = vld [vmem:[%s7313_s1 + $0xa60] sm:$0xff]  }
 0x123   :  { %5327 = vmatpush3.bf16.msra.mxu0 %v5843_v48  ;;  %4113 = vmatprep.mubr.bf16.mxu0 %v4517_v28  ;;  %v5893_v48 = vld [vmem:[%s7313_s1 + $0xa98] sm:$0xff]   ;;  %v5923_v28 = vld [vmem:[%s7313_s1 + $0xb10] sm:$0xff]  }
 0x124   :  { %4074 = vmatmul.mubr.bf16.vlgmr.msra.gmra.mrb[32].mxu1 %v4514_v46  ;;  %5328 = vmatprep.subr.bf16.mxu0 %v5846_v51  ;;  %v5891_v46 = vld [vmem:[%s7313_s1 + $0xa18] sm:$0xff]  }
 0x125   :  { %5349 = vmatpush3.bf16.msra.mxu1 %v5845_v50  ;;  %4153 = vmatprep.mubr.bf16.mxu1 %v4519_v33  ;;  %v5895_v50 = vld [vmem:[%s7313_s1 + $0xa20] sm:$0xff]   ;;  %v5928_v33 = vld [vmem:[%s7313_s1 + $0xbd8] sm:$0xff]  }
 0x126   :  { %5350 = vmatprep.subr.bf16.mxu1 %v5848_v53 }
 0x127   :  { %5329 = vmatpush3.bf16.msra.mxu0 %v5847_v52  ;;  %v5896_v52 = vld [vmem:[%s7313_s1 + $0xae0] sm:$0xff]  }
 0x128   :  { %5330 = vmatprep.subr.bf16.mxu0 %v5850_v55 }
 0x129   :  { %5351 = vmatpush3.bf16.msra.mxu1 %v5849_v54  ;;  %v5897_v54 = vld [vmem:[%s7313_s1 + $0xaa0] sm:$0xff]  }
 0x12a   :  { %5352 = vmatprep.subr.bf16.mxu1 %v5852_v57  ;;  %v5898_v57 = vld [vmem:[%s7313_s1 + $0xa68] sm:$0xff]  }
 0x12b   :  { %5331 = vmatpush3.bf16.msra.mxu0 %v5851_v56 }
 0x12c   :  { %5332 = vmatprep.subr.bf16.mxu0 %v5854_v59 }
 0x12d   :  { %5353 = vmatpush3.bf16.msra.mxu1 %v5853_v58 }
 0x12e   :  { %5354 = vmatprep.subr.bf16.mxu1 %v5856_v61 }
 0x12f   :  { %5333 = vmatpush3.bf16.msra.mxu0 %v5855_v60  ;;  %v5899_v60 = vld [vmem:[%s7313_s1 + $0xa28] sm:$0xff]  }
 0x130   :  { %5334 = vmatprep.subr.bf16.mxu0 %v5858_v63  ;;  %v5900_v63 = vld [vmem:[%s7313_s1 + $0xae8] sm:$0xff]  }
 0x131   :  { %5355 = vmatpush3.bf16.msra.mxu1 %v5857_v62 }
 0x132   :  { %5356 = vmatprep.subr.bf16.mxu1 %v5860_v3  ;;  %v5902_v3 = vld [vmem:[%s7313_s1 + $0xa70] sm:$0xff]  }
 0x133   :  { %5335 = vmatpush3.bf16.msra.mxu0 %v5859_v1  ;;  %v5901_v1 = vld [vmem:[%s7313_s1 + $0xaa8] sm:$0xff]  }
 0x134   :  { %5336 = vmatprep.subr.bf16.mxu0 %v5862_v9  ;;  %v5906_v9 = vld [vmem:[%s7313_s1 + $0xa78] sm:$0xff]  }
 0x135   :  { %v5034_v0 = vpop.f32.mrb[8].mxu0  ;;  %5357 = vmatpush3.bf16.msra.mxu1 %v5861_v6  ;;  %v5903_v6 = vld [vmem:[%s7313_s1 + $0xa30] sm:$0xff]  }
 0x136   :  { %v5035_v2 = vpop.f32.mrb[9].mxu0  ;;  %5358 = vmatprep.subr.bf16.mxu1 %v5864_v14 }
 0x137   :  { %v5036_v4 = vadd.f32 %v5035_v2, %v5034_v0  ;;  %v5037_v5 = vpop.f32.mrb[10].mxu0  ;;  %v5056_v7 = vpop.f32.mrb[8].mxu1  ;;  %5337 = vmatpush3.bf16.msra.mxu0 %v5863_v11  ;;  %v5908_v11 = vld [vmem:[%s7313_s1 + $0xaf8] sm:$0xff]  }
 0x138   :  { %v5038_v10 = vpop.f32.mrb[11].mxu0  ;;  %v5057_v12 = vpop.f32.mrb[9].mxu1  ;;  %5338 = vmatprep.subr.bf16.mxu0 %v5866_v19 }
 0x139   :  { %v3556_v8 = vadd.f32 %v5036_v4, %v6893_v32  ;;  %v5058_v13 = vadd.f32 %v5057_v12, %v5056_v7  ;;  %v5059_v15 = vpop.f32.mrb[10].mxu1  ;;  %5359 = vmatpush3.bf16.msra.mxu1 %v5865_v16  ;;  %v4518_v32 = vcombine.low %v40_v31, %v40_v31  ;;  %v5904_v7 = vld [vmem:[%s7313_s1 + $0xaf0] sm:$0xff]   ;;  %v5907_v10 = vld [vmem:[%s7313_s1 + $0xa38] sm:$0xff]   ;;  %v41_v12 = vld [vmem:[%s7314_s0 + $0xa0] sm:$0xff] }
 0x13a   :  { %v5060_v17 = vpop.f32.mrb[11].mxu1  ;;  %5360 = vmatprep.subr.bf16.mxu1 %v5868_v21  ;;  %v4521_v14 = vcombine.high %v41_v12, %v41_v12  ;;  %v5911_v15 = vld [vmem:[%s7313_s1 + $0xab8] sm:$0xff]   ;;  %v5912_v16 = vld [vmem:[%s7313_s1 + $0xb40] sm:$0xff]  }
 0x13b   :  { %v6998_v18 = vadd.f32 %v5058_v13, %v3556_v8  ;;  %5339 = vmatpush3.bf16.msra.mxu0 %v5867_v20  ;;  %v5905_v8 = vld [vmem:[%s7313_s1 + $0xab0] sm:$0xff]   ;;  %v4520_v13 = vcombine.low %v41_v12, %v41_v12  ;;  %v42_v17 = vld [vmem:[%s7314_s0 + $0xa8] sm:$0xff]  ;;  %v5915_v20 = vld [vmem:[%s7313_s1 + $0xb00] sm:$0xff]  }
 0x13c   :  { %5340 = vmatprep.subr.bf16.mxu0 %v5870_v23  ;;  %v4523_v19 = vcombine.high %v42_v17, %v42_v17  ;;  %v5916_v21 = vld [vmem:[%s7313_s1 + $0xbc0] sm:$0xff]   ;;  %v5918_v23 = vld [vmem:[%s7313_s1 + $0xb48] sm:$0xff]   ;;  %v5926_v31 = vld [vmem:[%s7313_s1 + $0xb58] sm:$0xff]  }
 0x13d   :  { %5361 = vmatpush3.bf16.msra.mxu1 %v5869_v22  ;;  %v5917_v22 = vld [vmem:[%s7313_s1 + $0xb80] sm:$0xff]  }
 0x13e   :  { %5362 = vmatprep.subr.bf16.mxu1 %v5872_v25  ;;  %v5920_v25 = vld [vmem:[%s7313_s1 + $0xbc8] sm:$0xff]  }
 0x13f   :  { %5341 = vmatpush3.bf16.msra.mxu0 %v5871_v24  ;;  %v5919_v24 = vld [vmem:[%s7313_s1 + $0xb08] sm:$0xff]  }
 0x140   :  { %5370 = vmatprep.subr.bf16.mxu0 %v5876_v30  ;;  %v5925_v30 = vld [vmem:[%s7313_s1 + $0xb90] sm:$0xff]  }
 0x141   :  { %5363 = vmatpush3.bf16.msra.mxu1 %v5875_v29  ;;  %v5924_v29 = vld [vmem:[%s7313_s1 + $0xbd0] sm:$0xff]  }
 0x142   :  { %4114 = vmatmul.mubr.bf16.vlgmr.msra.gmra.mrb[36].mxu0 %v4516_v27  ;;  %5392 = vmatprep.subr.bf16.mxu1 %v5880_v35  ;;  %v5922_v27 = vld [vmem:[%s7313_s1 + $0xb50] sm:$0xff]   ;;  %v5930_v35 = vld [vmem:[%s7313_s1 + $0xb60] sm:$0xff]  }
 0x143   :  { %5371 = vmatpush3.bf16.msra.mxu0 %v5879_v34  ;;  %4193 = vmatprep.mubr.bf16.mxu0 %v4521_v14  ;;  %v5929_v34 = vld [vmem:[%s7313_s1 + $0xb98] sm:$0xff]  }
 0x144   :  { %4154 = vmatmul.mubr.bf16.vlgmr.msra.gmra.mrb[36].mxu1 %v4518_v32  ;;  %5372 = vmatprep.subr.bf16.mxu0 %v5882_v37  ;;  %v5927_v32 = vld [vmem:[%s7313_s1 + $0xb18] sm:$0xff]   ;;  %v5931_v37 = vld [vmem:[%s7313_s1 + $0xb20] sm:$0xff]  }
 0x145   :  { %5393 = vmatpush3.bf16.msra.mxu1 %v5881_v36  ;;  %4233 = vmatprep.mubr.bf16.mxu1 %v4523_v19 }
 0x146   :  { %5394 = vmatprep.subr.bf16.mxu1 %v5884_v39  ;;  %v5932_v39 = vld [vmem:[%s7313_s1 + $0xbe0] sm:$0xff]  }
 0x147   :  { %5373 = vmatpush3.bf16.msra.mxu0 %v5883_v38 }
 0x148   :  { %5374 = vmatprep.subr.bf16.mxu0 %v5886_v41 }
 0x149   :  { %5395 = vmatpush3.bf16.msra.mxu1 %v5885_v40 }
 0x14a   :  { %5396 = vmatprep.subr.bf16.mxu1 %v5888_v43 }
 0x14b   :  { %5375 = vmatpush3.bf16.msra.mxu0 %v5887_v42  ;;  %v5933_v42 = vld [vmem:[%s7313_s1 + $0xba0] sm:$0xff]  }
 0x14c   :  { %5376 = vmatprep.subr.bf16.mxu0 %v5890_v45  ;;  %v5934_v45 = vld [vmem:[%s7313_s1 + $0xb68] sm:$0xff]  }
 0x14d   :  { %5397 = vmatpush3.bf16.msra.mxu1 %v5889_v44 }
 0x14e   :  { %5398 = vmatprep.subr.bf16.mxu1 %v5892_v47  ;;  %v5935_v47 = vld [vmem:[%s7313_s1 + $0xb28] sm:$0xff]  }
 0x14f   :  { %5377 = vmatpush3.bf16.msra.mxu0 %v5891_v46 }
 0x150   :  { %5378 = vmatprep.subr.bf16.mxu0 %v5894_v49 }
 0x151   :  { %5399 = vmatpush3.bf16.msra.mxu1 %v5893_v48 }
 0x152   :  { %5400 = vmatprep.subr.bf16.mxu1 %v5896_v52  ;;  %v5937_v52 = vld [vmem:[%s7313_s1 + $0xba8] sm:$0xff]  }
 0x153   :  { %5379 = vmatpush3.bf16.msra.mxu0 %v5895_v50  ;;  %v5936_v50 = vld [vmem:[%s7313_s1 + $0xbe8] sm:$0xff]  }
 0x154   :  { %5380 = vmatprep.subr.bf16.mxu0 %v5898_v57  ;;  %v5940_v57 = vld [vmem:[%s7313_s1 + $0xbf0] sm:$0xff]  }
 0x155   :  { %v5078_v51 = vpop.f32.mrb[12].mxu0  ;;  %5401 = vmatpush3.bf16.msra.mxu1 %v5897_v54 }
 0x156   :  { %v5079_v53 = vpop.f32.mrb[13].mxu0  ;;  %5402 = vmatprep.subr.bf16.mxu1 %v5900_v63 }
 0x157   :  { %v5080_v55 = vadd.f32 %v5079_v53, %v5078_v51  ;;  %v5081_v56 = vpop.f32.mrb[14].mxu0  ;;  %v5100_v58 = vpop.f32.mrb[12].mxu1  ;;  %5381 = vmatpush3.bf16.msra.mxu0 %v5899_v60  ;;  %v5943_v60 = vld [vmem:[%s7313_s1 + $0xb38] sm:$0xff]  }
 0x158   :  { %v5082_v61 = vpop.f32.mrb[15].mxu0  ;;  %v5101_v62 = vpop.f32.mrb[13].mxu1  ;;  %5382 = vmatprep.subr.bf16.mxu0 %v5902_v3  ;;  %v5939_v56 = vld [vmem:[%s7313_s1 + $0xb30] sm:$0xff]   ;;  %v44_v3 = vld [vmem:[%s7314_s0 + $0xb8] sm:$0xff] }
 0x159   :  { %v3636_v59 = vadd.f32 %v5080_v55, %v6998_v18  ;;  %v5102_v0 = vadd.f32 %v5101_v62, %v5100_v58  ;;  %v5103_v2 = vpop.f32.mrb[14].mxu1  ;;  %5403 = vmatpush3.bf16.msra.mxu1 %v5901_v1  ;;  %v4522_v18 = vcombine.low %v42_v17, %v42_v17  ;;  %v5938_v55 = vld [vmem:[%s7313_s1 + $0xb70] sm:$0xff]   ;;  %v5944_v61 = vld [vmem:[%s7313_s1 + $0xbf8] sm:$0xff]  }
 0x15a   :  { %v5104_v4 = vpop.f32.mrb[15].mxu1  ;;  %5404 = vmatprep.subr.bf16.mxu1 %v5904_v7  ;;  %v5941_v58 = vld [vmem:[%s7313_s1 + $0xbb0] sm:$0xff]   ;;  %v5947_v1 = vld [vmem:[%s7313_s1 + $0xbb8] sm:$0xff]   ;;  %v5967_v2 = vmov 0.0   ;;  %v5951_v7 = vld [vmem:[%s7313_s1 + $0xc08] sm:$0xff]  }
 0x15b   :  { %v7106_v5 = vadd.f32 %v5102_v0, %v3636_v59  ;;  %5383 = vmatpush3.bf16.msra.mxu0 %v5903_v6  ;;  %v5942_v59 = vld [vmem:[%s7313_s1 + $0xb78] sm:$0xff]   ;;  %v43_v62 = vld [vmem:[%s7314_s0 + $0xb0] sm:$0xff]  ;;  %v4526_v4 = vcombine.low %v44_v3, %v44_v3  ;;  %v5950_v6 = vld [vmem:[%s7313_s1 + $0xc00] sm:$0xff]  }
 0x15c   :  { %5384 = vmatprep.subr.bf16.mxu0 %v5906_v9  ;;  %v4524_v63 = vcombine.low %v43_v62, %v43_v62  ;;  %v4525_v0 = vcombine.high %v43_v62, %v43_v62  ;;  %v5953_v9 = vld [vmem:[%s7313_s1 + $0xc18] sm:$0xff]  }
 0x15d   :  { %5405 = vmatpush3.bf16.msra.mxu1 %v5905_v8  ;;  %v5952_v8 = vld [vmem:[%s7313_s1 + $0xc10] sm:$0xff]  }
 0x15e   :  { %5406 = vmatprep.subr.bf16.mxu1 %v5908_v11 }
 0x15f   :  { %5385 = vmatpush3.bf16.msra.mxu0 %v5907_v10  ;;  %v5954_v10 = vld [vmem:[%s7313_s1 + $0xc20] sm:$0xff]  }
 0x160   :  { %5414 = vmatprep.subr.bf16.mxu0 %v5912_v16  ;;  %v5955_v16 = vld [vmem:[%s7313_s1 + $0xc28] sm:$0xff]  }
 0x161   :  { %5407 = vmatpush3.bf16.msra.mxu1 %v5911_v15 }
 0x162   :  { %4194 = vmatmul.mubr.bf16.vlgmr.msra.gmra.mrb[40].mxu0 %v4520_v13  ;;  %5436 = vmatprep.subr.bf16.mxu1 %v5916_v21 }
 0x163   :  { %5415 = vmatpush3.bf16.msra.mxu0 %v5915_v20  ;;  %4273 = vmatprep.mubr.bf16.mxu0 %v4525_v0 }
 0x164   :  { %4234 = vmatmul.mubr.bf16.vlgmr.msra.gmra.mrb[40].mxu1 %v4522_v18  ;;  %5416 = vmatprep.subr.bf16.mxu0 %v5918_v23 }
 0x165   :  { %5437 = vmatpush3.bf16.msra.mxu1 %v5917_v22 }
 0x166   :  { %5438 = vmatprep.subr.bf16.mxu1 %v5920_v25  ;;  %v5957_v25 = vld [vmem:[%s7313_s1 + $0xc38] sm:$0xff]  }
 0x167   :  { %5417 = vmatpush3.bf16.msra.mxu0 %v5919_v24  ;;  %v5956_v24 = vld [vmem:[%s7313_s1 + $0xc30] sm:$0xff]  }
 0x168   :  { %5418 = vmatprep.subr.bf16.mxu0 %v5922_v27 }
 0x169   :  { %5439 = vmatpush3.bf16.msra.mxu1 %v5921_v26  ;;  %v5958_v26 = vld [vmem:[%s7314_s0 + $0xc0] ss:$0 sps:$4 sm:$0xff]  }
 0x16a   :  { %5440 = vmatprep.subr.bf16.mxu1 %v5924_v29 }
 0x16b   :  { %5419 = vmatpush3.bf16.msra.mxu0 %v5923_v28 }
 0x16c   :  { %5420 = vmatprep.subr.bf16.mxu0 %v5926_v31 }
 0x16d   :  { %5441 = vmatpush3.bf16.msra.mxu1 %v5925_v30 }
 0x16e   :  { %5442 = vmatprep.subr.bf16.mxu1 %v5928_v33 }
 0x16f   :  { %5421 = vmatpush3.bf16.msra.mxu0 %v5927_v32 }
 0x170   :  { %5422 = vmatprep.subr.bf16.mxu0 %v5930_v35 }
 0x171   :  { %5443 = vmatpush3.bf16.msra.mxu1 %v5929_v34 }
 0x172   :  { %5444 = vmatprep.subr.bf16.mxu1 %v5932_v39 }
 0x173   :  { %5423 = vmatpush3.bf16.msra.mxu0 %v5931_v37 }
 0x174   :  { %5424 = vmatprep.subr.bf16.mxu0 %v5934_v45 }
 0x175   :  { %v5122_v36 = vpop.f32.mrb[16].mxu0  ;;  %5445 = vmatpush3.bf16.msra.mxu1 %v5933_v42 }
 0x176   :  { %v5123_v38 = vpop.f32.mrb[17].mxu0  ;;  %5446 = vmatprep.subr.bf16.mxu1 %v5936_v50 }
 0x177   :  { %v5124_v40 = vadd.f32 %v5123_v38, %v5122_v36  ;;  %v5125_v41 = vpop.f32.mrb[18].mxu0  ;;  %v5144_v43 = vpop.f32.mrb[16].mxu1  ;;  %5425 = vmatpush3.bf16.msra.mxu0 %v5935_v47 }
 0x178   :  { %v5126_v46 = vpop.f32.mrb[19].mxu0  ;;  %v5145_v48 = vpop.f32.mrb[17].mxu1  ;;  %5426 = vmatprep.subr.bf16.mxu0 %v5938_v55  ;;  %v5963_v55 = vld [vmem:[%s7316_s3 + $0x20] sm:$0xff]  }
 0x179   :  { %v3716_v44 = vadd.f32 %v5124_v40, %v7106_v5  ;;  %v5146_v49 = vadd.f32 %v5145_v48, %v5144_v43  ;;  %v5147_v51 = vpop.f32.mrb[18].mxu1  ;;  %5447 = vmatpush3.bf16.msra.mxu1 %v5937_v52  ;;  %v4527_v5 = vcombine.high %v44_v3, %v44_v3  ;;  %v5960_v52 = vld [vmem:[%s7316_s3 + $0x8] sm:$0xff]   ;;  %v5966_v3 = vld [vmem:[%s7316_s3 + $0x38] sm:$0xff]  }
 0x17a   :  { %v5148_v53 = vpop.f32.mrb[19].mxu1  ;;  %5448 = vmatprep.subr.bf16.mxu1 %v5940_v57  ;;  %v5959_v51 = vld [vmem:[%s7316_s3] sm:$0xff]  }
 0x17b   :  { %v3756_v54 = vadd.f32 %v5146_v49, %v3716_v44  ;;  %5427 = vmatpush3.bf16.msra.mxu0 %v5939_v56  ;;  %4313 = vmatprep.mubr.bf16.mxu1 %v4527_v5  ;;  %v5961_v53 = vld [vmem:[%s7316_s3 + $0x10] sm:$0xff]   ;;  %v5964_v56 = vld [vmem:[%s7316_s3 + $0x28] sm:$0xff]  }
 0x17c   :  { %5428 = vmatprep.subr.bf16.mxu0 %v5942_v59 }
 0x17d   :  { %5449 = vmatpush3.bf16.msra.mxu1 %v5941_v58  ;;  %v5965_v58 = vld [vmem:[%s7316_s3 + $0x30] sm:$0xff]  }
 0x17e   :  { %5450 = vmatprep.subr.bf16.mxu1 %v5944_v61 }
 0x17f   :  { %5429 = vmatpush3.bf16.msra.mxu0 %v5943_v60 }
 0x180   :  { %5476 = vmatprep.subr.bf16.mxu0 %v5967_v2 }
 0x181   :  { %5451 = vmatpush3.bf16.msra.mxu1 %v5947_v1 }
 0x182   :  { %4274 = vmatmul.mubr.bf16.vlgmr.msra.gmra.mrb[44].mxu0 %v4524_v63  ;;  %5496 = vmatprep.subr.bf16.mxu1 %v5967_v2 }
 0x183   :  { %5477 = vmatpush3.bf16.msra.mxu0 %v5950_v6  ;;  %5492 = vmatprep.mubr.msk.bf16.mxu0 %vm5968_vm0, %v5967_v2 }
 0x184   :  { %4314 = vmatmul.mubr.bf16.vlgmr.msra.gmra.mrb[44].mxu1 %v4526_v4  ;;  %5478 = vmatprep.subr.bf16.mxu0 %v5967_v2 }
 0x185   :  { %5512 = vmatprep.mubr.msk.bf16.mxu1 %vm5968_vm0, %v5967_v2  ;;  %5497 = vmatpush3.bf16.msra.mxu1 %v5959_v51 }
 0x186   :  { %5498 = vmatprep.subr.bf16.mxu1 %v5967_v2 }
 0x187   :  { %5479 = vmatpush3.bf16.msra.mxu0 %v5951_v7 }
 0x188   :  { %5480 = vmatprep.subr.bf16.mxu0 %v5967_v2 }
 0x189   :  { %5499 = vmatpush3.bf16.msra.mxu1 %v5960_v52 }
 0x18a   :  { %5500 = vmatprep.subr.bf16.mxu1 %v5967_v2 }
 0x18b   :  { %5481 = vmatpush3.bf16.msra.mxu0 %v5952_v8 }
 0x18c   :  { %5482 = vmatprep.subr.bf16.mxu0 %v5967_v2 }
 0x18d   :  { %5501 = vmatpush3.bf16.msra.mxu1 %v5961_v53 }
 0x18e   :  { %5502 = vmatprep.subr.bf16.mxu1 %v5967_v2 }
 0x18f   :  { %5483 = vmatpush3.bf16.msra.mxu0 %v5953_v9 }
 0x190   :  { %5484 = vmatprep.subr.bf16.mxu0 %v5967_v2 }
 0x193   :  { %5485 = vmatpush3.bf16.msra.mxu0 %v5954_v10 }
 0x194   :  { %5486 = vmatprep.subr.bf16.mxu0 %v5967_v2 }
 0x195   :  { %v5166_v11 = vpop.f32.mrb[20].mxu0 }
 0x196   :  { %v5167_v12 = vpop.f32.mrb[21].mxu0 }
 0x197   :  { %v5168_v13 = vadd.f32 %v5167_v12, %v5166_v11  ;;  %v5169_v14 = vpop.f32.mrb[22].mxu0  ;;  %v5188_v15 = vpop.f32.mrb[20].mxu1  ;;  %5487 = vmatpush3.bf16.msra.mxu0 %v5955_v16 }
 0x198   :  { %v5170_v17 = vpop.f32.mrb[23].mxu0  ;;  %v5189_v18 = vpop.f32.mrb[21].mxu1  ;;  %5488 = vmatprep.subr.bf16.mxu0 %v5967_v2 }
 0x199   :  { %v3796_v19 = vadd.f32 %v5168_v13, %v3756_v54  ;;  %v5190_v20 = vadd.f32 %v5189_v18, %v5188_v15  ;;  %v5191_v21 = vpop.f32.mrb[22].mxu1  ;;  %v5962_v54 = vld [vmem:[%s7316_s3 + $0x18] sm:$0xff]  }
 0x19a   :  { %v5192_v22 = vpop.f32.mrb[23].mxu1  ;;  %5503 = vmatpush3.bf16.msra.mxu1 %v5962_v54 }
 0x19b   :  { %v3836_v23 = vadd.f32 %v5190_v20, %v3796_v19  ;;  %5489 = vmatpush3.bf16.msra.mxu0 %v5956_v24  ;;  %5504 = vmatprep.subr.bf16.mxu1 %v5967_v2 }
 0x19c   :  { %5490 = vmatprep.subr.bf16.mxu0 %v5967_v2 }
 0x19e   :  { %5505 = vmatpush3.bf16.msra.mxu1 %v5963_v55 }
 0x19f   :  { %5491 = vmatpush3.bf16.msra.mxu0 %v5957_v25  ;;  %5506 = vmatprep.subr.bf16.mxu1 %v5967_v2 }
 0x1a2   :  { %5493 = vmatmul.mubr.bf16.vlgmr.msra.gmra.mrb[48].mxu0 %v5958_v26  ;;  %5507 = vmatpush3.bf16.msra.mxu1 %v5964_v56 }
 0x1a3   :  { %5508 = vmatprep.subr.bf16.mxu1 %v5967_v2 }
 0x1a6   :  { %5509 = vmatpush3.bf16.msra.mxu1 %v5965_v58 }
 0x1a7   :  { %5510 = vmatprep.subr.bf16.mxu1 %v5967_v2 }
 0x1aa   :  { %5511 = vmatpush3.bf16.msra.mxu1 %v5966_v3 }
 0x1b5   :  { %v5210_v27 = vpop.f32.mrb[24].mxu0 }
 0x1b6   :  { %v5211_v28 = vpop.f32.mrb[25].mxu0 }
 0x1b7   :  { %v5212_v29 = vadd.f32 %v5211_v28, %v5210_v27  ;;  %v5213_v30 = vpop.f32.mrb[26].mxu0  ;;  %v5232_v31 = vpop.f32.mrb[24].mxu1 }
 0x1b8   :  { %v5214_v32 = vpop.f32.mrb[27].mxu0  ;;  %v5233_v33 = vpop.f32.mrb[25].mxu1 }
 0x1b9   :  { %v3876_v34 = vadd.f32 %v5212_v29, %v3836_v23  ;;  %v5234_v35 = vadd.f32 %v5233_v33, %v5232_v31  ;;  %v5235_v36 = vpop.f32.mrb[26].mxu1 }
 0x1ba   :  { %v5236_v37 = vpop.f32.mrb[27].mxu1 }
 0x1bb   :  { %v3916_v38 = vadd.f32 %v5234_v35, %v3876_v34 }
 0x1d5   :  { %v5254_v39 = vpop.f32.mrb[28].mxu0 }
 0x1d6   :  { %v5255_v40 = vpop.f32.mrb[29].mxu0 }
 0x1d7   :  { %v5256_v41 = vadd.f32 %v5255_v40, %v5254_v39  ;;  %v5257_v42 = vpop.f32.mrb[30].mxu0  ;;  %v5276_v43 = vpop.f32.mrb[28].mxu1 }
 0x1d8   :  { %v5258_v44 = vpop.f32.mrb[31].mxu0  ;;  %v5277_v45 = vpop.f32.mrb[29].mxu1 }
 0x1d9   :  { %v3956_v46 = vadd.f32 %v5256_v41, %v3916_v38  ;;  %v5278_v47 = vadd.f32 %v5277_v45, %v5276_v43  ;;  %v5279_v48 = vpop.f32.mrb[30].mxu1 }
 0x1da   :  { %v5280_v49 = vpop.f32.mrb[31].mxu1 }
 0x1db   :  { %v3996_v50 = vadd.f32 %v5278_v47, %v3956_v46 }
 0x1f5   :  { %v5298_v57 = vpop.f32.mrb[32].mxu0 }
 0x1f6   :  { %v5299_v59 = vpop.f32.mrb[33].mxu0 }
 0x1f7   :  { %v5300_v60 = vadd.f32 %v5299_v59, %v5298_v57  ;;  %v5301_v61 = vpop.f32.mrb[34].mxu0  ;;  %v5320_v62 = vpop.f32.mrb[32].mxu1 }
 0x1f8   :  { %v5302_v63 = vpop.f32.mrb[35].mxu0  ;;  %v5321_v1 = vpop.f32.mrb[33].mxu1 }
 0x1f9   :  { %v4036_v0 = vadd.f32 %v5300_v60, %v3996_v50  ;;  %v5322_v4 = vadd.f32 %v5321_v1, %v5320_v62  ;;  %v5323_v5 = vpop.f32.mrb[34].mxu1  ;;  %v4921_v50 = vld [vmem:[%s7317_s4] ss:$0 sm:$0xff] }
 0x1fa   :  { %v5324_v6 = vpop.f32.mrb[35].mxu1 }
 0x1fb   :  { %v4076_v7 = vadd.f32 %v5322_v4, %v4036_v0 }
 0x215   :  { %v5342_v8 = vpop.f32.mrb[36].mxu0 }
 0x216   :  { %v5343_v9 = vpop.f32.mrb[37].mxu0 }
 0x217   :  { %v5344_v10 = vadd.f32 %v5343_v9, %v5342_v8  ;;  %v5345_v11 = vpop.f32.mrb[38].mxu0  ;;  %v5364_v12 = vpop.f32.mrb[36].mxu1 }
 0x218   :  { %v5346_v13 = vpop.f32.mrb[39].mxu0  ;;  %v5365_v14 = vpop.f32.mrb[37].mxu1 }
 0x219   :  { %v4116_v15 = vadd.f32 %v5344_v10, %v4076_v7  ;;  %v5366_v2 = vadd.f32 %v5365_v14, %v5364_v12  ;;  %v5367_v16 = vpop.f32.mrb[38].mxu1 }
 0x21a   :  { %v5368_v17 = vpop.f32.mrb[39].mxu1 }
 0x21b   :  { %v4156_v18 = vadd.f32 %v5366_v2, %v4116_v15 }
 0x235   :  { %v5386_v19 = vpop.f32.mrb[40].mxu0 }
 0x236   :  { %v5387_v20 = vpop.f32.mrb[41].mxu0 }
 0x237   :  { %v5388_v21 = vadd.f32 %v5387_v20, %v5386_v19  ;;  %v5389_v22 = vpop.f32.mrb[42].mxu0  ;;  %v5408_v23 = vpop.f32.mrb[40].mxu1 }
 0x238   :  { %v5390_v24 = vpop.f32.mrb[43].mxu0  ;;  %v5409_v25 = vpop.f32.mrb[41].mxu1 }
 0x239   :  { %v4196_v26 = vadd.f32 %v5388_v21, %v4156_v18  ;;  %v5410_v27 = vadd.f32 %v5409_v25, %v5408_v23  ;;  %v5411_v28 = vpop.f32.mrb[42].mxu1 }
 0x23a   :  { %v5412_v29 = vpop.f32.mrb[43].mxu1 }
 0x23b   :  { %v4236_v30 = vadd.f32 %v5410_v27, %v4196_v26 }
 0x255   :  { %v5430_v31 = vpop.f32.mrb[44].mxu0 }
 0x256   :  { %v5431_v32 = vpop.f32.mrb[45].mxu0 }
 0x257   :  { %v5432_v33 = vadd.f32 %v5431_v32, %v5430_v31  ;;  %v5433_v34 = vpop.f32.mrb[46].mxu0  ;;  %v5452_v35 = vpop.f32.mrb[44].mxu1 }
 0x258   :  { %v5434_v36 = vpop.f32.mrb[47].mxu0  ;;  %v5453_v37 = vpop.f32.mrb[45].mxu1 }
 0x259   :  { %v4276_v38 = vadd.f32 %v5432_v33, %v4236_v30  ;;  %v5454_v39 = vadd.f32 %v5453_v37, %v5452_v35  ;;  %v5455_v40 = vpop.f32.mrb[46].mxu1 }
 0x25a   :  { %v5456_v41 = vpop.f32.mrb[47].mxu1 }
 0x25b   :  { %v4316_v42 = vadd.f32 %v5454_v39, %v4276_v38 }
 0x275   :  { %v4355_v43 = vpop.f32.mrb[48].mxu0 }
 0x276   :  { %v4356_v44 = vadd.f32 %v4355_v43, %v4316_v42  ;;  %v5494_v45 = vpop.f32.mrb[49].mxu0 }
 0x277   :  { %v4358_v46 = vpop.f32.mrb[50].mxu0 }
 0x278   :  { %v4361_v47 = vmax.f32 %v4356_v44, 0.0  ;;  %v5495_v48 = vpop.f32.mrb[51].mxu0 }
 0x27a   :  { %v4362_v49 = vpack.c.bf16 %v4361_v47, %v4361_v47 }
 0x27c   :  { %5513 = vmatmul.mubr.bf16.vlgmr.msra.gmra.mrb[48].mxu1 %v4362_v49 }
 0x34f   :  { %v4468_v51 = vpop.f32.mrb[48].mxu1 }
 0x350   :  { %v4469_v52 = vadd.f32 %v4921_v50, %v4468_v51  ;;  %v5514_v53 = vpop.f32.mrb[49].mxu1 }
 0x351   :  { %v4471_v54 = vpop.f32.mrb[50].mxu1 }
 0x352   :  { %4474 = vst [vmem:[%s7318_s5] sm:$0xff] %v4469_v52  ;;  %v5515_v55 = vpop.f32.mrb[51].mxu1 }

</bundles_post_ra>
